<compile_context>
chip_gen: v7x
topology: tpu7x:2x2x1
jax: 0.10.0
libtpu: 0.0.40
codegen_flags: <defaults>
</compile_context>

<pallas_src>
import math
from functools import partial
from typing import Dict

import jax
import jax.numpy as jnp
from jax.experimental import pallas as pl
from jax.experimental.pallas import tpu as pltpu


# ----------------------------------------------------------------------------
# helpers
# ----------------------------------------------------------------------------
def _round_up(x: int, m: int) -> int:
    return (x + m - 1) // m * m


# ----------------------------------------------------------------------------
# Pallas kernel 1: tiled matmul + bias  (backbone of every convolution)
# ----------------------------------------------------------------------------
def _matmul_bias_kernel(x_ref, w_ref, b_ref, o_ref, acc_ref):
    @pl.when(pl.program_id(2) == 0)
    def _init():
        acc_ref[...] = jnp.zeros_like(acc_ref)

    acc_ref[...] += jnp.dot(x_ref[...], w_ref[...],
                            preferred_element_type=jnp.float32)

    @pl.when(pl.program_id(2) == pl.num_programs(2) - 1)
    def _finalize():
        o_ref[...] = (acc_ref[...] + b_ref[...]).astype(o_ref.dtype)


def matmul_bias(x, w, b, *, tm=256, tk=512, tn=256):
    """(M, K) @ (K, N) + b with fp32 accumulation, MXU-tiled, zero-padded to tiles."""
    M, K = x.shape
    Kw, N = w.shape
    assert K == Kw, (K, Kw)

    tm = min(tm, _round_up(M, 8))
    tk = min(tk, _round_up(K, 128))
    tn = min(tn, _round_up(N, 128))
    Mp, Kp, Np = _round_up(M, tm), _round_up(K, tk), _round_up(N, tn)

    xp = jnp.pad(x, ((0, Mp - M), (0, Kp - K)))
    wp = jnp.pad(w, ((0, Kp - K), (0, Np - N)))
    bp = jnp.pad(b.reshape(1, -1), ((0, 0), (0, Np - N)))

    out = pl.pallas_call(
        _matmul_bias_kernel,
        out_shape=jax.ShapeDtypeStruct((Mp, Np), jnp.float32),
        grid_spec=pltpu.PrefetchScalarGridSpec(
            num_scalar_prefetch=0,
            grid=(Mp // tm, Np // tn, Kp // tk),
            in_specs=[
                pl.BlockSpec((tm, tk), lambda i, j, k: (i, k)),
                pl.BlockSpec((tk, tn), lambda i, j, k: (k, j)),
                pl.BlockSpec((1, tn), lambda i, j, k: (0, j)),
            ],
            out_specs=pl.BlockSpec((tm, tn), lambda i, j, k: (i, j)),
            scratch_shapes=[pltpu.VMEM((tm, tn), jnp.float32)],
        ),
        compiler_params=pltpu.CompilerParams(
            dimension_semantics=("parallel", "parallel", "arbitrary")),
        cost_estimate=pl.CostEstimate(
            flops=2 * Mp * Kp * Np,
            transcendentals=0,
            bytes_accessed=4 * (Mp * Kp + Kp * Np + Mp * Np)),
    )(xp, wp, bp)
    return out[:M, :N]


# ----------------------------------------------------------------------------
# Pallas kernels 2/3: GroupNorm (num_groups=32, eps=1e-6) + optional fused Swish
# ----------------------------------------------------------------------------
def _gn_stats_kernel(x_ref, o_ref):
    x = x_ref[...].astype(jnp.float32)                      # (P, C)
    o_ref[0:1, :] = jnp.sum(x, axis=0, keepdims=True)       # per-channel sum
    o_ref[1:2, :] = jnp.sum(x * x, axis=0, keepdims=True)   # per-channel sum of squares


def _gn_apply_kernel(x_ref, mean_ref, rstd_ref, gamma_ref, beta_ref, o_ref, *,
                     apply_swish):
    x = x_ref[...].astype(jnp.float32)                      # (P, C)
    y = (x - mean_ref[...]) * rstd_ref[...] * gamma_ref[...] + beta_ref[...]
    if apply_swish:
        y = y * (1.0 / (1.0 + jnp.exp(-y)))                 # Swish: y * sigmoid(y)
    o_ref[...] = y.astype(o_ref.dtype)


def group_norm(x_nhwc, gamma, beta, *, eps=1e-6, swish=False):
    """PyTorch GroupNorm(32, C) semantics (biased var), NHWC, optional fused Swish."""
    N, H, W, C = x_nhwc.shape
    P = H * W
    G = min(32, C)
    assert C % G == 0, (C, G)
    gs = C // G
    x2 = x_nhwc.reshape(N, P, C)

    img_spec = pl.BlockSpec((None, P, C), lambda n: (n, 0, 0))

    # Pass 1 (Pallas): per-image per-channel sum / sum-of-squares.
    stats = pl.pallas_call(
        _gn_stats_kernel,
        out_shape=jax.ShapeDtypeStruct((N, 2, C), jnp.float32),
        grid_spec=pltpu.PrefetchScalarGridSpec(
            num_scalar_prefetch=0, grid=(N,),
            in_specs=[img_spec],
            out_specs=pl.BlockSpec((None, 2, C), lambda n: (n, 0, 0))),
        compiler_params=pltpu.CompilerParams(dimension_semantics=("parallel",)),
    )(x2)

    # Tiny (N, G)-sized group aggregation in XLA (negligible scalar-scale work).
    s = stats[:, 0, :].reshape(N, G, gs).sum(-1)
    q = stats[:, 1, :].reshape(N, G, gs).sum(-1)
    cnt = float(P * gs)
    mean_g = s / cnt
    var_g = q / cnt - mean_g * mean_g
    rstd_g = 1.0 / jnp.sqrt(var_g + eps)
    mean_c = jnp.repeat(mean_g, gs, axis=1).reshape(N, 1, C)
    rstd_c = jnp.repeat(rstd_g, gs, axis=1).reshape(N, 1, C)

    # Pass 2 (Pallas): normalize + affine (+ fused Swish).
    stat_spec = pl.BlockSpec((None, 1, C), lambda n: (n, 0, 0))
    vec_spec = pl.BlockSpec((1, C), lambda n: (0, 0))
    out = pl.pallas_call(
        partial(_gn_apply_kernel, apply_swish=swish),
        out_shape=jax.ShapeDtypeStruct((N, P, C), x_nhwc.dtype),
        grid_spec=pltpu.PrefetchScalarGridSpec(
            num_scalar_prefetch=0, grid=(N,),
            in_specs=[img_spec, stat_spec, stat_spec, vec_spec, vec_spec],
            out_specs=img_spec),
        compiler_params=pltpu.CompilerParams(dimension_semantics=("parallel",)),
    )(x2, mean_c, rstd_c, gamma, beta)
    # TODO(synk): for production H*W, tile spatially (block-wise two-pass reduction)
    # instead of holding one full (H*W, C) image per grid step.
    return out.reshape(N, H, W, C)


# ----------------------------------------------------------------------------
# Pallas kernel 4: NonLocalBlock spatial attention  softmax(q k^T / sqrt(C)) v
# ----------------------------------------------------------------------------
def _attention_kernel(q_ref, kt_ref, v_ref, o_ref, *, scale):
    q = q_ref[...].astype(jnp.float32)                      # (P, C)
    kt = kt_ref[...].astype(jnp.float32)                    # (C, P)
    v = v_ref[...].astype(jnp.float32)                      # (P, C)
    s = jnp.dot(q, kt, preferred_element_type=jnp.float32) * scale   # (P, P)
    s = s - jnp.max(s, axis=-1, keepdims=True)
    p = jnp.exp(s)
    p = p / jnp.sum(p, axis=-1, keepdims=True)
    o_ref[...] = jnp.dot(p, v, preferred_element_type=jnp.float32).astype(o_ref.dtype)


def spatial_attention(q, k, v):
    """q, k, v: (N, P, C);  out[n, i] = sum_j softmax_j(q_i.k_j / sqrt(C)) v_j."""
    N, P, C = q.shape
    kt = jnp.swapaxes(k, 1, 2)                              # (N, C, P), lane-dense rhs
    qv_spec = pl.BlockSpec((None, P, C), lambda n: (n, 0, 0))
    kt_spec = pl.BlockSpec((None, C, P), lambda n: (n, 0, 0))
    # TODO(synk): whole (P, P) score matrix per image; switch to a flash-style
    # online-softmax tiling for production latent resolutions.
    return pl.pallas_call(
        partial(_attention_kernel, scale=float(C) ** -0.5),
        out_shape=jax.ShapeDtypeStruct((N, P, C), q.dtype),
        grid_spec=pltpu.PrefetchScalarGridSpec(
            num_scalar_prefetch=0, grid=(N,),
            in_specs=[qv_spec, kt_spec, qv_spec],
            out_specs=qv_spec),
        compiler_params=pltpu.CompilerParams(dimension_semantics=("parallel",)),
    )(q, kt, v)


# ----------------------------------------------------------------------------
# Convolution / upsample wrappers (data layout in XLA, FLOPs in Pallas)
# ----------------------------------------------------------------------------
def conv2d_3x3(x_nhwc, w_flat, b):
    """3x3 / stride 1 / pad 1 conv via im2col + Pallas matmul. w_flat: (9*Cin, Cout)."""
    N, H, W, C = x_nhwc.shape
    xp = jnp.pad(x_nhwc, ((0, 0), (1, 1), (1, 1), (0, 0)))
    # TODO(synk): patch extraction (9x read blow-up) is left to XLA; a fused
    # halo-DMA conv kernel would avoid it at production resolutions.
    cols = [xp[:, dh:dh + H, dw:dw + W, :] for dh in range(3) for dw in range(3)]
    patches = jnp.concatenate(cols, axis=-1).reshape(N * H * W, 9 * C)
    y = matmul_bias(patches, w_flat, b)
    return y.reshape(N, H, W, w_flat.shape[1])


def conv2d_1x1(x_nhwc, w, b):
    N, H, W, C = x_nhwc.shape
    y = matmul_bias(x_nhwc.reshape(N * H * W, C), w, b)
    return y.reshape(N, H, W, w.shape[1])


def upsample_nearest_2x(x_nhwc):
    # F.interpolate(scale_factor=2.0, mode='nearest'): pure data movement -> XLA.
    return jnp.repeat(jnp.repeat(x_nhwc, 2, axis=1), 2, axis=2)


# ----------------------------------------------------------------------------
# parameter init + building blocks (ResidualBlock / NonLocalBlock / UpSample)
# ----------------------------------------------------------------------------
def _init_conv3x3(key, cin, cout):
    w = jax.random.normal(key, (9 * cin, cout), jnp.float32) / math.sqrt(9 * cin)
    return {'w': w, 'b': jnp.zeros((cout,), jnp.float32)}


def _init_conv1x1(key, cin, cout):
    w = jax.random.normal(key, (cin, cout), jnp.float32) / math.sqrt(cin)
    return {'w': w, 'b': jnp.zeros((cout,), jnp.float32)}


def _init_group_norm(c):
    return {'gamma': jnp.ones((1, c), jnp.float32),
            'beta': jnp.zeros((1, c), jnp.float32)}


def _init_residual_block(key, cin, cout):
    k1, k2, k3 = jax.random.split(key, 3)
    p = {'gn1': _init_group_norm(cin),
         'conv1': _init_conv3x3(k1, cin, cout),
         'gn2': _init_group_norm(cout),
         'conv2': _init_conv3x3(k2, cout, cout)}
    if cin != cout:
        p['channel_up'] = _init_conv1x1(k3, cin, cout)
    return p


def _apply_residual_block(p, x):
    h = group_norm(x, p['gn1']['gamma'], p['gn1']['beta'], swish=True)
    h = conv2d_3x3(h, p['conv1']['w'], p['conv1']['b'])
    h = group_norm(h, p['gn2']['gamma'], p['gn2']['beta'], swish=True)
    h = conv2d_3x3(h, p['conv2']['w'], p['conv2']['b'])
    if 'channel_up' in p:
        x = conv2d_1x1(x, p['channel_up']['w'], p['channel_up']['b'])
    return x + h


def _init_nonlocal_block(key, c):
    kq, kk, kv, kp = jax.random.split(key, 4)
    return {'gn': _init_group_norm(c),
            'q': _init_conv1x1(kq, c, c),
            'k': _init_conv1x1(kk, c, c),
            'v': _init_conv1x1(kv, c, c),
            'proj': _init_conv1x1(kp, c, c)}


def _apply_nonlocal_block(p, x):
    N, H, W, C = x.shape
    h = group_norm(x, p['gn']['gamma'], p['gn']['beta'], swish=False)
    q = conv2d_1x1(h, p['q']['w'], p['q']['b']).reshape(N, H * W, C)
    k = conv2d_1x1(h, p['k']['w'], p['k']['b']).reshape(N, H * W, C)
    v = conv2d_1x1(h, p['v']['w'], p['v']['b']).reshape(N, H * W, C)
    a = spatial_attention(q, k, v).reshape(N, H, W, C)
    a = conv2d_1x1(a, p['proj']['w'], p['proj']['b'])
    return x + a


# ----------------------------------------------------------------------------
# check_results — exact semantics of the PyTorch helper (explicit raises)
# ----------------------------------------------------------------------------
_REQUIRED_KEYS = ('rgb_key', 'depth_key', 'alpha_key', 'flow_key',
                  'decoder_depth_key', 'decoder_alpha_key', 'decoder_flow_key')


def check_results(result_dict) -> bool:
    for k in _REQUIRED_KEYS:
        if k not in result_dict:
            raise AssertionError(f'{k} not found in result_dict')
    return True


# ----------------------------------------------------------------------------
# Decoder
# ----------------------------------------------------------------------------
class Decoder:
    """VQGAN-style decoder. NHWC internally; every conv / norm / attention in Pallas."""

    def __init__(self, latent_dim, channels=(512, 256, 256, 128, 128),
                 num_res_blocks=3, *, key=None):
        if key is None:
            key = jax.random.PRNGKey(0)
        channels = list(channels)
        in_ch = channels[0]

        def nk():
            nonlocal key
            key, sub = jax.random.split(key)
            return sub

        layers = [('conv3x3', _init_conv3x3(nk(), latent_dim, in_ch)),
                  ('res', _init_residual_block(nk(), in_ch, in_ch)),
                  ('attn', _init_nonlocal_block(nk(), in_ch)),
                  ('res', _init_residual_block(nk(), in_ch, in_ch))]
        for i, out_ch in enumerate(channels):
            for _ in range(num_res_blocks):
                layers.append(('res', _init_residual_block(nk(), in_ch, out_ch)))
                in_ch = out_ch
            if i != 0:
                layers.append(('up', _init_conv3x3(nk(), in_ch, in_ch)))
        layers.append(('gn_swish', _init_group_norm(in_ch)))
        layers.append(('conv3x3', _init_conv3x3(nk(), in_ch, 4)))
        self._layers = layers
        # One jit over the full stack: all pallas_calls are compiled/scheduled together.
        self._model = jax.jit(self._apply_model)

    def _apply_model(self, x):
        for kind, p in self._layers:
            if kind == 'conv3x3':
                x = conv2d_3x3(x, p['w'], p['b'])
            elif kind == 'res':
                x = _apply_residual_block(p, x)
            elif kind == 'attn':
                x = _apply_nonlocal_block(p, x)
            elif kind == 'up':
                x = conv2d_3x3(upsample_nearest_2x(x), p['w'], p['b'])
            elif kind == 'gn_swish':
                x = group_norm(x, p['gamma'], p['beta'], swish=True)
            else:
                raise ValueError(kind)
        return x

    def forward(self, render_results: Dict) -> Dict:
        x = render_results['rendered_image']          # (b, t, v, h, w, c)
        b, t, v, h, w, c = x.shape
        x = x.reshape(b * t * v, h, w, c)             # '(b t v) h w c' (NHWC, lane = C)
        x = self._model(x)
        _, ho, wo, _ = x.shape
        x = x.reshape(b, t, v, ho, wo, 4)             # '(b t v) h w c -> b t v h w c'
        decoder_dict = {
            'decoded_image': x[..., :3],
            'decoded_depth': x[..., 3],
            'rgb_key': 'decoded_image',
            'decoder_depth_key': 'decoded_depth',
        }
        render_results.update(decoder_dict)
        if not check_results(render_results):
            raise ValueError('Invalid result dict')
        return render_results

    __call__ = forward


# ----------------------------------------------------------------------------
# Demo
# ----------------------------------------------------------------------------
if __name__ == "__main__":
    key = jax.random.PRNGKey(0)
    k_model, k_x = jax.random.split(key)

    # Small-but-representative config (production default: channels=[512,256,256,128,128]).
    B, T, V, H, W, LATENT = 1, 1, 2, 8, 8, 8
    dec = Decoder(latent_dim=LATENT, channels=[64, 32], num_res_blocks=1, key=k_model)

    rendered = jax.random.normal(k_x, (B, T, V, H, W, LATENT), jnp.float32)
    render_results = {
        'rendered_image': rendered,
        'rgb_key': 'rendered_rgb',
        'depth_key': 'rendered_depth',
        'alpha_key': 'rendered_alpha',
        'flow_key': 'rendered_flow',
        'decoder_depth_key': 'rendered_depth',
        'decoder_alpha_key': 'rendered_alpha',
        'decoder_flow_key': 'rendered_flow',
    }

    out = dec(render_results)
    img = out['decoded_image']
    dep = out['decoded_depth']
    jax.block_until_ready((img, dep))

    # One upsample stage (len(channels)=2) -> spatial x2.
    assert img.shape == (B, T, V, 2 * H, 2 * W, 3), img.shape
    assert dep.shape == (B, T, V, 2 * H, 2 * W), dep.shape
    assert out['rgb_key'] == 'decoded_image'
    assert out['decoder_depth_key'] == 'decoded_depth'
    assert bool(jnp.all(jnp.isfinite(img))) and bool(jnp.all(jnp.isfinite(dep)))

    print("KERNEL_OK")
</pallas_src>

<mosaic_0001>
module attributes {stable_mosaic.version = 11 : i64} {
  func.func @_gn_apply_kernel(%arg0: i32, %arg1: memref<1x64x64xf32, #tpu.memory_space<vmem>>, %arg2: memref<1x1x64xf32, #tpu.memory_space<vmem>>, %arg3: memref<1x1x64xf32, #tpu.memory_space<vmem>>, %arg4: memref<1x64xf32, #tpu.memory_space<vmem>>, %arg5: memref<1x64xf32, #tpu.memory_space<vmem>>, %arg6: memref<1x64x64xf32, #tpu.memory_space<vmem>>) attributes {dimension_semantics = [#tpu.dimension_semantics<parallel>], iteration_bounds = array<i64: 2>, scalar_prefetch = 0 : i64, scratch_operands = 0 : i64, tpu.core_type = #tpu.core_type<tc>, window_params = [{transform_indices = @transform_0, window_bounds = array<i64: 1, 64, 64>}, {transform_indices = @transform_1, window_bounds = array<i64: 1, 1, 64>}, {transform_indices = @transform_2, window_bounds = array<i64: 1, 1, 64>}, {pipeline_mode = #tpu.pipeline_mode<synchronous>, transform_indices = @transform_3, window_bounds = array<i64: 1, 64>}, {pipeline_mode = #tpu.pipeline_mode<synchronous>, transform_indices = @transform_4, window_bounds = array<i64: 1, 64>}, {transform_indices = @transform_5, window_bounds = array<i64: 1, 64, 64>}]} {
    %c0 = arith.constant 0 : index
    %c0_0 = arith.constant 0 : index
    %c0_1 = arith.constant 0 : index
    %0 = vector.load %arg1[%c0, %c0_0, %c0_1] : memref<1x64x64xf32, #tpu.memory_space<vmem>>, vector<1x64x64xf32>
    %1 = vector.shape_cast %0 : vector<1x64x64xf32> to vector<64x64xf32>
    %c0_2 = arith.constant 0 : index
    %c0_3 = arith.constant 0 : index
    %c0_4 = arith.constant 0 : index
    %2 = vector.load %arg2[%c0_2, %c0_3, %c0_4] : memref<1x1x64xf32, #tpu.memory_space<vmem>>, vector<1x1x64xf32>
    %3 = vector.shape_cast %2 : vector<1x1x64xf32> to vector<1x64xf32>
    %4 = vector.broadcast %3 : vector<1x64xf32> to vector<64x64xf32>
    %5 = arith.subf %1, %4 : vector<64x64xf32>
    %c0_5 = arith.constant 0 : index
    %c0_6 = arith.constant 0 : index
    %c0_7 = arith.constant 0 : index
    %6 = vector.load %arg3[%c0_5, %c0_6, %c0_7] : memref<1x1x64xf32, #tpu.memory_space<vmem>>, vector<1x1x64xf32>
    %7 = vector.shape_cast %6 : vector<1x1x64xf32> to vector<1x64xf32>
    %8 = vector.broadcast %7 : vector<1x64xf32> to vector<64x64xf32>
    %9 = arith.mulf %5, %8 : vector<64x64xf32>
    %c0_8 = arith.constant 0 : index
    %c0_9 = arith.constant 0 : index
    %10 = vector.load %arg4[%c0_8, %c0_9] : memref<1x64xf32, #tpu.memory_space<vmem>>, vector<1x64xf32>
    %11 = vector.broadcast %10 : vector<1x64xf32> to vector<64x64xf32>
    %12 = arith.mulf %9, %11 : vector<64x64xf32>
    %c0_10 = arith.constant 0 : index
    %c0_11 = arith.constant 0 : index
    %13 = vector.load %arg5[%c0_10, %c0_11] : memref<1x64xf32, #tpu.memory_space<vmem>>, vector<1x64xf32>
    %14 = vector.broadcast %13 : vector<1x64xf32> to vector<64x64xf32>
    %15 = arith.addf %12, %14 : vector<64x64xf32>
    %cst = arith.constant 0.000000e+00 : f32
    %16 = vector.broadcast %cst : f32 to vector<64x64xf32>
    %17 = arith.subf %16, %15 : vector<64x64xf32>
    %18 = math.exp %17 : vector<64x64xf32>
    %cst_12 = arith.constant 1.000000e+00 : f32
    %19 = vector.broadcast %cst_12 : f32 to vector<64x64xf32>
    %20 = arith.addf %19, %18 : vector<64x64xf32>
    %cst_13 = arith.constant 1.000000e+00 : f32
    %21 = vector.broadcast %cst_13 : f32 to vector<64x64xf32>
    %22 = arith.divf %21, %20 : vector<64x64xf32>
    %23 = arith.mulf %15, %22 : vector<64x64xf32>
    %c0_14 = arith.constant 0 : index
    %c0_15 = arith.constant 0 : index
    %c0_16 = arith.constant 0 : index
    %24 = vector.load %arg6[%c0_14, %c0_15, %c0_16] : memref<1x64x64xf32, #tpu.memory_space<vmem>>, vector<1x64x64xf32>
    %25 = vector.shape_cast %24 : vector<1x64x64xf32> to vector<64x64xf32>
    %26 = vector.shape_cast %23 : vector<64x64xf32> to vector<1x64x64xf32>
    tpu.vector_store %arg6[%c0_14, %c0_15, %c0_16], %26 {strides = array<i32>} : memref<1x64x64xf32, #tpu.memory_space<vmem>>, vector<1x64x64xf32>,
    return
  }
  func.func @transform_0(%arg0: i32) -> (i32, i32, i32) {
    %c0_i32 = arith.constant 0 : i32
    %c0_i32_0 = arith.constant 0 : i32
    %c0_i32_1 = arith.constant 0 : i32
    return %arg0, %c0_i32, %c0_i32_0 : i32, i32, i32
  }
  func.func @transform_1(%arg0: i32) -> (i32, i32, i32) {
    %c0_i32 = arith.constant 0 : i32
    %c0_i32_0 = arith.constant 0 : i32
    %c0_i32_1 = arith.constant 0 : i32
    return %arg0, %c0_i32, %c0_i32_0 : i32, i32, i32
  }
  func.func @transform_2(%arg0: i32) -> (i32, i32, i32) {
    %c0_i32 = arith.constant 0 : i32
    %c0_i32_0 = arith.constant 0 : i32
    %c0_i32_1 = arith.constant 0 : i32
    return %arg0, %c0_i32, %c0_i32_0 : i32, i32, i32
  }
  func.func @transform_3(%arg0: i32) -> (i32, i32) {
    %c0_i32 = arith.constant 0 : i32
    %c0_i32_0 = arith.constant 0 : i32
    %c0_i32_1 = arith.constant 0 : i32
    return %c0_i32, %c0_i32_0 : i32, i32
  }
  func.func @transform_4(%arg0: i32) -> (i32, i32) {
    %c0_i32 = arith.constant 0 : i32
    %c0_i32_0 = arith.constant 0 : i32
    %c0_i32_1 = arith.constant 0 : i32
    return %c0_i32, %c0_i32_0 : i32, i32
  }
  func.func @transform_5(%arg0: i32) -> (i32, i32, i32) {
    %c0_i32 = arith.constant 0 : i32
    %c0_i32_0 = arith.constant 0 : i32
    %c0_i32_1 = arith.constant 0 : i32
    return %arg0, %c0_i32, %c0_i32_0 : i32, i32, i32
  }
}

module attributes {stable_mosaic.version = 11 : i64} {
  func.func @_gn_stats_kernel(%arg0: i32, %arg1: memref<1x64x64xf32, #tpu.memory_space<vmem>>, %arg2: memref<1x2x64xf32, #tpu.memory_space<vmem>>) attributes {dimension_semantics = [#tpu.dimension_semantics<parallel>], iteration_bounds = array<i64: 2>, scalar_prefetch = 0 : i64, scratch_operands = 0 : i64, tpu.core_type = #tpu.core_type<tc>, window_params = [{transform_indices = @transform_0, window_bounds = array<i64: 1, 64, 64>}, {transform_indices = @transform_1, window_bounds = array<i64: 1, 2, 64>}]} {
    %c0 = arith.constant 0 : index
    %c0_0 = arith.constant 0 : index
    %c0_1 = arith.constant 0 : index
    %0 = vector.load %arg1[%c0, %c0_0, %c0_1] : memref<1x64x64xf32, #tpu.memory_space<vmem>>, vector<1x64x64xf32>
    %1 = vector.shape_cast %0 : vector<1x64x64xf32> to vector<64x64xf32>
    %cst = arith.constant dense<0.000000e+00> : vector<64xf32>
    %2 = vector.multi_reduction <add>, %1, %cst [0] : vector<64x64xf32> to vector<64xf32>
    %3 = vector.shape_cast %2 : vector<64xf32> to vector<1x64xf32>
    %c0_2 = arith.constant 0 : index
    %c0_3 = arith.constant 0 : index
    %c0_4 = arith.constant 0 : index
    %4 = vector.load %arg2[%c0_2, %c0_3, %c0_4] : memref<1x2x64xf32, #tpu.memory_space<vmem>>, vector<1x1x64xf32>
    %5 = vector.shape_cast %4 : vector<1x1x64xf32> to vector<1x64xf32>
    %6 = vector.shape_cast %3 : vector<1x64xf32> to vector<1x1x64xf32>
    tpu.vector_store %arg2[%c0_2, %c0_3, %c0_4], %6 {strides = array<i32>} : memref<1x2x64xf32, #tpu.memory_space<vmem>>, vector<1x1x64xf32>,
    %7 = arith.mulf %1, %1 : vector<64x64xf32>
    %cst_5 = arith.constant dense<0.000000e+00> : vector<64xf32>
    %8 = vector.multi_reduction <add>, %7, %cst_5 [0] : vector<64x64xf32> to vector<64xf32>
    %9 = vector.shape_cast %8 : vector<64xf32> to vector<1x64xf32>
    %c0_6 = arith.constant 0 : index
    %c1 = arith.constant 1 : index
    %c0_7 = arith.constant 0 : index
    %10 = vector.load %arg2[%c0_6, %c1, %c0_7] : memref<1x2x64xf32, #tpu.memory_space<vmem>>, vector<1x1x64xf32>
    %11 = vector.shape_cast %10 : vector<1x1x64xf32> to vector<1x64xf32>
    %12 = vector.shape_cast %9 : vector<1x64xf32> to vector<1x1x64xf32>
    tpu.vector_store %arg2[%c0_6, %c1, %c0_7], %12 {strides = array<i32>} : memref<1x2x64xf32, #tpu.memory_space<vmem>>, vector<1x1x64xf32>,
    return
  }
  func.func @transform_0(%arg0: i32) -> (i32, i32, i32) {
    %c0_i32 = arith.constant 0 : i32
    %c0_i32_0 = arith.constant 0 : i32
    %c0_i32_1 = arith.constant 0 : i32
    return %arg0, %c0_i32, %c0_i32_0 : i32, i32, i32
  }
  func.func @transform_1(%arg0: i32) -> (i32, i32, i32) {
    %c0_i32 = arith.constant 0 : i32
    %c0_i32_0 = arith.constant 0 : i32
    %c0_i32_1 = arith.constant 0 : i32
    return %arg0, %c0_i32, %c0_i32_0 : i32, i32, i32
  }
}

module attributes {stable_mosaic.version = 11 : i64} {
  func.func @_matmul_bias_kernel(%arg0: i32, %arg1: i32, %arg2: i32, %arg3: memref<128x128xf32, #tpu.memory_space<vmem>>, %arg4: memref<128x128xf32, #tpu.memory_space<vmem>>, %arg5: memref<1x128xf32, #tpu.memory_space<vmem>>, %arg6: memref<128x128xf32, #tpu.memory_space<vmem>>, %arg7: memref<128x128xf32, #tpu.memory_space<vmem>>) attributes {dimension_semantics = [#tpu.dimension_semantics<parallel>, #tpu.dimension_semantics<parallel>, #tpu.dimension_semantics<arbitrary>], iteration_bounds = array<i64: 1, 1, 1>, scalar_prefetch = 0 : i64, scratch_operands = 1 : i64, tpu.core_type = #tpu.core_type<tc>, window_params = [{transform_indices = @transform_0, window_bounds = array<i64: 128, 128>}, {transform_indices = @transform_1, window_bounds = array<i64: 128, 128>}, {transform_indices = @transform_2, window_bounds = array<i64: 1, 128>}, {transform_indices = @transform_3, window_bounds = array<i64: 128, 128>}]} {
    %c0_i32 = arith.constant 0 : i32
    %0 = arith.cmpi eq, %arg2, %c0_i32 : i32
    %1 = arith.extui %0 : i1 to i32
    %c0_i32_0 = arith.constant 0 : i32
    %2 = arith.cmpi ne, %1, %c0_i32_0 : i32
    scf.if %2 {
      %cst_10 = arith.constant 0.000000e+00 : f32
      %12 = vector.broadcast %cst_10 : f32 to vector<128x128xf32>
      %c0_11 = arith.constant 0 : index
      %c0_12 = arith.constant 0 : index
      %13 = vector.load %arg7[%c0_11, %c0_12] : memref<128x128xf32, #tpu.memory_space<vmem>>, vector<128x128xf32>
      tpu.vector_store %arg7[%c0_11, %c0_12], %12 {strides = array<i32>} : memref<128x128xf32, #tpu.memory_space<vmem>>, vector<128x128xf32>,
    } else {
    }
    %c0 = arith.constant 0 : index
    %c0_1 = arith.constant 0 : index
    %3 = vector.load %arg7[%c0, %c0_1] : memref<128x128xf32, #tpu.memory_space<vmem>>, vector<128x128xf32>
    %c0_2 = arith.constant 0 : index
    %c0_3 = arith.constant 0 : index
    %4 = vector.load %arg3[%c0_2, %c0_3] : memref<128x128xf32, #tpu.memory_space<vmem>>, vector<128x128xf32>
    %c0_4 = arith.constant 0 : index
    %c0_5 = arith.constant 0 : index
    %5 = vector.load %arg4[%c0_4, %c0_5] : memref<128x128xf32, #tpu.memory_space<vmem>>, vector<128x128xf32>
    %cst = arith.constant dense<0.000000e+00> : vector<128x128xf32>
    %6 = tpu.matmul %4, %5, %cst {dimension_numbers = #tpu.dot_dimension_numbers<[1], [0], [0], [1], [0, 0, 1, 1], [], []>} : vector<128x128xf32>, vector<128x128xf32>, vector<128x128xf32> -> vector<128x128xf32>
    %7 = arith.addf %3, %6 : vector<128x128xf32>
    %c0_6 = arith.constant 0 : index
    %c0_7 = arith.constant 0 : index
    %8 = vector.load %arg7[%c0_6, %c0_7] : memref<128x128xf32, #tpu.memory_space<vmem>>, vector<128x128xf32>
    tpu.vector_store %arg7[%c0_6, %c0_7], %7 {strides = array<i32>} : memref<128x128xf32, #tpu.memory_space<vmem>>, vector<128x128xf32>,
    %c0_i32_8 = arith.constant 0 : i32
    %9 = arith.cmpi eq, %arg2, %c0_i32_8 : i32
    %10 = arith.extui %9 : i1 to i32
    %c0_i32_9 = arith.constant 0 : i32
    %11 = arith.cmpi ne, %10, %c0_i32_9 : i32
    scf.if %11 {
      %c0_10 = arith.constant 0 : index
      %c0_11 = arith.constant 0 : index
      %12 = vector.load %arg7[%c0_10, %c0_11] : memref<128x128xf32, #tpu.memory_space<vmem>>, vector<128x128xf32>
      %c0_12 = arith.constant 0 : index
      %c0_13 = arith.constant 0 : index
      %13 = vector.load %arg5[%c0_12, %c0_13] : memref<1x128xf32, #tpu.memory_space<vmem>>, vector<1x128xf32>
      %14 = vector.broadcast %13 : vector<1x128xf32> to vector<128x128xf32>
      %15 = arith.addf %12, %14 : vector<128x128xf32>
      %c0_14 = arith.constant 0 : index
      %c0_15 = arith.constant 0 : index
      %16 = vector.load %arg6[%c0_14, %c0_15] : memref<128x128xf32, #tpu.memory_space<vmem>>, vector<128x128xf32>
      tpu.vector_store %arg6[%c0_14, %c0_15], %15 {strides = array<i32>} : memref<128x128xf32, #tpu.memory_space<vmem>>, vector<128x128xf32>,
    } else {
    }
    return
  }
  func.func @transform_0(%arg0: i32, %arg1: i32, %arg2: i32) -> (i32, i32) {
    %c0_i32 = arith.constant 0 : i32
    return %arg0, %arg2 : i32, i32
  }
  func.func @transform_1(%arg0: i32, %arg1: i32, %arg2: i32) -> (i32, i32) {
    %c0_i32 = arith.constant 0 : i32
    return %arg2, %arg1 : i32, i32
  }
  func.func @transform_2(%arg0: i32, %arg1: i32, %arg2: i32) -> (i32, i32) {
    %c0_i32 = arith.constant 0 : i32
    %c0_i32_0 = arith.constant 0 : i32
    return %c0_i32, %arg1 : i32, i32
  }
  func.func @transform_3(%arg0: i32, %arg1: i32, %arg2: i32) -> (i32, i32) {
    %c0_i32 = arith.constant 0 : i32
    return %arg0, %arg1 : i32, i32
  }
}

module attributes {stable_mosaic.version = 11 : i64} {
  func.func @_matmul_bias_kernel(%arg0: i32, %arg1: i32, %arg2: i32, %arg3: memref<128x512xf32, #tpu.memory_space<vmem>>, %arg4: memref<512x128xf32, #tpu.memory_space<vmem>>, %arg5: memref<1x128xf32, #tpu.memory_space<vmem>>, %arg6: memref<128x128xf32, #tpu.memory_space<vmem>>, %arg7: memref<128x128xf32, #tpu.memory_space<vmem>>) attributes {dimension_semantics = [#tpu.dimension_semantics<parallel>, #tpu.dimension_semantics<parallel>, #tpu.dimension_semantics<arbitrary>], iteration_bounds = array<i64: 1, 1, 2>, scalar_prefetch = 0 : i64, scratch_operands = 1 : i64, tpu.core_type = #tpu.core_type<tc>, window_params = [{transform_indices = @transform_0, window_bounds = array<i64: 128, 512>}, {transform_indices = @transform_1, window_bounds = array<i64: 512, 128>}, {transform_indices = @transform_2, window_bounds = array<i64: 1, 128>}, {transform_indices = @transform_3, window_bounds = array<i64: 128, 128>}]} {
    %c0_i32 = arith.constant 0 : i32
    %0 = arith.cmpi eq, %arg2, %c0_i32 : i32
    %1 = arith.extui %0 : i1 to i32
    %c0_i32_0 = arith.constant 0 : i32
    %2 = arith.cmpi ne, %1, %c0_i32_0 : i32
    scf.if %2 {
      %cst_9 = arith.constant 0.000000e+00 : f32
      %12 = vector.broadcast %cst_9 : f32 to vector<128x128xf32>
      %c0_10 = arith.constant 0 : index
      %c0_11 = arith.constant 0 : index
      %13 = vector.load %arg7[%c0_10, %c0_11] : memref<128x128xf32, #tpu.memory_space<vmem>>, vector<128x128xf32>
      tpu.vector_store %arg7[%c0_10, %c0_11], %12 {strides = array<i32>} : memref<128x128xf32, #tpu.memory_space<vmem>>, vector<128x128xf32>,
    } else {
    }
    %c0 = arith.constant 0 : index
    %c0_1 = arith.constant 0 : index
    %3 = vector.load %arg7[%c0, %c0_1] : memref<128x128xf32, #tpu.memory_space<vmem>>, vector<128x128xf32>
    %c0_2 = arith.constant 0 : index
    %c0_3 = arith.constant 0 : index
    %4 = vector.load %arg3[%c0_2, %c0_3] : memref<128x512xf32, #tpu.memory_space<vmem>>, vector<128x512xf32>
    %c0_4 = arith.constant 0 : index
    %c0_5 = arith.constant 0 : index
    %5 = vector.load %arg4[%c0_4, %c0_5] : memref<512x128xf32, #tpu.memory_space<vmem>>, vector<512x128xf32>
    %cst = arith.constant dense<0.000000e+00> : vector<128x128xf32>
    %6 = tpu.matmul %4, %5, %cst {dimension_numbers = #tpu.dot_dimension_numbers<[1], [0], [0], [1], [0, 0, 1, 1], [], []>} : vector<128x512xf32>, vector<512x128xf32>, vector<128x128xf32> -> vector<128x128xf32>
    %7 = arith.addf %3, %6 : vector<128x128xf32>
    %c0_6 = arith.constant 0 : index
    %c0_7 = arith.constant 0 : index
    %8 = vector.load %arg7[%c0_6, %c0_7] : memref<128x128xf32, #tpu.memory_space<vmem>>, vector<128x128xf32>
    tpu.vector_store %arg7[%c0_6, %c0_7], %7 {strides = array<i32>} : memref<128x128xf32, #tpu.memory_space<vmem>>, vector<128x128xf32>,
    %c1_i32 = arith.constant 1 : i32
    %9 = arith.cmpi eq, %arg2, %c1_i32 : i32
    %10 = arith.extui %9 : i1 to i32
    %c0_i32_8 = arith.constant 0 : i32
    %11 = arith.cmpi ne, %10, %c0_i32_8 : i32
    scf.if %11 {
      %c0_9 = arith.constant 0 : index
      %c0_10 = arith.constant 0 : index
      %12 = vector.load %arg7[%c0_9, %c0_10] : memref<128x128xf32, #tpu.memory_space<vmem>>, vector<128x128xf32>
      %c0_11 = arith.constant 0 : index
      %c0_12 = arith.constant 0 : index
      %13 = vector.load %arg5[%c0_11, %c0_12] : memref<1x128xf32, #tpu.memory_space<vmem>>, vector<1x128xf32>
      %14 = vector.broadcast %13 : vector<1x128xf32> to vector<128x128xf32>
      %15 = arith.addf %12, %14 : vector<128x128xf32>
      %c0_13 = arith.constant 0 : index
      %c0_14 = arith.constant 0 : index
      %16 = vector.load %arg6[%c0_13, %c0_14] : memref<128x128xf32, #tpu.memory_space<vmem>>, vector<128x128xf32>
      tpu.vector_store %arg6[%c0_13, %c0_14], %15 {strides = array<i32>} : memref<128x128xf32, #tpu.memory_space<vmem>>, vector<128x128xf32>,
    } else {
    }
    return
  }
  func.func @transform_0(%arg0: i32, %arg1: i32, %arg2: i32) -> (i32, i32) {
    %c0_i32 = arith.constant 0 : i32
    return %arg0, %arg2 : i32, i32
  }
  func.func @transform_1(%arg0: i32, %arg1: i32, %arg2: i32) -> (i32, i32) {
    %c0_i32 = arith.constant 0 : i32
    return %arg2, %arg1 : i32, i32
  }
  func.func @transform_2(%arg0: i32, %arg1: i32, %arg2: i32) -> (i32, i32) {
    %c0_i32 = arith.constant 0 : i32
    %c0_i32_0 = arith.constant 0 : i32
    return %c0_i32, %arg1 : i32, i32
  }
  func.func @transform_3(%arg0: i32, %arg1: i32, %arg2: i32) -> (i32, i32) {
    %c0_i32 = arith.constant 0 : i32
    return %arg0, %arg1 : i32, i32
  }
}

module attributes {stable_mosaic.version = 11 : i64} {
  func.func @_gn_apply_kernel(%arg0: i32, %arg1: memref<1x64x64xf32, #tpu.memory_space<vmem>>, %arg2: memref<1x1x64xf32, #tpu.memory_space<vmem>>, %arg3: memref<1x1x64xf32, #tpu.memory_space<vmem>>, %arg4: memref<1x64xf32, #tpu.memory_space<vmem>>, %arg5: memref<1x64xf32, #tpu.memory_space<vmem>>, %arg6: memref<1x64x64xf32, #tpu.memory_space<vmem>>) attributes {dimension_semantics = [#tpu.dimension_semantics<parallel>], iteration_bounds = array<i64: 2>, scalar_prefetch = 0 : i64, scratch_operands = 0 : i64, tpu.core_type = #tpu.core_type<tc>, window_params = [{transform_indices = @transform_0, window_bounds = array<i64: 1, 64, 64>}, {transform_indices = @transform_1, window_bounds = array<i64: 1, 1, 64>}, {transform_indices = @transform_2, window_bounds = array<i64: 1, 1, 64>}, {pipeline_mode = #tpu.pipeline_mode<synchronous>, transform_indices = @transform_3, window_bounds = array<i64: 1, 64>}, {pipeline_mode = #tpu.pipeline_mode<synchronous>, transform_indices = @transform_4, window_bounds = array<i64: 1, 64>}, {transform_indices = @transform_5, window_bounds = array<i64: 1, 64, 64>}]} {
    %c0 = arith.constant 0 : index
    %c0_0 = arith.constant 0 : index
    %c0_1 = arith.constant 0 : index
    %0 = vector.load %arg1[%c0, %c0_0, %c0_1] : memref<1x64x64xf32, #tpu.memory_space<vmem>>, vector<1x64x64xf32>
    %1 = vector.shape_cast %0 : vector<1x64x64xf32> to vector<64x64xf32>
    %c0_2 = arith.constant 0 : index
    %c0_3 = arith.constant 0 : index
    %c0_4 = arith.constant 0 : index
    %2 = vector.load %arg2[%c0_2, %c0_3, %c0_4] : memref<1x1x64xf32, #tpu.memory_space<vmem>>, vector<1x1x64xf32>
    %3 = vector.shape_cast %2 : vector<1x1x64xf32> to vector<1x64xf32>
    %4 = vector.broadcast %3 : vector<1x64xf32> to vector<64x64xf32>
    %5 = arith.subf %1, %4 : vector<64x64xf32>
    %c0_5 = arith.constant 0 : index
    %c0_6 = arith.constant 0 : index
    %c0_7 = arith.constant 0 : index
    %6 = vector.load %arg3[%c0_5, %c0_6, %c0_7] : memref<1x1x64xf32, #tpu.memory_space<vmem>>, vector<1x1x64xf32>
    %7 = vector.shape_cast %6 : vector<1x1x64xf32> to vector<1x64xf32>
    %8 = vector.broadcast %7 : vector<1x64xf32> to vector<64x64xf32>
    %9 = arith.mulf %5, %8 : vector<64x64xf32>
    %c0_8 = arith.constant 0 : index
    %c0_9 = arith.constant 0 : index
    %10 = vector.load %arg4[%c0_8, %c0_9] : memref<1x64xf32, #tpu.memory_space<vmem>>, vector<1x64xf32>
    %11 = vector.broadcast %10 : vector<1x64xf32> to vector<64x64xf32>
    %12 = arith.mulf %9, %11 : vector<64x64xf32>
    %c0_10 = arith.constant 0 : index
    %c0_11 = arith.constant 0 : index
    %13 = vector.load %arg5[%c0_10, %c0_11] : memref<1x64xf32, #tpu.memory_space<vmem>>, vector<1x64xf32>
    %14 = vector.broadcast %13 : vector<1x64xf32> to vector<64x64xf32>
    %15 = arith.addf %12, %14 : vector<64x64xf32>
    %c0_12 = arith.constant 0 : index
    %c0_13 = arith.constant 0 : index
    %c0_14 = arith.constant 0 : index
    %16 = vector.load %arg6[%c0_12, %c0_13, %c0_14] : memref<1x64x64xf32, #tpu.memory_space<vmem>>, vector<1x64x64xf32>
    %17 = vector.shape_cast %16 : vector<1x64x64xf32> to vector<64x64xf32>
    %18 = vector.shape_cast %15 : vector<64x64xf32> to vector<1x64x64xf32>
    tpu.vector_store %arg6[%c0_12, %c0_13, %c0_14], %18 {strides = array<i32>} : memref<1x64x64xf32, #tpu.memory_space<vmem>>, vector<1x64x64xf32>,
    return
  }
  func.func @transform_0(%arg0: i32) -> (i32, i32, i32) {
    %c0_i32 = arith.constant 0 : i32
    %c0_i32_0 = arith.constant 0 : i32
    %c0_i32_1 = arith.constant 0 : i32
    return %arg0, %c0_i32, %c0_i32_0 : i32, i32, i32
  }
  func.func @transform_1(%arg0: i32) -> (i32, i32, i32) {
    %c0_i32 = arith.constant 0 : i32
    %c0_i32_0 = arith.constant 0 : i32
    %c0_i32_1 = arith.constant 0 : i32
    return %arg0, %c0_i32, %c0_i32_0 : i32, i32, i32
  }
  func.func @transform_2(%arg0: i32) -> (i32, i32, i32) {
    %c0_i32 = arith.constant 0 : i32
    %c0_i32_0 = arith.constant 0 : i32
    %c0_i32_1 = arith.constant 0 : i32
    return %arg0, %c0_i32, %c0_i32_0 : i32, i32, i32
  }
  func.func @transform_3(%arg0: i32) -> (i32, i32) {
    %c0_i32 = arith.constant 0 : i32
    %c0_i32_0 = arith.constant 0 : i32
    %c0_i32_1 = arith.constant 0 : i32
    return %c0_i32, %c0_i32_0 : i32, i32
  }
  func.func @transform_4(%arg0: i32) -> (i32, i32) {
    %c0_i32 = arith.constant 0 : i32
    %c0_i32_0 = arith.constant 0 : i32
    %c0_i32_1 = arith.constant 0 : i32
    return %c0_i32, %c0_i32_0 : i32, i32
  }
  func.func @transform_5(%arg0: i32) -> (i32, i32, i32) {
    %c0_i32 = arith.constant 0 : i32
    %c0_i32_0 = arith.constant 0 : i32
    %c0_i32_1 = arith.constant 0 : i32
    return %arg0, %c0_i32, %c0_i32_0 : i32, i32, i32
  }
}

module attributes {stable_mosaic.version = 11 : i64} {
  func.func @_attention_kernel(%arg0: i32, %arg1: memref<1x64x64xf32, #tpu.memory_space<vmem>>, %arg2: memref<1x64x64xf32, #tpu.memory_space<vmem>>, %arg3: memref<1x64x64xf32, #tpu.memory_space<vmem>>, %arg4: memref<1x64x64xf32, #tpu.memory_space<vmem>>) attributes {dimension_semantics = [#tpu.dimension_semantics<parallel>], iteration_bounds = array<i64: 2>, scalar_prefetch = 0 : i64, scratch_operands = 0 : i64, tpu.core_type = #tpu.core_type<tc>, window_params = [{transform_indices = @transform_0, window_bounds = array<i64: 1, 64, 64>}, {transform_indices = @transform_1, window_bounds = array<i64: 1, 64, 64>}, {transform_indices = @transform_2, window_bounds = array<i64: 1, 64, 64>}, {transform_indices = @transform_3, window_bounds = array<i64: 1, 64, 64>}]} {
    %c0 = arith.constant 0 : index
    %c0_0 = arith.constant 0 : index
    %c0_1 = arith.constant 0 : index
    %0 = vector.load %arg1[%c0, %c0_0, %c0_1] : memref<1x64x64xf32, #tpu.memory_space<vmem>>, vector<1x64x64xf32>
    %1 = vector.shape_cast %0 : vector<1x64x64xf32> to vector<64x64xf32>
    %c0_2 = arith.constant 0 : index
    %c0_3 = arith.constant 0 : index
    %c0_4 = arith.constant 0 : index
    %2 = vector.load %arg2[%c0_2, %c0_3, %c0_4] : memref<1x64x64xf32, #tpu.memory_space<vmem>>, vector<1x64x64xf32>
    %3 = vector.shape_cast %2 : vector<1x64x64xf32> to vector<64x64xf32>
    %c0_5 = arith.constant 0 : index
    %c0_6 = arith.constant 0 : index
    %c0_7 = arith.constant 0 : index
    %4 = vector.load %arg3[%c0_5, %c0_6, %c0_7] : memref<1x64x64xf32, #tpu.memory_space<vmem>>, vector<1x64x64xf32>
    %5 = vector.shape_cast %4 : vector<1x64x64xf32> to vector<64x64xf32>
    %cst = arith.constant dense<0.000000e+00> : vector<64x64xf32>
    %6 = tpu.matmul %1, %3, %cst {dimension_numbers = #tpu.dot_dimension_numbers<[1], [0], [0], [1], [0, 0, 1, 1], [], []>} : vector<64x64xf32>, vector<64x64xf32>, vector<64x64xf32> -> vector<64x64xf32>
    %cst_8 = arith.constant 1.250000e-01 : f32
    %7 = vector.broadcast %cst_8 : f32 to vector<64x64xf32>
    %8 = arith.mulf %6, %7 : vector<64x64xf32>
    %cst_9 = arith.constant dense<0xFF800000> : vector<64xf32>
    %9 = vector.multi_reduction <maximumf>, %8, %cst_9 [1] : vector<64x64xf32> to vector<64xf32>
    %10 = vector.shape_cast %9 : vector<64xf32> to vector<64x1xf32>
    %11 = vector.broadcast %10 : vector<64x1xf32> to vector<64x64xf32>
    %12 = arith.subf %8, %11 : vector<64x64xf32>
    %13 = math.exp %12 : vector<64x64xf32>
    %cst_10 = arith.constant dense<0.000000e+00> : vector<64xf32>
    %14 = vector.multi_reduction <add>, %13, %cst_10 [1] : vector<64x64xf32> to vector<64xf32>
    %15 = vector.shape_cast %14 : vector<64xf32> to vector<64x1xf32>
    %16 = vector.broadcast %15 : vector<64x1xf32> to vector<64x64xf32>
    %17 = arith.divf %13, %16 : vector<64x64xf32>
    %cst_11 = arith.constant dense<0.000000e+00> : vector<64x64xf32>
    %18 = tpu.matmul %17, %5, %cst_11 {dimension_numbers = #tpu.dot_dimension_numbers<[1], [0], [0], [1], [0, 0, 1, 1], [], []>} : vector<64x64xf32>, vector<64x64xf32>, vector<64x64xf32> -> vector<64x64xf32>
    %c0_12 = arith.constant 0 : index
    %c0_13 = arith.constant 0 : index
    %c0_14 = arith.constant 0 : index
    %19 = vector.load %arg4[%c0_12, %c0_13, %c0_14] : memref<1x64x64xf32, #tpu.memory_space<vmem>>, vector<1x64x64xf32>
    %20 = vector.shape_cast %19 : vector<1x64x64xf32> to vector<64x64xf32>
    %21 = vector.shape_cast %18 : vector<64x64xf32> to vector<1x64x64xf32>
    tpu.vector_store %arg4[%c0_12, %c0_13, %c0_14], %21 {strides = array<i32>} : memref<1x64x64xf32, #tpu.memory_space<vmem>>, vector<1x64x64xf32>,
    return
  }
  func.func @transform_0(%arg0: i32) -> (i32, i32, i32) {
    %c0_i32 = arith.constant 0 : i32
    %c0_i32_0 = arith.constant 0 : i32
    %c0_i32_1 = arith.constant 0 : i32
    return %arg0, %c0_i32, %c0_i32_0 : i32, i32, i32
  }
  func.func @transform_1(%arg0: i32) -> (i32, i32, i32) {
    %c0_i32 = arith.constant 0 : i32
    %c0_i32_0 = arith.constant 0 : i32
    %c0_i32_1 = arith.constant 0 : i32
    return %arg0, %c0_i32, %c0_i32_0 : i32, i32, i32
  }
  func.func @transform_2(%arg0: i32) -> (i32, i32, i32) {
    %c0_i32 = arith.constant 0 : i32
    %c0_i32_0 = arith.constant 0 : i32
    %c0_i32_1 = arith.constant 0 : i32
    return %arg0, %c0_i32, %c0_i32_0 : i32, i32, i32
  }
  func.func @transform_3(%arg0: i32) -> (i32, i32, i32) {
    %c0_i32 = arith.constant 0 : i32
    %c0_i32_0 = arith.constant 0 : i32
    %c0_i32_1 = arith.constant 0 : i32
    return %arg0, %c0_i32, %c0_i32_0 : i32, i32, i32
  }
}

module attributes {stable_mosaic.version = 11 : i64} {
  func.func @_gn_stats_kernel(%arg0: i32, %arg1: memref<1x64x32xf32, #tpu.memory_space<vmem>>, %arg2: memref<1x2x32xf32, #tpu.memory_space<vmem>>) attributes {dimension_semantics = [#tpu.dimension_semantics<parallel>], iteration_bounds = array<i64: 2>, scalar_prefetch = 0 : i64, scratch_operands = 0 : i64, tpu.core_type = #tpu.core_type<tc>, window_params = [{transform_indices = @transform_0, window_bounds = array<i64: 1, 64, 32>}, {transform_indices = @transform_1, window_bounds = array<i64: 1, 2, 32>}]} {
    %c0 = arith.constant 0 : index
    %c0_0 = arith.constant 0 : index
    %c0_1 = arith.constant 0 : index
    %0 = vector.load %arg1[%c0, %c0_0, %c0_1] : memref<1x64x32xf32, #tpu.memory_space<vmem>>, vector<1x64x32xf32>
    %1 = vector.shape_cast %0 : vector<1x64x32xf32> to vector<64x32xf32>
    %cst = arith.constant dense<0.000000e+00> : vector<32xf32>
    %2 = vector.multi_reduction <add>, %1, %cst [0] : vector<64x32xf32> to vector<32xf32>
    %3 = vector.shape_cast %2 : vector<32xf32> to vector<1x32xf32>
    %c0_2 = arith.constant 0 : index
    %c0_3 = arith.constant 0 : index
    %c0_4 = arith.constant 0 : index
    %4 = vector.load %arg2[%c0_2, %c0_3, %c0_4] : memref<1x2x32xf32, #tpu.memory_space<vmem>>, vector<1x1x32xf32>
    %5 = vector.shape_cast %4 : vector<1x1x32xf32> to vector<1x32xf32>
    %6 = vector.shape_cast %3 : vector<1x32xf32> to vector<1x1x32xf32>
    tpu.vector_store %arg2[%c0_2, %c0_3, %c0_4], %6 {strides = array<i32>} : memref<1x2x32xf32, #tpu.memory_space<vmem>>, vector<1x1x32xf32>,
    %7 = arith.mulf %1, %1 : vector<64x32xf32>
    %cst_5 = arith.constant dense<0.000000e+00> : vector<32xf32>
    %8 = vector.multi_reduction <add>, %7, %cst_5 [0] : vector<64x32xf32> to vector<32xf32>
    %9 = vector.shape_cast %8 : vector<32xf32> to vector<1x32xf32>
    %c0_6 = arith.constant 0 : index
    %c1 = arith.constant 1 : index
    %c0_7 = arith.constant 0 : index
    %10 = vector.load %arg2[%c0_6, %c1, %c0_7] : memref<1x2x32xf32, #tpu.memory_space<vmem>>, vector<1x1x32xf32>
    %11 = vector.shape_cast %10 : vector<1x1x32xf32> to vector<1x32xf32>
    %12 = vector.shape_cast %9 : vector<1x32xf32> to vector<1x1x32xf32>
    tpu.vector_store %arg2[%c0_6, %c1, %c0_7], %12 {strides = array<i32>} : memref<1x2x32xf32, #tpu.memory_space<vmem>>, vector<1x1x32xf32>,
    return
  }
  func.func @transform_0(%arg0: i32) -> (i32, i32, i32) {
    %c0_i32 = arith.constant 0 : i32
    %c0_i32_0 = arith.constant 0 : i32
    %c0_i32_1 = arith.constant 0 : i32
    return %arg0, %c0_i32, %c0_i32_0 : i32, i32, i32
  }
  func.func @transform_1(%arg0: i32) -> (i32, i32, i32) {
    %c0_i32 = arith.constant 0 : i32
    %c0_i32_0 = arith.constant 0 : i32
    %c0_i32_1 = arith.constant 0 : i32
    return %arg0, %c0_i32, %c0_i32_0 : i32, i32, i32
  }
}

module attributes {stable_mosaic.version = 11 : i64} {
  func.func @_gn_apply_kernel(%arg0: i32, %arg1: memref<1x64x32xf32, #tpu.memory_space<vmem>>, %arg2: memref<1x1x32xf32, #tpu.memory_space<vmem>>, %arg3: memref<1x1x32xf32, #tpu.memory_space<vmem>>, %arg4: memref<1x32xf32, #tpu.memory_space<vmem>>, %arg5: memref<1x32xf32, #tpu.memory_space<vmem>>, %arg6: memref<1x64x32xf32, #tpu.memory_space<vmem>>) attributes {dimension_semantics = [#tpu.dimension_semantics<parallel>], iteration_bounds = array<i64: 2>, scalar_prefetch = 0 : i64, scratch_operands = 0 : i64, tpu.core_type = #tpu.core_type<tc>, window_params = [{transform_indices = @transform_0, window_bounds = array<i64: 1, 64, 32>}, {transform_indices = @transform_1, window_bounds = array<i64: 1, 1, 32>}, {transform_indices = @transform_2, window_bounds = array<i64: 1, 1, 32>}, {pipeline_mode = #tpu.pipeline_mode<synchronous>, transform_indices = @transform_3, window_bounds = array<i64: 1, 32>}, {pipeline_mode = #tpu.pipeline_mode<synchronous>, transform_indices = @transform_4, window_bounds = array<i64: 1, 32>}, {transform_indices = @transform_5, window_bounds = array<i64: 1, 64, 32>}]} {
    %c0 = arith.constant 0 : index
    %c0_0 = arith.constant 0 : index
    %c0_1 = arith.constant 0 : index
    %0 = vector.load %arg1[%c0, %c0_0, %c0_1] : memref<1x64x32xf32, #tpu.memory_space<vmem>>, vector<1x64x32xf32>
    %1 = vector.shape_cast %0 : vector<1x64x32xf32> to vector<64x32xf32>
    %c0_2 = arith.constant 0 : index
    %c0_3 = arith.constant 0 : index
    %c0_4 = arith.constant 0 : index
    %2 = vector.load %arg2[%c0_2, %c0_3, %c0_4] : memref<1x1x32xf32, #tpu.memory_space<vmem>>, vector<1x1x32xf32>
    %3 = vector.shape_cast %2 : vector<1x1x32xf32> to vector<1x32xf32>
    %4 = vector.broadcast %3 : vector<1x32xf32> to vector<64x32xf32>
    %5 = arith.subf %1, %4 : vector<64x32xf32>
    %c0_5 = arith.constant 0 : index
    %c0_6 = arith.constant 0 : index
    %c0_7 = arith.constant 0 : index
    %6 = vector.load %arg3[%c0_5, %c0_6, %c0_7] : memref<1x1x32xf32, #tpu.memory_space<vmem>>, vector<1x1x32xf32>
    %7 = vector.shape_cast %6 : vector<1x1x32xf32> to vector<1x32xf32>
    %8 = vector.broadcast %7 : vector<1x32xf32> to vector<64x32xf32>
    %9 = arith.mulf %5, %8 : vector<64x32xf32>
    %c0_8 = arith.constant 0 : index
    %c0_9 = arith.constant 0 : index
    %10 = vector.load %arg4[%c0_8, %c0_9] : memref<1x32xf32, #tpu.memory_space<vmem>>, vector<1x32xf32>
    %11 = vector.broadcast %10 : vector<1x32xf32> to vector<64x32xf32>
    %12 = arith.mulf %9, %11 : vector<64x32xf32>
    %c0_10 = arith.constant 0 : index
    %c0_11 = arith.constant 0 : index
    %13 = vector.load %arg5[%c0_10, %c0_11] : memref<1x32xf32, #tpu.memory_space<vmem>>, vector<1x32xf32>
    %14 = vector.broadcast %13 : vector<1x32xf32> to vector<64x32xf32>
    %15 = arith.addf %12, %14 : vector<64x32xf32>
    %cst = arith.constant 0.000000e+00 : f32
    %16 = vector.broadcast %cst : f32 to vector<64x32xf32>
    %17 = arith.subf %16, %15 : vector<64x32xf32>
    %18 = math.exp %17 : vector<64x32xf32>
    %cst_12 = arith.constant 1.000000e+00 : f32
    %19 = vector.broadcast %cst_12 : f32 to vector<64x32xf32>
    %20 = arith.addf %19, %18 : vector<64x32xf32>
    %cst_13 = arith.constant 1.000000e+00 : f32
    %21 = vector.broadcast %cst_13 : f32 to vector<64x32xf32>
    %22 = arith.divf %21, %20 : vector<64x32xf32>
    %23 = arith.mulf %15, %22 : vector<64x32xf32>
    %c0_14 = arith.constant 0 : index
    %c0_15 = arith.constant 0 : index
    %c0_16 = arith.constant 0 : index
    %24 = vector.load %arg6[%c0_14, %c0_15, %c0_16] : memref<1x64x32xf32, #tpu.memory_space<vmem>>, vector<1x64x32xf32>
    %25 = vector.shape_cast %24 : vector<1x64x32xf32> to vector<64x32xf32>
    %26 = vector.shape_cast %23 : vector<64x32xf32> to vector<1x64x32xf32>
    tpu.vector_store %arg6[%c0_14, %c0_15, %c0_16], %26 {strides = array<i32>} : memref<1x64x32xf32, #tpu.memory_space<vmem>>, vector<1x64x32xf32>,
    return
  }
  func.func @transform_0(%arg0: i32) -> (i32, i32, i32) {
    %c0_i32 = arith.constant 0 : i32
    %c0_i32_0 = arith.constant 0 : i32
    %c0_i32_1 = arith.constant 0 : i32
    return %arg0, %c0_i32, %c0_i32_0 : i32, i32, i32
  }
  func.func @transform_1(%arg0: i32) -> (i32, i32, i32) {
    %c0_i32 = arith.constant 0 : i32
    %c0_i32_0 = arith.constant 0 : i32
    %c0_i32_1 = arith.constant 0 : i32
    return %arg0, %c0_i32, %c0_i32_0 : i32, i32, i32
  }
  func.func @transform_2(%arg0: i32) -> (i32, i32, i32) {
    %c0_i32 = arith.constant 0 : i32
    %c0_i32_0 = arith.constant 0 : i32
    %c0_i32_1 = arith.constant 0 : i32
    return %arg0, %c0_i32, %c0_i32_0 : i32, i32, i32
  }
  func.func @transform_3(%arg0: i32) -> (i32, i32) {
    %c0_i32 = arith.constant 0 : i32
    %c0_i32_0 = arith.constant 0 : i32
    %c0_i32_1 = arith.constant 0 : i32
    return %c0_i32, %c0_i32_0 : i32, i32
  }
  func.func @transform_4(%arg0: i32) -> (i32, i32) {
    %c0_i32 = arith.constant 0 : i32
    %c0_i32_0 = arith.constant 0 : i32
    %c0_i32_1 = arith.constant 0 : i32
    return %c0_i32, %c0_i32_0 : i32, i32
  }
  func.func @transform_5(%arg0: i32) -> (i32, i32, i32) {
    %c0_i32 = arith.constant 0 : i32
    %c0_i32_0 = arith.constant 0 : i32
    %c0_i32_1 = arith.constant 0 : i32
    return %arg0, %c0_i32, %c0_i32_0 : i32, i32, i32
  }
}

module attributes {stable_mosaic.version = 11 : i64} {
  func.func @_matmul_bias_kernel(%arg0: i32, %arg1: i32, %arg2: i32, %arg3: memref<128x384xf32, #tpu.memory_space<vmem>>, %arg4: memref<384x128xf32, #tpu.memory_space<vmem>>, %arg5: memref<1x128xf32, #tpu.memory_space<vmem>>, %arg6: memref<128x128xf32, #tpu.memory_space<vmem>>, %arg7: memref<128x128xf32, #tpu.memory_space<vmem>>) attributes {dimension_semantics = [#tpu.dimension_semantics<parallel>, #tpu.dimension_semantics<parallel>, #tpu.dimension_semantics<arbitrary>], iteration_bounds = array<i64: 1, 1, 1>, scalar_prefetch = 0 : i64, scratch_operands = 1 : i64, tpu.core_type = #tpu.core_type<tc>, window_params = [{transform_indices = @transform_0, window_bounds = array<i64: 128, 384>}, {transform_indices = @transform_1, window_bounds = array<i64: 384, 128>}, {transform_indices = @transform_2, window_bounds = array<i64: 1, 128>}, {transform_indices = @transform_3, window_bounds = array<i64: 128, 128>}]} {
    %c0_i32 = arith.constant 0 : i32
    %0 = arith.cmpi eq, %arg2, %c0_i32 : i32
    %1 = arith.extui %0 : i1 to i32
    %c0_i32_0 = arith.constant 0 : i32
    %2 = arith.cmpi ne, %1, %c0_i32_0 : i32
    scf.if %2 {
      %cst_10 = arith.constant 0.000000e+00 : f32
      %12 = vector.broadcast %cst_10 : f32 to vector<128x128xf32>
      %c0_11 = arith.constant 0 : index
      %c0_12 = arith.constant 0 : index
      %13 = vector.load %arg7[%c0_11, %c0_12] : memref<128x128xf32, #tpu.memory_space<vmem>>, vector<128x128xf32>
      tpu.vector_store %arg7[%c0_11, %c0_12], %12 {strides = array<i32>} : memref<128x128xf32, #tpu.memory_space<vmem>>, vector<128x128xf32>,
    } else {
    }
    %c0 = arith.constant 0 : index
    %c0_1 = arith.constant 0 : index
    %3 = vector.load %arg7[%c0, %c0_1] : memref<128x128xf32, #tpu.memory_space<vmem>>, vector<128x128xf32>
    %c0_2 = arith.constant 0 : index
    %c0_3 = arith.constant 0 : index
    %4 = vector.load %arg3[%c0_2, %c0_3] : memref<128x384xf32, #tpu.memory_space<vmem>>, vector<128x384xf32>
    %c0_4 = arith.constant 0 : index
    %c0_5 = arith.constant 0 : index
    %5 = vector.load %arg4[%c0_4, %c0_5] : memref<384x128xf32, #tpu.memory_space<vmem>>, vector<384x128xf32>
    %cst = arith.constant dense<0.000000e+00> : vector<128x128xf32>
    %6 = tpu.matmul %4, %5, %cst {dimension_numbers = #tpu.dot_dimension_numbers<[1], [0], [0], [1], [0, 0, 1, 1], [], []>} : vector<128x384xf32>, vector<384x128xf32>, vector<128x128xf32> -> vector<128x128xf32>
    %7 = arith.addf %3, %6 : vector<128x128xf32>
    %c0_6 = arith.constant 0 : index
    %c0_7 = arith.constant 0 : index
    %8 = vector.load %arg7[%c0_6, %c0_7] : memref<128x128xf32, #tpu.memory_space<vmem>>, vector<128x128xf32>
    tpu.vector_store %arg7[%c0_6, %c0_7], %7 {strides = array<i32>} : memref<128x128xf32, #tpu.memory_space<vmem>>, vector<128x128xf32>,
    %c0_i32_8 = arith.constant 0 : i32
    %9 = arith.cmpi eq, %arg2, %c0_i32_8 : i32
    %10 = arith.extui %9 : i1 to i32
    %c0_i32_9 = arith.constant 0 : i32
    %11 = arith.cmpi ne, %10, %c0_i32_9 : i32
    scf.if %11 {
      %c0_10 = arith.constant 0 : index
      %c0_11 = arith.constant 0 : index
      %12 = vector.load %arg7[%c0_10, %c0_11] : memref<128x128xf32, #tpu.memory_space<vmem>>, vector<128x128xf32>
      %c0_12 = arith.constant 0 : index
      %c0_13 = arith.constant 0 : index
      %13 = vector.load %arg5[%c0_12, %c0_13] : memref<1x128xf32, #tpu.memory_space<vmem>>, vector<1x128xf32>
      %14 = vector.broadcast %13 : vector<1x128xf32> to vector<128x128xf32>
      %15 = arith.addf %12, %14 : vector<128x128xf32>
      %c0_14 = arith.constant 0 : index
      %c0_15 = arith.constant 0 : index
      %16 = vector.load %arg6[%c0_14, %c0_15] : memref<128x128xf32, #tpu.memory_space<vmem>>, vector<128x128xf32>
      tpu.vector_store %arg6[%c0_14, %c0_15], %15 {strides = array<i32>} : memref<128x128xf32, #tpu.memory_space<vmem>>, vector<128x128xf32>,
    } else {
    }
    return
  }
  func.func @transform_0(%arg0: i32, %arg1: i32, %arg2: i32) -> (i32, i32) {
    %c0_i32 = arith.constant 0 : i32
    return %arg0, %arg2 : i32, i32
  }
  func.func @transform_1(%arg0: i32, %arg1: i32, %arg2: i32) -> (i32, i32) {
    %c0_i32 = arith.constant 0 : i32
    return %arg2, %arg1 : i32, i32
  }
  func.func @transform_2(%arg0: i32, %arg1: i32, %arg2: i32) -> (i32, i32) {
    %c0_i32 = arith.constant 0 : i32
    %c0_i32_0 = arith.constant 0 : i32
    return %c0_i32, %arg1 : i32, i32
  }
  func.func @transform_3(%arg0: i32, %arg1: i32, %arg2: i32) -> (i32, i32) {
    %c0_i32 = arith.constant 0 : i32
    return %arg0, %arg1 : i32, i32
  }
}

module attributes {stable_mosaic.version = 11 : i64} {
  func.func @_gn_stats_kernel(%arg0: i32, %arg1: memref<1x256x32xf32, #tpu.memory_space<vmem>>, %arg2: memref<1x2x32xf32, #tpu.memory_space<vmem>>) attributes {dimension_semantics = [#tpu.dimension_semantics<parallel>], iteration_bounds = array<i64: 2>, scalar_prefetch = 0 : i64, scratch_operands = 0 : i64, tpu.core_type = #tpu.core_type<tc>, window_params = [{transform_indices = @transform_0, window_bounds = array<i64: 1, 256, 32>}, {transform_indices = @transform_1, window_bounds = array<i64: 1, 2, 32>}]} {
    %c0 = arith.constant 0 : index
    %c0_0 = arith.constant 0 : index
    %c0_1 = arith.constant 0 : index
    %0 = vector.load %arg1[%c0, %c0_0, %c0_1] : memref<1x256x32xf32, #tpu.memory_space<vmem>>, vector<1x256x32xf32>
    %1 = vector.shape_cast %0 : vector<1x256x32xf32> to vector<256x32xf32>
    %cst = arith.constant dense<0.000000e+00> : vector<32xf32>
    %2 = vector.multi_reduction <add>, %1, %cst [0] : vector<256x32xf32> to vector<32xf32>
    %3 = vector.shape_cast %2 : vector<32xf32> to vector<1x32xf32>
    %c0_2 = arith.constant 0 : index
    %c0_3 = arith.constant 0 : index
    %c0_4 = arith.constant 0 : index
    %4 = vector.load %arg2[%c0_2, %c0_3, %c0_4] : memref<1x2x32xf32, #tpu.memory_space<vmem>>, vector<1x1x32xf32>
    %5 = vector.shape_cast %4 : vector<1x1x32xf32> to vector<1x32xf32>
    %6 = vector.shape_cast %3 : vector<1x32xf32> to vector<1x1x32xf32>
    tpu.vector_store %arg2[%c0_2, %c0_3, %c0_4], %6 {strides = array<i32>} : memref<1x2x32xf32, #tpu.memory_space<vmem>>, vector<1x1x32xf32>,
    %7 = arith.mulf %1, %1 : vector<256x32xf32>
    %cst_5 = arith.constant dense<0.000000e+00> : vector<32xf32>
    %8 = vector.multi_reduction <add>, %7, %cst_5 [0] : vector<256x32xf32> to vector<32xf32>
    %9 = vector.shape_cast %8 : vector<32xf32> to vector<1x32xf32>
    %c0_6 = arith.constant 0 : index
    %c1 = arith.constant 1 : index
    %c0_7 = arith.constant 0 : index
    %10 = vector.load %arg2[%c0_6, %c1, %c0_7] : memref<1x2x32xf32, #tpu.memory_space<vmem>>, vector<1x1x32xf32>
    %11 = vector.shape_cast %10 : vector<1x1x32xf32> to vector<1x32xf32>
    %12 = vector.shape_cast %9 : vector<1x32xf32> to vector<1x1x32xf32>
    tpu.vector_store %arg2[%c0_6, %c1, %c0_7], %12 {strides = array<i32>} : memref<1x2x32xf32, #tpu.memory_space<vmem>>, vector<1x1x32xf32>,
    return
  }
  func.func @transform_0(%arg0: i32) -> (i32, i32, i32) {
    %c0_i32 = arith.constant 0 : i32
    %c0_i32_0 = arith.constant 0 : i32
    %c0_i32_1 = arith.constant 0 : i32
    return %arg0, %c0_i32, %c0_i32_0 : i32, i32, i32
  }
  func.func @transform_1(%arg0: i32) -> (i32, i32, i32) {
    %c0_i32 = arith.constant 0 : i32
    %c0_i32_0 = arith.constant 0 : i32
    %c0_i32_1 = arith.constant 0 : i32
    return %arg0, %c0_i32, %c0_i32_0 : i32, i32, i32
  }
}

module attributes {stable_mosaic.version = 11 : i64} {
  func.func @_matmul_bias_kernel(%arg0: i32, %arg1: i32, %arg2: i32, %arg3: memref<256x384xf32, #tpu.memory_space<vmem>>, %arg4: memref<384x128xf32, #tpu.memory_space<vmem>>, %arg5: memref<1x128xf32, #tpu.memory_space<vmem>>, %arg6: memref<256x128xf32, #tpu.memory_space<vmem>>, %arg7: memref<256x128xf32, #tpu.memory_space<vmem>>) attributes {dimension_semantics = [#tpu.dimension_semantics<parallel>, #tpu.dimension_semantics<parallel>, #tpu.dimension_semantics<arbitrary>], iteration_bounds = array<i64: 2, 1, 1>, scalar_prefetch = 0 : i64, scratch_operands = 1 : i64, tpu.core_type = #tpu.core_type<tc>, window_params = [{transform_indices = @transform_0, window_bounds = array<i64: 256, 384>}, {transform_indices = @transform_1, window_bounds = array<i64: 384, 128>}, {transform_indices = @transform_2, window_bounds = array<i64: 1, 128>}, {transform_indices = @transform_3, window_bounds = array<i64: 256, 128>}]} {
    %c0_i32 = arith.constant 0 : i32
    %0 = arith.cmpi eq, %arg2, %c0_i32 : i32
    %1 = arith.extui %0 : i1 to i32
    %c0_i32_0 = arith.constant 0 : i32
    %2 = arith.cmpi ne, %1, %c0_i32_0 : i32
    scf.if %2 {
      %cst_10 = arith.constant 0.000000e+00 : f32
      %12 = vector.broadcast %cst_10 : f32 to vector<256x128xf32>
      %c0_11 = arith.constant 0 : index
      %c0_12 = arith.constant 0 : index
      %13 = vector.load %arg7[%c0_11, %c0_12] : memref<256x128xf32, #tpu.memory_space<vmem>>, vector<256x128xf32>
      tpu.vector_store %arg7[%c0_11, %c0_12], %12 {strides = array<i32>} : memref<256x128xf32, #tpu.memory_space<vmem>>, vector<256x128xf32>,
    } else {
    }
    %c0 = arith.constant 0 : index
    %c0_1 = arith.constant 0 : index
    %3 = vector.load %arg7[%c0, %c0_1] : memref<256x128xf32, #tpu.memory_space<vmem>>, vector<256x128xf32>
    %c0_2 = arith.constant 0 : index
    %c0_3 = arith.constant 0 : index
    %4 = vector.load %arg3[%c0_2, %c0_3] : memref<256x384xf32, #tpu.memory_space<vmem>>, vector<256x384xf32>
    %c0_4 = arith.constant 0 : index
    %c0_5 = arith.constant 0 : index
    %5 = vector.load %arg4[%c0_4, %c0_5] : memref<384x128xf32, #tpu.memory_space<vmem>>, vector<384x128xf32>
    %cst = arith.constant dense<0.000000e+00> : vector<256x128xf32>
    %6 = tpu.matmul %4, %5, %cst {dimension_numbers = #tpu.dot_dimension_numbers<[1], [0], [0], [1], [0, 0, 1, 1], [], []>} : vector<256x384xf32>, vector<384x128xf32>, vector<256x128xf32> -> vector<256x128xf32>
    %7 = arith.addf %3, %6 : vector<256x128xf32>
    %c0_6 = arith.constant 0 : index
    %c0_7 = arith.constant 0 : index
    %8 = vector.load %arg7[%c0_6, %c0_7] : memref<256x128xf32, #tpu.memory_space<vmem>>, vector<256x128xf32>
    tpu.vector_store %arg7[%c0_6, %c0_7], %7 {strides = array<i32>} : memref<256x128xf32, #tpu.memory_space<vmem>>, vector<256x128xf32>,
    %c0_i32_8 = arith.constant 0 : i32
    %9 = arith.cmpi eq, %arg2, %c0_i32_8 : i32
    %10 = arith.extui %9 : i1 to i32
    %c0_i32_9 = arith.constant 0 : i32
    %11 = arith.cmpi ne, %10, %c0_i32_9 : i32
    scf.if %11 {
      %c0_10 = arith.constant 0 : index
      %c0_11 = arith.constant 0 : index
      %12 = vector.load %arg7[%c0_10, %c0_11] : memref<256x128xf32, #tpu.memory_space<vmem>>, vector<256x128xf32>
      %c0_12 = arith.constant 0 : index
      %c0_13 = arith.constant 0 : index
      %13 = vector.load %arg5[%c0_12, %c0_13] : memref<1x128xf32, #tpu.memory_space<vmem>>, vector<1x128xf32>
      %14 = vector.broadcast %13 : vector<1x128xf32> to vector<256x128xf32>
      %15 = arith.addf %12, %14 : vector<256x128xf32>
      %c0_14 = arith.constant 0 : index
      %c0_15 = arith.constant 0 : index
      %16 = vector.load %arg6[%c0_14, %c0_15] : memref<256x128xf32, #tpu.memory_space<vmem>>, vector<256x128xf32>
      tpu.vector_store %arg6[%c0_14, %c0_15], %15 {strides = array<i32>} : memref<256x128xf32, #tpu.memory_space<vmem>>, vector<256x128xf32>,
    } else {
    }
    return
  }
  func.func @transform_0(%arg0: i32, %arg1: i32, %arg2: i32) -> (i32, i32) {
    %c0_i32 = arith.constant 0 : i32
    return %arg0, %arg2 : i32, i32
  }
  func.func @transform_1(%arg0: i32, %arg1: i32, %arg2: i32) -> (i32, i32) {
    %c0_i32 = arith.constant 0 : i32
    return %arg2, %arg1 : i32, i32
  }
  func.func @transform_2(%arg0: i32, %arg1: i32, %arg2: i32) -> (i32, i32) {
    %c0_i32 = arith.constant 0 : i32
    %c0_i32_0 = arith.constant 0 : i32
    return %c0_i32, %arg1 : i32, i32
  }
  func.func @transform_3(%arg0: i32, %arg1: i32, %arg2: i32) -> (i32, i32) {
    %c0_i32 = arith.constant 0 : i32
    return %arg0, %arg1 : i32, i32
  }
}

module attributes {stable_mosaic.version = 11 : i64} {
  func.func @_gn_apply_kernel(%arg0: i32, %arg1: memref<1x256x32xf32, #tpu.memory_space<vmem>>, %arg2: memref<1x1x32xf32, #tpu.memory_space<vmem>>, %arg3: memref<1x1x32xf32, #tpu.memory_space<vmem>>, %arg4: memref<1x32xf32, #tpu.memory_space<vmem>>, %arg5: memref<1x32xf32, #tpu.memory_space<vmem>>, %arg6: memref<1x256x32xf32, #tpu.memory_space<vmem>>) attributes {dimension_semantics = [#tpu.dimension_semantics<parallel>], iteration_bounds = array<i64: 2>, scalar_prefetch = 0 : i64, scratch_operands = 0 : i64, tpu.core_type = #tpu.core_type<tc>, window_params = [{transform_indices = @transform_0, window_bounds = array<i64: 1, 256, 32>}, {transform_indices = @transform_1, window_bounds = array<i64: 1, 1, 32>}, {transform_indices = @transform_2, window_bounds = array<i64: 1, 1, 32>}, {pipeline_mode = #tpu.pipeline_mode<synchronous>, transform_indices = @transform_3, window_bounds = array<i64: 1, 32>}, {pipeline_mode = #tpu.pipeline_mode<synchronous>, transform_indices = @transform_4, window_bounds = array<i64: 1, 32>}, {transform_indices = @transform_5, window_bounds = array<i64: 1, 256, 32>}]} {
    %c0 = arith.constant 0 : index
    %c0_0 = arith.constant 0 : index
    %c0_1 = arith.constant 0 : index
    %0 = vector.load %arg1[%c0, %c0_0, %c0_1] : memref<1x256x32xf32, #tpu.memory_space<vmem>>, vector<1x256x32xf32>
    %1 = vector.shape_cast %0 : vector<1x256x32xf32> to vector<256x32xf32>
    %c0_2 = arith.constant 0 : index
    %c0_3 = arith.constant 0 : index
    %c0_4 = arith.constant 0 : index
    %2 = vector.load %arg2[%c0_2, %c0_3, %c0_4] : memref<1x1x32xf32, #tpu.memory_space<vmem>>, vector<1x1x32xf32>
    %3 = vector.shape_cast %2 : vector<1x1x32xf32> to vector<1x32xf32>
    %4 = vector.broadcast %3 : vector<1x32xf32> to vector<256x32xf32>
    %5 = arith.subf %1, %4 : vector<256x32xf32>
    %c0_5 = arith.constant 0 : index
    %c0_6 = arith.constant 0 : index
    %c0_7 = arith.constant 0 : index
    %6 = vector.load %arg3[%c0_5, %c0_6, %c0_7] : memref<1x1x32xf32, #tpu.memory_space<vmem>>, vector<1x1x32xf32>
    %7 = vector.shape_cast %6 : vector<1x1x32xf32> to vector<1x32xf32>
    %8 = vector.broadcast %7 : vector<1x32xf32> to vector<256x32xf32>
    %9 = arith.mulf %5, %8 : vector<256x32xf32>
    %c0_8 = arith.constant 0 : index
    %c0_9 = arith.constant 0 : index
    %10 = vector.load %arg4[%c0_8, %c0_9] : memref<1x32xf32, #tpu.memory_space<vmem>>, vector<1x32xf32>
    %11 = vector.broadcast %10 : vector<1x32xf32> to vector<256x32xf32>
    %12 = arith.mulf %9, %11 : vector<256x32xf32>
    %c0_10 = arith.constant 0 : index
    %c0_11 = arith.constant 0 : index
    %13 = vector.load %arg5[%c0_10, %c0_11] : memref<1x32xf32, #tpu.memory_space<vmem>>, vector<1x32xf32>
    %14 = vector.broadcast %13 : vector<1x32xf32> to vector<256x32xf32>
    %15 = arith.addf %12, %14 : vector<256x32xf32>
    %cst = arith.constant 0.000000e+00 : f32
    %16 = vector.broadcast %cst : f32 to vector<256x32xf32>
    %17 = arith.subf %16, %15 : vector<256x32xf32>
    %18 = math.exp %17 : vector<256x32xf32>
    %cst_12 = arith.constant 1.000000e+00 : f32
    %19 = vector.broadcast %cst_12 : f32 to vector<256x32xf32>
    %20 = arith.addf %19, %18 : vector<256x32xf32>
    %cst_13 = arith.constant 1.000000e+00 : f32
    %21 = vector.broadcast %cst_13 : f32 to vector<256x32xf32>
    %22 = arith.divf %21, %20 : vector<256x32xf32>
    %23 = arith.mulf %15, %22 : vector<256x32xf32>
    %c0_14 = arith.constant 0 : index
    %c0_15 = arith.constant 0 : index
    %c0_16 = arith.constant 0 : index
    %24 = vector.load %arg6[%c0_14, %c0_15, %c0_16] : memref<1x256x32xf32, #tpu.memory_space<vmem>>, vector<1x256x32xf32>
    %25 = vector.shape_cast %24 : vector<1x256x32xf32> to vector<256x32xf32>
    %26 = vector.shape_cast %23 : vector<256x32xf32> to vector<1x256x32xf32>
    tpu.vector_store %arg6[%c0_14, %c0_15, %c0_16], %26 {strides = array<i32>} : memref<1x256x32xf32, #tpu.memory_space<vmem>>, vector<1x256x32xf32>,
    return
  }
  func.func @transform_0(%arg0: i32) -> (i32, i32, i32) {
    %c0_i32 = arith.constant 0 : i32
    %c0_i32_0 = arith.constant 0 : i32
    %c0_i32_1 = arith.constant 0 : i32
    return %arg0, %c0_i32, %c0_i32_0 : i32, i32, i32
  }
  func.func @transform_1(%arg0: i32) -> (i32, i32, i32) {
    %c0_i32 = arith.constant 0 : i32
    %c0_i32_0 = arith.constant 0 : i32
    %c0_i32_1 = arith.constant 0 : i32
    return %arg0, %c0_i32, %c0_i32_0 : i32, i32, i32
  }
  func.func @transform_2(%arg0: i32) -> (i32, i32, i32) {
    %c0_i32 = arith.constant 0 : i32
    %c0_i32_0 = arith.constant 0 : i32
    %c0_i32_1 = arith.constant 0 : i32
    return %arg0, %c0_i32, %c0_i32_0 : i32, i32, i32
  }
  func.func @transform_3(%arg0: i32) -> (i32, i32) {
    %c0_i32 = arith.constant 0 : i32
    %c0_i32_0 = arith.constant 0 : i32
    %c0_i32_1 = arith.constant 0 : i32
    return %c0_i32, %c0_i32_0 : i32, i32
  }
  func.func @transform_4(%arg0: i32) -> (i32, i32) {
    %c0_i32 = arith.constant 0 : i32
    %c0_i32_0 = arith.constant 0 : i32
    %c0_i32_1 = arith.constant 0 : i32
    return %c0_i32, %c0_i32_0 : i32, i32
  }
  func.func @transform_5(%arg0: i32) -> (i32, i32, i32) {
    %c0_i32 = arith.constant 0 : i32
    %c0_i32_0 = arith.constant 0 : i32
    %c0_i32_1 = arith.constant 0 : i32
    return %arg0, %c0_i32, %c0_i32_0 : i32, i32, i32
  }
}

</mosaic_0001>

<bundles_post_ra>
// kernel: squeeze.20
= control target key start
LH: loop header
LB: loop body
LE: loop exit
PB: predicated region body
PF: predicated region fallthrough
CT: control target
= control target key end

     0   :  { %s354_s8 = smov 122   ;;  %s355_s9 = smov 124   ;;  %vm7_vm0 = vcmask 15360   ;;  %s653_s0 = inlined_call_operand.vmem [shape: f32[2,64], index: 0, kind: input, shape index: {}]   ;;  %s654_s1 = inlined_call_operand.vmem [shape: f32[2,32,2], index: 1, kind: output, shape index: {}]  }
   0x1   :  { %v4_v0 = vld [vmem:[%s653_s0] sm:$0x3]  ;;  %s353_s0 = smov 126   ;;  %s356_s10 = smov 120  }
   0x2   :  { %5 = vst [vmem:[#allocation0] sm:$0x3] %v4_v0  ;;  %s357_s11 = smov 118   ;;  %s358_s12 = smov 116  }
   0x3   :  { %s359_s13 = smov 114   ;;  %s360_s14 = smov 112  }
   0x4   :  { %s361_s15 = smov 110   ;;  %s362_s16 = smov 108  }
   0x5   :  { %s363_s17 = smov 106   ;;  %s364_s18 = smov 104  }
   0x6   :  { %s365_s19 = smov 102   ;;  %s366_s20 = smov 100  }
   0x7   :  { %s367_s21 = smov 98   ;;  %s368_s22 = smov 96  }
   0x8   :  { %s369_s23 = smov 94   ;;  %s370_s24 = smov 92  }
   0x9   :  { %v11_v1 = vld [vmem:[#allocation0] sm:$0x3]   ;;  %s371_s25 = smov 90   ;;  %s372_s26 = smov 88  }
   0xa   :  { %v27_v2 = vld [vmem:[#allocation0] sm:$0x3]   ;;  %12 = vrot.lane.b32.xlu0 %v11_v1, %s353_s0  ;;  %s373_s27 = smov 86   ;;  %s374_s28 = smov 84  }
   0xb   :  { %28 = vrot.lane.b32.xlu1 %v27_v2, %s354_s8  ;;  %v19_v3 = vld [vmem:[#allocation0] sm:$0x3]   ;;  %s375_s29 = smov 82   ;;  %s376_s30 = smov 80  }
   0xc   :  { %v35_v4 = vld [vmem:[#allocation0] sm:$0x3]   ;;  %s377_s6 = smov 78   ;;  %s378_s7 = smov 76  }
   0xd   :  { %v43_v5 = vld [vmem:[#allocation0] sm:$0x3]   ;;  %s379_s0 = smov 74   ;;  %s380_s8 = smov 72  }
   0xe   :  { %20 = vrot.lane.b32.xlu0 %v19_v3, %s355_s9  ;;  %v51_v6 = vld [vmem:[#allocation0] sm:$0x3]   ;;  %s381_s9 = smov 70  }
   0xf   :  { %36 = vrot.lane.b32.xlu1 %v35_v4, %s356_s10  ;;  %v59_v7 = vld [vmem:[#allocation0] sm:$0x3]   ;;  %s382_s10 = smov 68  }
  0x10   :  { %v67_v8 = vld [vmem:[#allocation0] sm:$0x3]  }
  0x11   :  { %v75_v9 = vld [vmem:[#allocation0] sm:$0x3]  }
  0x12   :  { %44 = vrot.lane.b32.xlu0 %v43_v5, %s357_s11  ;;  %v83_v10 = vld [vmem:[#allocation0] sm:$0x3]   ;;  %s383_s11 = smov 66  }
  0x13   :  { %52 = vrot.lane.b32.xlu1 %v51_v6, %s358_s12  ;;  %v91_v11 = vld [vmem:[#allocation0] sm:$0x3]  }
  0x14   :  { %v99_v12 = vld [vmem:[#allocation0] sm:$0x3]  }
  0x15   :  { %v107_v13 = vld [vmem:[#allocation0] sm:$0x3]  }
  0x16   :  { %60 = vrot.lane.b32.xlu0 %v59_v7, %s359_s13  ;;  %v115_v14 = vld [vmem:[#allocation0] sm:$0x3]  }
  0x17   :  { %68 = vrot.lane.b32.xlu1 %v67_v8, %s360_s14  ;;  %v123_v15 = vld [vmem:[#allocation0] sm:$0x3]  }
  0x18   :  { %v131_v16 = vld [vmem:[#allocation0] sm:$0x3]  }
  0x19   :  { %v139_v17 = vld [vmem:[#allocation0] sm:$0x3]  }
  0x1a   :  { %76 = vrot.lane.b32.xlu0 %v75_v9, %s361_s15  ;;  %v147_v18 = vld [vmem:[#allocation0] sm:$0x3]  }
  0x1b   :  { %84 = vrot.lane.b32.xlu1 %v83_v10, %s362_s16  ;;  %v155_v19 = vld [vmem:[#allocation0] sm:$0x3]  }
  0x1c   :  { %v163_v20 = vld [vmem:[#allocation0] sm:$0x3]  }
  0x1d   :  { %v171_v21 = vld [vmem:[#allocation0] sm:$0x3]  }
  0x1e   :  { %92 = vrot.lane.b32.xlu0 %v91_v11, %s363_s17  ;;  %v179_v22 = vld [vmem:[#allocation0] sm:$0x3]  }
  0x1f   :  { %100 = vrot.lane.b32.xlu1 %v99_v12, %s364_s18  ;;  %v187_v23 = vld [vmem:[#allocation0] sm:$0x3]  }
  0x20   :  { %v195_v24 = vld [vmem:[#allocation0] sm:$0x3]  }
  0x21   :  { %v203_v25 = vld [vmem:[#allocation0] sm:$0x3]  }
  0x22   :  { %108 = vrot.lane.b32.xlu0 %v107_v13, %s365_s19  ;;  %v211_v26 = vld [vmem:[#allocation0] sm:$0x3]  }
  0x23   :  { %116 = vrot.lane.b32.xlu1 %v115_v14, %s366_s20  ;;  %v6_v27 = vld [vmem:[#allocation0] sm:$0x3]  }
  0x24   :  { %8 = vst.msk [vmem:[%s654_s1] sm:$0x1] %vm7_vm0, %v6_v27   ;;  %259 = vst.msk [vmem:[%s654_s1 + $0x1f] sm:$0x2] %vm7_vm0, %v6_v27   ;;  %v219_v28 = vld [vmem:[#allocation0] sm:$0x3]  }
  0x25   :  { %v227_v29 = vld [vmem:[#allocation0] sm:$0x3]  }
  0x26   :  { %124 = vrot.lane.b32.xlu0 %v123_v15, %s367_s21  ;;  %v235_v30 = vld [vmem:[#allocation0] sm:$0x3]  }
  0x27   :  { %132 = vrot.lane.b32.xlu1 %v131_v16, %s368_s22  ;;  %v243_v31 = vld [vmem:[#allocation0] sm:$0x3]  }
  0x28   :  { %v251_v32 = vld [vmem:[#allocation0] sm:$0x3]  }
  0x2a   :  { %140 = vrot.lane.b32.xlu0 %v139_v17, %s369_s23 }
  0x2b   :  { %148 = vrot.lane.b32.xlu1 %v147_v18, %s370_s24 }
  0x2e   :  { %156 = vrot.lane.b32.xlu0 %v155_v19, %s371_s25 }
  0x2f   :  { %164 = vrot.lane.b32.xlu1 %v163_v20, %s372_s26 }
  0x32   :  { %172 = vrot.lane.b32.xlu0 %v171_v21, %s373_s27 }
  0x33   :  { %180 = vrot.lane.b32.xlu1 %v179_v22, %s374_s28 }
  0x36   :  { %188 = vrot.lane.b32.xlu0 %v187_v23, %s375_s29 }
  0x37   :  { %196 = vrot.lane.b32.xlu1 %v195_v24, %s376_s30 }
  0x3a   :  { %204 = vrot.lane.b32.xlu0 %v203_v25, %s377_s6 }
  0x3b   :  { %212 = vrot.lane.b32.xlu1 %v211_v26, %s378_s7 }
  0x3e   :  { %220 = vrot.lane.b32.xlu0 %v219_v28, %s379_s0 }
  0x3f   :  { %228 = vrot.lane.b32.xlu1 %v227_v29, %s380_s8 }
  0x42   :  { %236 = vrot.lane.b32.xlu0 %v235_v30, %s381_s9 }
  0x43   :  { %244 = vrot.lane.b32.xlu1 %v243_v31, %s382_s10 }
  0x46   :  { %252 = vrot.lane.b32.xlu0 %v251_v32, %s383_s11 }
  0x7c   :  { %v13_v33 = vpop.permute.xlu0 %12  }
  0x7d   :  { %v29_v34 = vpop.permute.xlu1 %28   ;;  %260 = vst.msk [vmem:[%s654_s1 + $0x1] sm:$0x1] %vm7_vm0, %v13_v33   ;;  %261 = vst.msk [vmem:[%s654_s1 + $0x20] sm:$0x2] %vm7_vm0, %v13_v33  }
  0x7e   :  { %264 = vst.msk [vmem:[%s654_s1 + $0x3] sm:$0x1] %vm7_vm0, %v29_v34   ;;  %265 = vst.msk [vmem:[%s654_s1 + $0x22] sm:$0x2] %vm7_vm0, %v29_v34  }
  0x80   :  { %v21_v35 = vpop.permute.xlu0 %20  }
  0x81   :  { %v37_v36 = vpop.permute.xlu1 %36   ;;  %262 = vst.msk [vmem:[%s654_s1 + $0x2] sm:$0x1] %vm7_vm0, %v21_v35   ;;  %263 = vst.msk [vmem:[%s654_s1 + $0x21] sm:$0x2] %vm7_vm0, %v21_v35  }
  0x82   :  { %266 = vst.msk [vmem:[%s654_s1 + $0x4] sm:$0x1] %vm7_vm0, %v37_v36   ;;  %267 = vst.msk [vmem:[%s654_s1 + $0x23] sm:$0x2] %vm7_vm0, %v37_v36  }
  0x84   :  { %v45_v37 = vpop.permute.xlu0 %44  }
  0x85   :  { %v53_v38 = vpop.permute.xlu1 %52   ;;  %268 = vst.msk [vmem:[%s654_s1 + $0x5] sm:$0x1] %vm7_vm0, %v45_v37   ;;  %269 = vst.msk [vmem:[%s654_s1 + $0x24] sm:$0x2] %vm7_vm0, %v45_v37  }
  0x86   :  { %270 = vst.msk [vmem:[%s654_s1 + $0x6] sm:$0x1] %vm7_vm0, %v53_v38   ;;  %271 = vst.msk [vmem:[%s654_s1 + $0x25] sm:$0x2] %vm7_vm0, %v53_v38  }
  0x88   :  { %v61_v39 = vpop.permute.xlu0 %60  }
  0x89   :  { %v69_v40 = vpop.permute.xlu1 %68   ;;  %272 = vst.msk [vmem:[%s654_s1 + $0x7] sm:$0x1] %vm7_vm0, %v61_v39   ;;  %273 = vst.msk [vmem:[%s654_s1 + $0x26] sm:$0x2] %vm7_vm0, %v61_v39  }
  0x8a   :  { %274 = vst.msk [vmem:[%s654_s1 + $0x8] sm:$0x1] %vm7_vm0, %v69_v40   ;;  %275 = vst.msk [vmem:[%s654_s1 + $0x27] sm:$0x2] %vm7_vm0, %v69_v40  }
  0x8c   :  { %v77_v41 = vpop.permute.xlu0 %76  }
  0x8d   :  { %v85_v42 = vpop.permute.xlu1 %84   ;;  %276 = vst.msk [vmem:[%s654_s1 + $0x9] sm:$0x1] %vm7_vm0, %v77_v41   ;;  %277 = vst.msk [vmem:[%s654_s1 + $0x28] sm:$0x2] %vm7_vm0, %v77_v41  }
  0x8e   :  { %278 = vst.msk [vmem:[%s654_s1 + $0xa] sm:$0x1] %vm7_vm0, %v85_v42   ;;  %279 = vst.msk [vmem:[%s654_s1 + $0x29] sm:$0x2] %vm7_vm0, %v85_v42  }
  0x90   :  { %v93_v43 = vpop.permute.xlu0 %92  }
  0x91   :  { %v101_v44 = vpop.permute.xlu1 %100   ;;  %280 = vst.msk [vmem:[%s654_s1 + $0xb] sm:$0x1] %vm7_vm0, %v93_v43   ;;  %281 = vst.msk [vmem:[%s654_s1 + $0x2a] sm:$0x2] %vm7_vm0, %v93_v43  }
  0x92   :  { %282 = vst.msk [vmem:[%s654_s1 + $0xc] sm:$0x1] %vm7_vm0, %v101_v44   ;;  %283 = vst.msk [vmem:[%s654_s1 + $0x2b] sm:$0x2] %vm7_vm0, %v101_v44  }
  0x94   :  { %v109_v45 = vpop.permute.xlu0 %108  }
  0x95   :  { %v117_v46 = vpop.permute.xlu1 %116   ;;  %284 = vst.msk [vmem:[%s654_s1 + $0xd] sm:$0x1] %vm7_vm0, %v109_v45   ;;  %285 = vst.msk [vmem:[%s654_s1 + $0x2c] sm:$0x2] %vm7_vm0, %v109_v45  }
  0x96   :  { %286 = vst.msk [vmem:[%s654_s1 + $0xe] sm:$0x1] %vm7_vm0, %v117_v46   ;;  %287 = vst.msk [vmem:[%s654_s1 + $0x2d] sm:$0x2] %vm7_vm0, %v117_v46  }
  0x98   :  { %v125_v47 = vpop.permute.xlu0 %124  }
  0x99   :  { %v133_v48 = vpop.permute.xlu1 %132   ;;  %288 = vst.msk [vmem:[%s654_s1 + $0xf] sm:$0x1] %vm7_vm0, %v125_v47   ;;  %289 = vst.msk [vmem:[%s654_s1 + $0x2e] sm:$0x2] %vm7_vm0, %v125_v47  }
  0x9a   :  { %290 = vst.msk [vmem:[%s654_s1 + $0x10] sm:$0x1] %vm7_vm0, %v133_v48   ;;  %291 = vst.msk [vmem:[%s654_s1 + $0x2f] sm:$0x2] %vm7_vm0, %v133_v48  }
  0x9c   :  { %v141_v49 = vpop.permute.xlu0 %140  }
  0x9d   :  { %v149_v50 = vpop.permute.xlu1 %148   ;;  %292 = vst.msk [vmem:[%s654_s1 + $0x11] sm:$0x1] %vm7_vm0, %v141_v49   ;;  %293 = vst.msk [vmem:[%s654_s1 + $0x30] sm:$0x2] %vm7_vm0, %v141_v49  }
  0x9e   :  { %294 = vst.msk [vmem:[%s654_s1 + $0x12] sm:$0x1] %vm7_vm0, %v149_v50   ;;  %295 = vst.msk [vmem:[%s654_s1 + $0x31] sm:$0x2] %vm7_vm0, %v149_v50  }
  0xa0   :  { %v157_v51 = vpop.permute.xlu0 %156  }
  0xa1   :  { %v165_v52 = vpop.permute.xlu1 %164   ;;  %296 = vst.msk [vmem:[%s654_s1 + $0x13] sm:$0x1] %vm7_vm0, %v157_v51   ;;  %297 = vst.msk [vmem:[%s654_s1 + $0x32] sm:$0x2] %vm7_vm0, %v157_v51  }
  0xa2   :  { %298 = vst.msk [vmem:[%s654_s1 + $0x14] sm:$0x1] %vm7_vm0, %v165_v52   ;;  %299 = vst.msk [vmem:[%s654_s1 + $0x33] sm:$0x2] %vm7_vm0, %v165_v52  }
  0xa4   :  { %v173_v53 = vpop.permute.xlu0 %172  }
  0xa5   :  { %v181_v54 = vpop.permute.xlu1 %180   ;;  %300 = vst.msk [vmem:[%s654_s1 + $0x15] sm:$0x1] %vm7_vm0, %v173_v53   ;;  %301 = vst.msk [vmem:[%s654_s1 + $0x34] sm:$0x2] %vm7_vm0, %v173_v53  }
  0xa6   :  { %302 = vst.msk [vmem:[%s654_s1 + $0x16] sm:$0x1] %vm7_vm0, %v181_v54   ;;  %303 = vst.msk [vmem:[%s654_s1 + $0x35] sm:$0x2] %vm7_vm0, %v181_v54  }
  0xa8   :  { %v189_v55 = vpop.permute.xlu0 %188  }
  0xa9   :  { %v197_v56 = vpop.permute.xlu1 %196   ;;  %304 = vst.msk [vmem:[%s654_s1 + $0x17] sm:$0x1] %vm7_vm0, %v189_v55   ;;  %305 = vst.msk [vmem:[%s654_s1 + $0x36] sm:$0x2] %vm7_vm0, %v189_v55  }
  0xaa   :  { %306 = vst.msk [vmem:[%s654_s1 + $0x18] sm:$0x1] %vm7_vm0, %v197_v56   ;;  %307 = vst.msk [vmem:[%s654_s1 + $0x37] sm:$0x2] %vm7_vm0, %v197_v56  }
  0xac   :  { %v205_v57 = vpop.permute.xlu0 %204  }
  0xad   :  { %v213_v58 = vpop.permute.xlu1 %212   ;;  %308 = vst.msk [vmem:[%s654_s1 + $0x19] sm:$0x1] %vm7_vm0, %v205_v57   ;;  %309 = vst.msk [vmem:[%s654_s1 + $0x38] sm:$0x2] %vm7_vm0, %v205_v57  }
  0xae   :  { %310 = vst.msk [vmem:[%s654_s1 + $0x1a] sm:$0x1] %vm7_vm0, %v213_v58   ;;  %311 = vst.msk [vmem:[%s654_s1 + $0x39] sm:$0x2] %vm7_vm0, %v213_v58  }
  0xb0   :  { %v221_v59 = vpop.permute.xlu0 %220  }
  0xb1   :  { %v229_v60 = vpop.permute.xlu1 %228   ;;  %312 = vst.msk [vmem:[%s654_s1 + $0x1b] sm:$0x1] %vm7_vm0, %v221_v59   ;;  %313 = vst.msk [vmem:[%s654_s1 + $0x3a] sm:$0x2] %vm7_vm0, %v221_v59  }
  0xb2   :  { %314 = vst.msk [vmem:[%s654_s1 + $0x1c] sm:$0x1] %vm7_vm0, %v229_v60   ;;  %315 = vst.msk [vmem:[%s654_s1 + $0x3b] sm:$0x2] %vm7_vm0, %v229_v60  }
  0xb4   :  { %v237_v61 = vpop.permute.xlu0 %236  }
  0xb5   :  { %v245_v62 = vpop.permute.xlu1 %244   ;;  %316 = vst.msk [vmem:[%s654_s1 + $0x1d] sm:$0x1] %vm7_vm0, %v237_v61   ;;  %317 = vst.msk [vmem:[%s654_s1 + $0x3c] sm:$0x2] %vm7_vm0, %v237_v61  }
  0xb6   :  { %318 = vst.msk [vmem:[%s654_s1 + $0x1e] sm:$0x1] %vm7_vm0, %v245_v62   ;;  %319 = vst.msk [vmem:[%s654_s1 + $0x3d] sm:$0x2] %vm7_vm0, %v245_v62  }
  0xb8   :  { %v253_v63 = vpop.permute.xlu0 %252  }
  0xb9   :  { %320 = vst.msk [vmem:[%s654_s1 + $0x1f] sm:$0x1] %vm7_vm0, %v253_v63   ;;  %321 = vst.msk [vmem:[%s654_s1 + $0x3e] sm:$0x2] %vm7_vm0, %v253_v63  }

// kernel: _apply_model.38
= control target key start
LH: loop header
LB: loop body
LE: loop exit
PB: predicated region body
PF: predicated region fallthrough
CT: control target
= control target key end

     0   :  { %s267_s6 = smov 0   ;;  %s304_s0 = inlined_call_operand.vmem [shape: f32[2,64,64], index: 0, kind: input, shape index: {}]   ;;  %s305_s1 = inlined_call_operand.vmem [shape: f32[2,2,64], index: 1, kind: output, shape index: {}]  }
   0x1 LB: > { %s230_s7 = sadd.s32 4294967295, %s255_s6   ;;  %p234_p0 = scmp.ge.s32.totalorder %s255_s6, 1  ;;  %s255_s6 = sphi %s267_s6, %s11_s6  }
   0x2   : > { %p87_p1 = scmp.lt.s32.totalorder %s255_s6, 3 }
   0x4   : > { %p88_p2 = pnand %p234_p0, %p87_p1 }
   0x5   : > { %p106_p3 = scmp.lt.s32.totalorder (!%p88_p2), %s230_s7, 1  ;;  %vm123_vm0 = vcmask (!%p88_p2), 523264   ;;  %vm145_vm1 = vcmask (!%p88_p2), 516096  }
   0x6   : > { %91 = sbr.rel (%p88_p2) target bundleno = 48 (0x30), region = 24 }
   0xd   : > { %s307_s7 = smov (!%p106_p3, %s230_s7), 1 }
   0xe   : > { %s240_s8 = sshll.u32 %s307_s7, 6  ;;  %s237_s12 = sshll.u32 %s307_s7, 1 }
   0xf   : > { %s110_s11 = scalar_lea.vmem %s304_s0, %s240_s8  ;;  %s114_s15 = scalar_lea.vmem %s305_s1, %s237_s12 }
  0x10   : > { %v115_v0 = vld [vmem:[%s110_s11] sm:$0xff]  ;;  %v116_v1 = vld [vmem:[%s110_s11 + $0x8] sm:$0xff]  ;;  %v117_v2 = vld [vmem:[%s110_s11 + $0x10] sm:$0xff] }
  0x11   : > { %v118_v3 = vld [vmem:[%s110_s11 + $0x18] sm:$0xff]  ;;  %v124_v4 = vsel %vm123_vm0, %v115_v0, 0.0  ;;  %v125_v5 = vsel %vm123_vm0, %v116_v1, 0.0  ;;  %v127_v6 = vsel %vm123_vm0, %v117_v2, 0.0  ;;  %v147_v7 = vmul.f32 %v115_v0, %v115_v0  ;;  %v119_v8 = vld [vmem:[%s110_s11 + $0x20] sm:$0xff]  ;;  %v120_v13 = vld [vmem:[%s110_s11 + $0x28] sm:$0xff] }
  0x12   : > { %v126_v9 = vadd.f32 %v125_v5, %v124_v4  ;;  %v129_v10 = vsel %vm123_vm0, %v118_v3, 0.0  ;;  %v148_v11 = vmul.f32 %v116_v1, %v116_v1  ;;  %v149_v12 = vmul.f32 %v117_v2, %v117_v2  ;;  %v121_v20 = vld [vmem:[%s110_s11 + $0x30] sm:$0xff]  ;;  %v122_v27 = vld [vmem:[%s110_s11 + $0x38] sm:$0xff] }
  0x13   : > { %v150_v15 = vmul.f32 %v118_v3, %v118_v3  ;;  %v131_v16 = vsel %vm123_vm0, %v119_v8, 0.0  ;;  %v151_v17 = vmul.f32 %v119_v8, %v119_v8  ;;  %v155_v18 = vsel %vm123_vm0, %v147_v7, 0.0 }
  0x14   : > { %v128_v14 = vadd.f32 %v127_v6, %v126_v9  ;;  %v156_v19 = vsel %vm123_vm0, %v148_v11, 0.0  ;;  %v158_v23 = vsel %vm123_vm0, %v149_v12, 0.0  ;;  %v133_v24 = vsel %vm123_vm0, %v120_v13, 0.0 }
  0x15   : > { %v157_v22 = vadd.f32 %v156_v19, %v155_v18  ;;  %v152_v25 = vmul.f32 %v120_v13, %v120_v13  ;;  %v160_v26 = vsel %vm123_vm0, %v150_v15, 0.0  ;;  %v135_v30 = vsel %vm123_vm0, %v121_v20, 0.0 }
  0x16   : > { %v130_v21 = vadd.f32 %v129_v10, %v128_v14  ;;  %v153_v31 = vmul.f32 %v121_v20, %v121_v20  ;;  %v162_v32 = vsel %vm123_vm0, %v151_v17, 0.0  ;;  %v137_v35 = vsel %vm123_vm0, %v122_v27, 0.0 }
  0x17   : > { %v159_v29 = vadd.f32 %v158_v23, %v157_v22  ;;  %v154_v36 = vmul.f32 %v122_v27, %v122_v27  ;;  %v164_v37 = vsel %vm123_vm0, %v152_v25, 0.0 }
  0x18   : > { %v132_v28 = vadd.f32 %v131_v16, %v130_v21  ;;  %v166_v40 = vsel %vm123_vm0, %v153_v31, 0.0 }
  0x19   : > { %v161_v34 = vadd.f32 %v160_v26, %v159_v29  ;;  %v168_v43 = vsel %vm123_vm0, %v154_v36, 0.0 }
  0x1a   : > { %v134_v33 = vadd.f32 %v133_v24, %v132_v28 }
  0x1b   : > { %v163_v39 = vadd.f32 %v162_v32, %v161_v34 }
  0x1c   : > { %v136_v38 = vadd.f32 %v135_v30, %v134_v33 }
  0x1d   : > { %v165_v42 = vadd.f32 %v164_v37, %v163_v39 }
  0x1e   : > { %v138_v41 = vadd.f32 %v137_v35, %v136_v38 }
  0x1f   : > { %v167_v45 = vadd.f32 %v166_v40, %v165_v42 }
  0x20   : > { %v139_v44 = vrot.slane %v138_v41, 4 }
  0x21   : > { %v169_v47 = vadd.f32 %v168_v43, %v167_v45 }
  0x22   : > { %v140_v46 = vadd.f32 %v139_v44, %v138_v41 }
  0x23   : > { %v170_v49 = vrot.slane %v169_v47, 4 }
  0x24   : > { %v141_v48 = vrot.slane %v140_v46, 2 }
  0x25   : > { %v171_v51 = vadd.f32 %v170_v49, %v169_v47 }
  0x26   : > { %v142_v50 = vadd.f32 %v141_v48, %v140_v46 }
  0x27   : > { %v172_v53 = vrot.slane %v171_v51, 2 }
  0x28   : > { %v143_v52 = vrot.slane %v142_v50, 1 }
  0x29   : > { %v173_v55 = vadd.f32 %v172_v53, %v171_v51 }
  0x2a   : > { %v144_v54 = vadd.f32 %v143_v52, %v142_v50 }
  0x2b   : > { %v174_v56 = vrot.slane %v173_v55, 1 }
  0x2c   : > { %146 = vst.msk [vmem:[%s114_s15] sm:$0x1] %vm145_vm1, %v144_v54 }
  0x2d   : > { %v175_v57 = vadd.f32 %v174_v56, %v173_v55 }
  0x2f   : > { %176 = vst.msk [vmem:[%s114_s15 + $0x1] sm:$0x1] %vm145_vm1, %v175_v57 }
  0x30 PF: > { %s11_s6 = sadd.s32 1, %s255_s6  }
  0x31   : > { %p8_p4 = scmp.ge.s32.totalorder %s11_s6, 4  }
  0x33   :  { %10 = sbr.rel (!%p8_p4) target bundleno = 1 (0x1), region = 54 }

// kernel: _apply_model.39
= control target key start
LH: loop header
LB: loop body
LE: loop exit
PB: predicated region body
PF: predicated region fallthrough
CT: control target
= control target key end

     0   :  { %s554_s18 = smov 0   ;;  %s632_s0 = inlined_call_operand.vmem [shape: f32[2,64,64], index: 0, kind: input, shape index: {}]   ;;  %s633_s1 = inlined_call_operand.vmem [shape: f32[2,1,64], index: 1, kind: input, shape index: {}]   ;;  %s634_s2 = inlined_call_operand.vmem [shape: f32[2,1,64], index: 2, kind: input, shape index: {}]   ;;  %s635_s3 = inlined_call_operand.vmem [shape: f32[1,64], index: 3, kind: input, shape index: {}]   ;;  %s636_s4 = inlined_call_operand.vmem [shape: f32[1,64], index: 4, kind: input, shape index: {}]   ;;  %s637_s5 = inlined_call_operand.vmem [shape: f32[2,64,64], index: 5, kind: output, shape index: {}]  }
   0x1 LB: > { %s459_s19 = sadd.s32 4294967295, %s522_s18   ;;  %p463_p0 = scmp.ge.s32.totalorder %s522_s18, 1  ;;  %s522_s18 = sphi %s554_s18, %s15_s18  }
   0x2   : > { %p203_p1 = scmp.lt.s32.totalorder %s522_s18, 3 }
   0x4   : > { %p204_p2 = pnand %p463_p0, %p203_p1 }
   0x5   : > { %p237_p3 = scmp.lt.s32.totalorder (!%p204_p2), %s459_s19, 1  ;;  %v470_v3 = vld [vmem:[%s635_s3] ss:$0 sm:$0xff] (!%p204_p2)  ;;  %vm377_vm0 = vcmask (!%p204_p2), 523264  }
   0x6   : > { %207 = sbr.rel (%p204_p2) target bundleno = 63 (0x3f), region = 40  ;;  %v471_v20 = vld [vmem:[%s636_s4] ss:$0 sm:$0xff] (!%p204_p2) }
   0xd   : > { %s639_s19 = smov (!%p237_p3, %s459_s19), 1 }
   0xe   : > { %s474_s20 = sshll.u32 %s639_s19, 6  ;;  %s244_s23 = scalar_lea.vmem %s633_s1, %s639_s19 }
   0xf   : > { %s241_s26 = scalar_lea.vmem %s632_s0, %s474_s20  ;;  %s247_s29 = scalar_lea.vmem %s634_s2, %s639_s19  ;;  %v468_v0 = vld [vmem:[%s244_s23] ss:$0 sm:$0xff] }
  0x10   : > { %v253_v1 = vld [vmem:[%s241_s26] sm:$0xff]  ;;  %v254_v4 = vld [vmem:[%s241_s26 + $0x8] sm:$0xff]  ;;  %v255_v7 = vld [vmem:[%s241_s26 + $0x10] sm:$0xff]  ;;  %s252_s11 = scalar_lea.vmem %s637_s5, %s474_s20 }
  0x11   : > { %v469_v2 = vld [vmem:[%s247_s29] ss:$0 sm:$0xff]  ;;  %v268_v5 = vsub.f32 %v253_v1, %v468_v0  ;;  %v269_v6 = vsub.f32 %v254_v4, %v468_v0  ;;  %v256_v8 = vld [vmem:[%s241_s26 + $0x18] sm:$0xff]  ;;  %v270_v10 = vsub.f32 %v255_v7, %v468_v0  ;;  %v258_v13 = vld [vmem:[%s241_s26 + $0x28] sm:$0xff] }
  0x12   : > { %v257_v9 = vld [vmem:[%s241_s26 + $0x20] sm:$0xff]  ;;  %v271_v11 = vsub.f32 %v256_v8, %v468_v0  ;;  %v259_v14 = vld [vmem:[%s241_s26 + $0x30] sm:$0xff]  ;;  %v260_v15 = vld [vmem:[%s241_s26 + $0x38] sm:$0xff]  ;;  %v273_v18 = vsub.f32 %v258_v13, %v468_v0 }
  0x13   : > { %v272_v12 = vsub.f32 %v257_v9, %v468_v0  ;;  %v283_v16 = vmul.f32 %v469_v2, %v268_v5  ;;  %v284_v17 = vmul.f32 %v469_v2, %v269_v6  ;;  %v274_v19 = vsub.f32 %v259_v14, %v468_v0 }
  0x14   : > { %v285_v21 = vmul.f32 %v469_v2, %v270_v10  ;;  %v286_v22 = vmul.f32 %v469_v2, %v271_v11  ;;  %v275_v24 = vsub.f32 %v260_v15, %v468_v0  ;;  %v288_v27 = vmul.f32 %v469_v2, %v273_v18 }
  0x15   : > { %v287_v23 = vmul.f32 %v469_v2, %v272_v12  ;;  %v298_v25 = vmul.f32 %v470_v3, %v283_v16  ;;  %v299_v26 = vmul.f32 %v470_v3, %v284_v17  ;;  %v289_v28 = vmul.f32 %v469_v2, %v274_v19 }
  0x16   : > { %v300_v29 = vmul.f32 %v470_v3, %v285_v21  ;;  %v301_v30 = vmul.f32 %v470_v3, %v286_v22  ;;  %v290_v32 = vmul.f32 %v469_v2, %v275_v24  ;;  %v303_v35 = vmul.f32 %v470_v3, %v288_v27 }
  0x17   : > { %v302_v31 = vmul.f32 %v470_v3, %v287_v23  ;;  %v584_v33 = vadd.f32 %v471_v20, %v298_v25  ;;  %v586_v34 = vadd.f32 %v471_v20, %v299_v26  ;;  %v304_v36 = vmul.f32 %v470_v3, %v289_v28 }
  0x18   : > { %v588_v37 = vadd.f32 %v471_v20, %v300_v29  ;;  %v590_v38 = vadd.f32 %v471_v20, %v301_v30  ;;  %v305_v40 = vmul.f32 %v470_v3, %v290_v32  ;;  %v596_v43 = vadd.f32 %v471_v20, %v303_v35 }
  0x19   : > { %v592_v39 = vadd.f32 %v471_v20, %v302_v31  ;;  %v321_v41 = vsub.f32 0.0, %v584_v33  ;;  %v322_v42 = vsub.f32 0.0, %v586_v34  ;;  %v598_v44 = vadd.f32 %v471_v20, %v304_v36 }
  0x1a   : > { %v323_v45 = vsub.f32 0.0, %v588_v37  ;;  %v324_v46 = vsub.f32 0.0, %v590_v38  ;;  %v603_v48 = vadd.f32 %v471_v20, %v305_v40  ;;  %v326_v51 = vsub.f32 0.0, %v596_v43 }
  0x1b   : > { %v325_v47 = vsub.f32 0.0, %v592_v39  ;;  %v329_v49 = vmul.f32 1.442695, %v321_v41  ;;  %v331_v50 = vmul.f32 1.442695, %v322_v42  ;;  %v327_v52 = vsub.f32 0.0, %v598_v44 }
  0x1c   : > { %v333_v53 = vmul.f32 1.442695, %v323_v45  ;;  %v335_v54 = vmul.f32 1.442695, %v324_v46  ;;  %v328_v56 = vsub.f32 0.0, %v603_v48 }
  0x1d   : > { %484 = vpow2.f32 %v329_v49  ;;  %v337_v55 = vmul.f32 1.442695, %v325_v47  ;;  %v339_v57 = vmul.f32 1.442695, %v326_v51  ;;  %v341_v58 = vmul.f32 1.442695, %v327_v52 }
  0x1e   : > { %486 = vpow2.f32 %v331_v50  ;;  %v343_v59 = vmul.f32 1.442695, %v328_v56 }
  0x1f   : > { %488 = vpow2.f32 %v333_v53 }
  0x20   : > { %490 = vpow2.f32 %v335_v54 }
  0x21   : > { %492 = vpow2.f32 %v337_v55 }
  0x22   : > { %494 = vpow2.f32 %v339_v57 }
  0x23   : > { %496 = vpow2.f32 %v341_v58 }
  0x24   : > { %498 = vpow2.f32 %v343_v59 }
  0x27   : > { %v485_v60 = vpop.eup %484 }
  0x28   : > { %v487_v61 = vpop.eup %486  ;;  %v345_v62 = vadd.f32 1.0, %v485_v60 }
  0x29   : > { %v489_v63 = vpop.eup %488  ;;  %v346_v0 = vadd.f32 1.0, %v487_v61 }
  0x2a   : > { %v491_v1 = vpop.eup %490  ;;  %500 = vrcp.f32 %v345_v62  ;;  %v347_v2 = vadd.f32 1.0, %v489_v63 }
  0x2b   : > { %v493_v3 = vpop.eup %492  ;;  %502 = vrcp.f32 %v346_v0  ;;  %v348_v4 = vadd.f32 1.0, %v491_v1 }
  0x2c   : > { %v495_v5 = vpop.eup %494  ;;  %504 = vrcp.f32 %v347_v2  ;;  %v349_v6 = vadd.f32 1.0, %v493_v3 }
  0x2d   : > { %v497_v7 = vpop.eup %496  ;;  %506 = vrcp.f32 %v348_v4  ;;  %v350_v8 = vadd.f32 1.0, %v495_v5 }
  0x2e   : > { %v499_v9 = vpop.eup %498  ;;  %508 = vrcp.f32 %v349_v6  ;;  %v351_v10 = vadd.f32 1.0, %v497_v7 }
  0x2f   : > { %510 = vrcp.f32 %v350_v8  ;;  %v352_v11 = vadd.f32 1.0, %v499_v9 }
  0x30   : > { %512 = vrcp.f32 %v351_v10 }
  0x31   : > { %514 = vrcp.f32 %v352_v11 }
  0x34   : > { %v501_v12 = vpop.eup %500 }
  0x35   : > { %v503_v13 = vpop.eup %502  ;;  %v369_v14 = vmul.f32 %v501_v12, %v584_v33 }
  0x36   : > { %v505_v15 = vpop.eup %504  ;;  %v370_v16 = vmul.f32 %v503_v13, %v586_v34 }
  0x37   : > { %v507_v17 = vpop.eup %506  ;;  %378 = vst.msk [vmem:[%s252_s11] sm:$0xff] %vm377_vm0, %v369_v14  ;;  %v371_v18 = vmul.f32 %v505_v15, %v588_v37 }
  0x38   : > { %v509_v19 = vpop.eup %508  ;;  %379 = vst.msk [vmem:[%s252_s11 + $0x8] sm:$0xff] %vm377_vm0, %v370_v16  ;;  %v372_v20 = vmul.f32 %v507_v17, %v590_v38 }
  0x39   : > { %v511_v21 = vpop.eup %510  ;;  %380 = vst.msk [vmem:[%s252_s11 + $0x10] sm:$0xff] %vm377_vm0, %v371_v18  ;;  %v373_v22 = vmul.f32 %v509_v19, %v592_v39 }
  0x3a   : > { %v513_v23 = vpop.eup %512  ;;  %381 = vst.msk [vmem:[%s252_s11 + $0x18] sm:$0xff] %vm377_vm0, %v372_v20  ;;  %v374_v24 = vmul.f32 %v511_v21, %v596_v43 }
  0x3b   : > { %v515_v25 = vpop.eup %514  ;;  %382 = vst.msk [vmem:[%s252_s11 + $0x20] sm:$0xff] %vm377_vm0, %v373_v22  ;;  %v375_v26 = vmul.f32 %v513_v23, %v598_v44 }
  0x3c   : > { %383 = vst.msk [vmem:[%s252_s11 + $0x28] sm:$0xff] %vm377_vm0, %v374_v24  ;;  %v376_v27 = vmul.f32 %v515_v25, %v603_v48 }
  0x3d   : > { %384 = vst.msk [vmem:[%s252_s11 + $0x30] sm:$0xff] %vm377_vm0, %v375_v26 }
  0x3e   : > { %385 = vst.msk [vmem:[%s252_s11 + $0x38] sm:$0xff] %vm377_vm0, %v376_v27 }
  0x3f PF: > { %s15_s18 = sadd.s32 1, %s522_s18  }
  0x40   : > { %p12_p4 = scmp.ge.s32.totalorder %s15_s18, 4  }
  0x42   :  { %14 = sbr.rel (!%p12_p4) target bundleno = 1 (0x1), region = 76 }

// kernel: _apply_model.37
= control target key start
LH: loop header
LB: loop body
LE: loop exit
PB: predicated region body
PF: predicated region fallthrough
CT: control target
= control target key end

     0   :  { %s625_s1 = inlined_call_operand.vmem [shape: f32[128,128], index: 1, kind: input, shape index: {}]   ;;  %s626_s0 = inlined_call_operand.vmem [shape: f32[128,128], index: 0, kind: input, shape index: {}]   ;;  %s627_s2 = inlined_call_operand.vmem [shape: f32[1,128], index: 2, kind: input, shape index: {}]   ;;  %s628_s3 = inlined_call_operand.vmem [shape: f32[128,128], index: 3, kind: output, shape index: {}]  }
   0x1   :  { %v66_v0 = vld [vmem:[%s625_s1] sm:$0xff]  ;;  %v67_v1 = vld [vmem:[%s625_s1 + $0x8] sm:$0xff]  ;;  %v68_v2 = vld [vmem:[%s625_s1 + $0x10] sm:$0xff] }
   0x2   :  { %v410_v3 = vpack.c.bf16 %v67_v1, %v66_v0  ;;  %v69_v4 = vld [vmem:[%s625_s1 + $0x18] sm:$0xff]  ;;  %v70_v6 = vld [vmem:[%s625_s1 + $0x20] sm:$0xff]  ;;  %v71_v7 = vld [vmem:[%s625_s1 + $0x28] sm:$0xff] }
   0x3   :  { %v414_v5 = vpack.c.bf16 %v69_v4, %v68_v2  ;;  %v418_v8 = vpack.c.bf16 %v71_v7, %v70_v6  ;;  %v50_v9 = vld [vmem:[%s626_s0] sm:$0xff]  ;;  %v72_v11 = vld [vmem:[%s625_s1 + $0x30] sm:$0xff]  ;;  %v73_v12 = vld [vmem:[%s625_s1 + $0x38] sm:$0xff] }
   0x4   :  { %411 = vmatprep.subr.bf16.mxu0 %v410_v3  ;;  %442 = vmatprep.subr.bf16.mxu1 %v410_v3  ;;  %v58_v10 = vld [vmem:[%s626_s0 + $0x40] sm:$0xff]  ;;  %v422_v13 = vpack.c.bf16 %v73_v12, %v72_v11  ;;  %v75_v15 = vld [vmem:[%s625_s1 + $0x48] sm:$0xff]  ;;  %v76_v17 = vld [vmem:[%s625_s1 + $0x50] sm:$0xff] }
   0x5   :  { %413 = vmatpush3.bf16.msra.mxu0 %v410_v3  ;;  %450 = vmatpush3.bf16.msra.mxu1 %v410_v3  ;;  %v74_v14 = vld [vmem:[%s625_s1 + $0x40] sm:$0xff]  ;;  %v77_v18 = vld [vmem:[%s625_s1 + $0x58] sm:$0xff]  ;;  %v79_v21 = vld [vmem:[%s625_s1 + $0x68] sm:$0xff] }
   0x6   :  { %415 = vmatprep.subr.bf16.mxu0 %v414_v5  ;;  %443 = vmatprep.subr.bf16.mxu1 %v414_v5  ;;  %v426_v16 = vpack.c.bf16 %v75_v15, %v74_v14  ;;  %v430_v19 = vpack.c.bf16 %v77_v18, %v76_v17  ;;  %v78_v20 = vld [vmem:[%s625_s1 + $0x60] sm:$0xff]  ;;  %v80_v23 = vld [vmem:[%s625_s1 + $0x70] sm:$0xff]  ;;  %v81_v24 = vld [vmem:[%s625_s1 + $0x78] sm:$0xff] }
   0x7   :  { %386 = vmatprep.mubr.f32.mxu0 %v50_v9  ;;  %398 = vmatprep.mubr.f32.mxu1 %v58_v10  ;;  %v434_v22 = vpack.c.bf16 %v79_v21, %v78_v20  ;;  %v438_v25 = vpack.c.bf16 %v81_v24, %v80_v23  ;;  %v51_v26 = vld [vmem:[%s626_s0 + $0x8] sm:$0xff]  ;;  %v52_v28 = vld [vmem:[%s626_s0 + $0x10] sm:$0xff]  ;;  %v53_v30 = vld [vmem:[%s626_s0 + $0x18] sm:$0xff] }
   0x8   :  { %v59_v27 = vld [vmem:[%s626_s0 + $0x48] sm:$0xff]  ;;  %v60_v29 = vld [vmem:[%s626_s0 + $0x50] sm:$0xff]  ;;  %v61_v31 = vld [vmem:[%s626_s0 + $0x58] sm:$0xff] }
   0x9   :  { %417 = vmatpush3.bf16.msra.mxu0 %v414_v5  ;;  %451 = vmatpush3.bf16.msra.mxu1 %v414_v5  ;;  %v54_v32 = vld [vmem:[%s626_s0 + $0x20] sm:$0xff]  ;;  %v55_v34 = vld [vmem:[%s626_s0 + $0x28] sm:$0xff]  ;;  %v56_v36 = vld [vmem:[%s626_s0 + $0x30] sm:$0xff] }
   0xa   :  { %419 = vmatprep.subr.bf16.mxu0 %v418_v8  ;;  %444 = vmatprep.subr.bf16.mxu1 %v418_v8  ;;  %v62_v33 = vld [vmem:[%s626_s0 + $0x60] sm:$0xff]  ;;  %v63_v35 = vld [vmem:[%s626_s0 + $0x68] sm:$0xff]  ;;  %v64_v37 = vld [vmem:[%s626_s0 + $0x70] sm:$0xff] }
   0xb   :  { %v57_v38 = vld [vmem:[%s626_s0 + $0x38] sm:$0xff]  ;;  %v321_v40 = vld [vmem:[%s627_s2] ss:$0 sm:$0xff] }
   0xc   :  { %v65_v39 = vld [vmem:[%s626_s0 + $0x78] sm:$0xff] }
   0xd   :  { %421 = vmatpush3.bf16.msra.mxu0 %v418_v8  ;;  %452 = vmatpush3.bf16.msra.mxu1 %v418_v8 }
   0xe   :  { %423 = vmatprep.subr.bf16.mxu0 %v422_v13  ;;  %445 = vmatprep.subr.bf16.mxu1 %v422_v13 }
  0x11   :  { %425 = vmatpush3.bf16.msra.mxu0 %v422_v13  ;;  %453 = vmatpush3.bf16.msra.mxu1 %v422_v13 }
  0x12   :  { %427 = vmatprep.subr.bf16.mxu0 %v426_v16  ;;  %446 = vmatprep.subr.bf16.mxu1 %v426_v16 }
  0x15   :  { %429 = vmatpush3.bf16.msra.mxu0 %v426_v16  ;;  %454 = vmatpush3.bf16.msra.mxu1 %v426_v16 }
  0x16   :  { %431 = vmatprep.subr.bf16.mxu0 %v430_v19  ;;  %447 = vmatprep.subr.bf16.mxu1 %v430_v19 }
  0x19   :  { %433 = vmatpush3.bf16.msra.mxu0 %v430_v19  ;;  %455 = vmatpush3.bf16.msra.mxu1 %v430_v19 }
  0x1a   :  { %435 = vmatprep.subr.bf16.mxu0 %v434_v22  ;;  %448 = vmatprep.subr.bf16.mxu1 %v434_v22 }
  0x1d   :  { %437 = vmatpush3.bf16.msra.mxu0 %v434_v22  ;;  %456 = vmatpush3.bf16.msra.mxu1 %v434_v22 }
  0x1e   :  { %439 = vmatprep.subr.bf16.mxu0 %v438_v25  ;;  %449 = vmatprep.subr.bf16.mxu1 %v438_v25 }
  0x21   :  { %441 = vmatpush3.bf16.msra.mxu0 %v438_v25  ;;  %457 = vmatpush3.bf16.msra.mxu1 %v438_v25 }
  0x24   :  { %387 = vmatmul.mubr.f32.vlgmr.msra.gmra.mrb[0].mxu0 %v51_v26  ;;  %399 = vmatmul.mubr.f32.vlgmr.msra.gmra.mrb[0].mxu1 %v59_v27 }
  0x25   :  { %389 = vmatprep.mubr.f32.mxu0 %v52_v28  ;;  %401 = vmatprep.mubr.f32.mxu1 %v60_v29 }
  0x28   :  { %390 = vmatmul.mubr.f32.gmra.mrb[2].mxu0 %v53_v30  ;;  %402 = vmatmul.mubr.f32.gmra.mrb[2].mxu1 %v61_v31 }
  0x29   :  { %392 = vmatprep.mubr.f32.mxu0 %v54_v32  ;;  %404 = vmatprep.mubr.f32.mxu1 %v62_v33 }
  0x2c   :  { %393 = vmatmul.mubr.f32.gmra.mrb[4].mxu0 %v55_v34  ;;  %405 = vmatmul.mubr.f32.gmra.mrb[4].mxu1 %v63_v35 }
  0x2d   :  { %395 = vmatprep.mubr.f32.mxu0 %v56_v36  ;;  %407 = vmatprep.mubr.f32.mxu1 %v64_v37 }
  0x30   :  { %396 = vmatmul.mubr.f32.gmra.mrb[6].mxu0 %v57_v38  ;;  %408 = vmatmul.mubr.f32.gmra.mrb[6].mxu1 %v65_v39 }
  0xf7   :  { %v388_v41 = vpop.f32.mrb[0].mxu0  ;;  %v400_v42 = vpop.f32.mrb[0].mxu1 }
  0xf8   :  { %v286_v43 = vadd.f32 %v388_v41, %v321_v40  ;;  %v294_v44 = vadd.f32 %v400_v42, %v321_v40  ;;  %v148_v45 = vpop.f32.mrb[1].mxu0  ;;  %v188_v46 = vpop.f32.mrb[1].mxu1 }
  0xf9   :  { %v285_v47 = vadd.f32 %v321_v40, %v148_v45  ;;  %v293_v48 = vadd.f32 %v321_v40, %v188_v46 }
  0xfa   :  { %302 = vst [vmem:[%s628_s3 + $0x8] sm:$0xff] %v286_v43  ;;  %310 = vst [vmem:[%s628_s3 + $0x48] sm:$0xff] %v294_v44 }
  0xfb   :  { %301 = vst [vmem:[%s628_s3] sm:$0xff] %v285_v47  ;;  %309 = vst [vmem:[%s628_s3 + $0x40] sm:$0xff] %v293_v48  ;;  %v391_v49 = vpop.f32.mrb[2].mxu0  ;;  %v403_v50 = vpop.f32.mrb[2].mxu1 }
  0xfc   :  { %v288_v51 = vadd.f32 %v391_v49, %v321_v40  ;;  %v296_v52 = vadd.f32 %v403_v50, %v321_v40  ;;  %v158_v53 = vpop.f32.mrb[3].mxu0  ;;  %v198_v54 = vpop.f32.mrb[3].mxu1 }
  0xfd   :  { %v287_v55 = vadd.f32 %v321_v40, %v158_v53  ;;  %v295_v56 = vadd.f32 %v321_v40, %v198_v54 }
  0xfe   :  { %304 = vst [vmem:[%s628_s3 + $0x18] sm:$0xff] %v288_v51  ;;  %312 = vst [vmem:[%s628_s3 + $0x58] sm:$0xff] %v296_v52 }
  0xff   :  { %303 = vst [vmem:[%s628_s3 + $0x10] sm:$0xff] %v287_v55  ;;  %311 = vst [vmem:[%s628_s3 + $0x50] sm:$0xff] %v295_v56  ;;  %v394_v57 = vpop.f32.mrb[4].mxu0  ;;  %v406_v58 = vpop.f32.mrb[4].mxu1 }
 0x100   :  { %v290_v59 = vadd.f32 %v394_v57, %v321_v40  ;;  %v298_v60 = vadd.f32 %v406_v58, %v321_v40  ;;  %v168_v61 = vpop.f32.mrb[5].mxu0  ;;  %v208_v62 = vpop.f32.mrb[5].mxu1 }
 0x101   :  { %v289_v63 = vadd.f32 %v321_v40, %v168_v61  ;;  %v297_v0 = vadd.f32 %v321_v40, %v208_v62 }
 0x102   :  { %306 = vst [vmem:[%s628_s3 + $0x28] sm:$0xff] %v290_v59  ;;  %314 = vst [vmem:[%s628_s3 + $0x68] sm:$0xff] %v298_v60 }
 0x103   :  { %305 = vst [vmem:[%s628_s3 + $0x20] sm:$0xff] %v289_v63  ;;  %313 = vst [vmem:[%s628_s3 + $0x60] sm:$0xff] %v297_v0  ;;  %v397_v1 = vpop.f32.mrb[6].mxu0  ;;  %v409_v2 = vpop.f32.mrb[6].mxu1 }
 0x104   :  { %v292_v3 = vadd.f32 %v397_v1, %v321_v40  ;;  %v300_v4 = vadd.f32 %v409_v2, %v321_v40  ;;  %v178_v5 = vpop.f32.mrb[7].mxu0  ;;  %v218_v6 = vpop.f32.mrb[7].mxu1 }
 0x105   :  { %v291_v7 = vadd.f32 %v321_v40, %v178_v5  ;;  %v299_v8 = vadd.f32 %v321_v40, %v218_v6 }
 0x106   :  { %308 = vst [vmem:[%s628_s3 + $0x38] sm:$0xff] %v292_v3  ;;  %316 = vst [vmem:[%s628_s3 + $0x78] sm:$0xff] %v300_v4 }
 0x107   :  { %307 = vst [vmem:[%s628_s3 + $0x30] sm:$0xff] %v291_v7  ;;  %315 = vst [vmem:[%s628_s3 + $0x70] sm:$0xff] %v299_v8 }

// kernel: _apply_model.45
= control target key start
LH: loop header
LB: loop body
LE: loop exit
PB: predicated region body
PF: predicated region fallthrough
CT: control target
= control target key end

     0   :  { %s466_s18 = smov 0   ;;  %s512_s0 = inlined_call_operand.vmem [shape: f32[2,64,64], index: 0, kind: input, shape index: {}]   ;;  %s513_s1 = inlined_call_operand.vmem [shape: f32[2,1,64], index: 1, kind: input, shape index: {}]   ;;  %s514_s2 = inlined_call_operand.vmem [shape: f32[2,1,64], index: 2, kind: input, shape index: {}]   ;;  %s515_s3 = inlined_call_operand.vmem [shape: f32[1,64], index: 3, kind: input, shape index: {}]   ;;  %s516_s4 = inlined_call_operand.vmem [shape: f32[1,64], index: 4, kind: input, shape index: {}]   ;;  %s517_s5 = inlined_call_operand.vmem [shape: f32[2,64,64], index: 5, kind: output, shape index: {}]  }
   0x1 LB: > { %s403_s19 = sadd.s32 4294967295, %s434_s18   ;;  %p407_p0 = scmp.ge.s32.totalorder %s434_s18, 1  ;;  %s434_s18 = sphi %s466_s18, %s15_s18  }
   0x2   : > { %p203_p1 = scmp.lt.s32.totalorder %s434_s18, 3 }
   0x4   : > { %p204_p2 = pnand %p407_p0, %p203_p1 }
   0x5   : > { %p237_p3 = scmp.lt.s32.totalorder (!%p204_p2), %s403_s19, 1  ;;  %v414_v3 = vld [vmem:[%s515_s3] ss:$0 sm:$0xff] (!%p204_p2)  ;;  %vm321_vm0 = vcmask (!%p204_p2), 523264  }
   0x6   : > { %207 = sbr.rel (%p204_p2) target bundleno = 29 (0x1d), region = 40  ;;  %v415_v20 = vld [vmem:[%s516_s4] ss:$0 sm:$0xff] (!%p204_p2) }
   0xd   : > { %s519_s19 = smov (!%p237_p3, %s403_s19), 1 }
   0xe   : > { %s418_s20 = sshll.u32 %s519_s19, 6  ;;  %s244_s23 = scalar_lea.vmem %s513_s1, %s519_s19 }
   0xf   : > { %s241_s26 = scalar_lea.vmem %s512_s0, %s418_s20  ;;  %s247_s29 = scalar_lea.vmem %s514_s2, %s519_s19  ;;  %v412_v0 = vld [vmem:[%s244_s23] ss:$0 sm:$0xff] }
  0x10   : > { %v253_v1 = vld [vmem:[%s241_s26] sm:$0xff]  ;;  %v254_v4 = vld [vmem:[%s241_s26 + $0x8] sm:$0xff]  ;;  %v255_v7 = vld [vmem:[%s241_s26 + $0x10] sm:$0xff]  ;;  %s252_s11 = scalar_lea.vmem %s517_s5, %s418_s20 }
  0x11   : > { %v413_v2 = vld [vmem:[%s247_s29] ss:$0 sm:$0xff]  ;;  %v268_v5 = vsub.f32 %v253_v1, %v412_v0  ;;  %v269_v6 = vsub.f32 %v254_v4, %v412_v0  ;;  %v256_v8 = vld [vmem:[%s241_s26 + $0x18] sm:$0xff]  ;;  %v270_v10 = vsub.f32 %v255_v7, %v412_v0  ;;  %v258_v13 = vld [vmem:[%s241_s26 + $0x28] sm:$0xff] }
  0x12   : > { %v257_v9 = vld [vmem:[%s241_s26 + $0x20] sm:$0xff]  ;;  %v271_v11 = vsub.f32 %v256_v8, %v412_v0  ;;  %v259_v14 = vld [vmem:[%s241_s26 + $0x30] sm:$0xff]  ;;  %v260_v15 = vld [vmem:[%s241_s26 + $0x38] sm:$0xff]  ;;  %v273_v18 = vsub.f32 %v258_v13, %v412_v0 }
  0x13   : > { %v272_v12 = vsub.f32 %v257_v9, %v412_v0  ;;  %v283_v16 = vmul.f32 %v413_v2, %v268_v5  ;;  %v284_v17 = vmul.f32 %v413_v2, %v269_v6  ;;  %v274_v19 = vsub.f32 %v259_v14, %v412_v0 }
  0x14   : > { %v285_v21 = vmul.f32 %v413_v2, %v270_v10  ;;  %v286_v22 = vmul.f32 %v413_v2, %v271_v11  ;;  %v275_v24 = vsub.f32 %v260_v15, %v412_v0  ;;  %v288_v27 = vmul.f32 %v413_v2, %v273_v18 }
  0x15   : > { %v287_v23 = vmul.f32 %v413_v2, %v272_v12  ;;  %v298_v25 = vmul.f32 %v414_v3, %v283_v16  ;;  %v299_v26 = vmul.f32 %v414_v3, %v284_v17  ;;  %v289_v28 = vmul.f32 %v413_v2, %v274_v19 }
  0x16   : > { %v300_v29 = vmul.f32 %v414_v3, %v285_v21  ;;  %v301_v30 = vmul.f32 %v414_v3, %v286_v22  ;;  %v290_v32 = vmul.f32 %v413_v2, %v275_v24  ;;  %v303_v35 = vmul.f32 %v414_v3, %v288_v27 }
  0x17   : > { %v302_v31 = vmul.f32 %v414_v3, %v287_v23  ;;  %v313_v33 = vadd.f32 %v415_v20, %v298_v25  ;;  %v314_v34 = vadd.f32 %v415_v20, %v299_v26  ;;  %v304_v36 = vmul.f32 %v414_v3, %v289_v28 }
  0x18   : > { %v315_v37 = vadd.f32 %v415_v20, %v300_v29  ;;  %v316_v38 = vadd.f32 %v415_v20, %v301_v30  ;;  %v305_v40 = vmul.f32 %v414_v3, %v290_v32  ;;  %v318_v41 = vadd.f32 %v415_v20, %v303_v35 }
  0x19   : > { %v317_v39 = vadd.f32 %v415_v20, %v302_v31  ;;  %322 = vst.msk [vmem:[%s252_s11] sm:$0xff] %vm321_vm0, %v313_v33  ;;  %323 = vst.msk [vmem:[%s252_s11 + $0x8] sm:$0xff] %vm321_vm0, %v314_v34  ;;  %v319_v42 = vadd.f32 %v415_v20, %v304_v36 }
  0x1a   : > { %324 = vst.msk [vmem:[%s252_s11 + $0x10] sm:$0xff] %vm321_vm0, %v315_v37  ;;  %325 = vst.msk [vmem:[%s252_s11 + $0x18] sm:$0xff] %vm321_vm0, %v316_v38  ;;  %v320_v43 = vadd.f32 %v415_v20, %v305_v40 }
  0x1b   : > { %326 = vst.msk [vmem:[%s252_s11 + $0x20] sm:$0xff] %vm321_vm0, %v317_v39  ;;  %327 = vst.msk [vmem:[%s252_s11 + $0x28] sm:$0xff] %vm321_vm0, %v318_v41 }
  0x1c   : > { %328 = vst.msk [vmem:[%s252_s11 + $0x30] sm:$0xff] %vm321_vm0, %v319_v42  ;;  %329 = vst.msk [vmem:[%s252_s11 + $0x38] sm:$0xff] %vm321_vm0, %v320_v43 }
  0x1d PF: > { %s15_s18 = sadd.s32 1, %s434_s18  }
  0x1e   : > { %p12_p4 = scmp.ge.s32.totalorder %s15_s18, 4  }
  0x20   :  { %14 = sbr.rel (!%p12_p4) target bundleno = 1 (0x1), region = 76 }

// kernel: _apply_model.40
= control target key start
LH: loop header
LB: loop body
LE: loop exit
PB: predicated region body
PF: predicated region fallthrough
CT: control target
= control target key end

     0   :  { %s1400_s12 = smov 0   ;;  %s1402_s13 = smov 0   ;;  %s1782_s0 = inlined_call_operand.vmem [shape: f32[128,1024], index: 0, kind: input, shape index: {}]   ;;  %s1783_s1 = inlined_call_operand.vmem [shape: f32[1024,128], index: 1, kind: input, shape index: {}]   ;;  %s1784_s2 = inlined_call_operand.vmem [shape: f32[1,128], index: 2, kind: input, shape index: {}]   ;;  %s1785_s3 = inlined_call_operand.vmem [shape: f32[128,128], index: 3, kind: output, shape index: {}]  }
   0x1   :  { %s1404_s14 = smov 0   ;;  %s1406_s15 = smov 0  }
   0x2   :  { %s1408_s16 = smov 0  }
   0x3 LB: > { %s25_s17 = sadd.s32 1, %s1373_s15  ;;  %p48_p1 = scmp.ne.s32.totalorder %s1365_s13, %s1361_s12  ;;  %s1377_s16 = sphi %s1408_s16, %s13_s16   ;;  %s1373_s15 = sphi %s1406_s15, %s1789_s15   ;;  %s1369_s14 = sphi %s1404_s14, %s1788_s14   ;;  %s1365_s13 = sphi %s1402_s13, %s1787_s13   ;;  %s1361_s12 = sphi %s1400_s12, %s1786_s12  }
   0x4   : > { %p26_p0 = scmp.ge.s32.totalorder %s25_s17, 2  ;;  %p49_p2 = scmp.eq.s32.totalorder %s1377_s16, 0 }
   0x5   : > { %s41_s19 = sadd.s32 1, %s1365_s13  ;;  %p1058_p5 = scmp.ge.s32.totalorder %s1377_s16, 2 }
   0x6   : > { %s1791_s17 = smov (%p26_p0, %s25_s17), 0  ;;  %p50_p3 = por %p49_p2, %p48_p1 }
   0x7   : > { %s37_s18 = ssub.s32 %s1373_s15, %s1791_s17  ;;  %162 = sbr.rel (%p1058_p5) target bundleno = 50 (0x32), region = 20 }
   0x8   : > { %p39_p4 = scmp.eq.s32.totalorder %s37_s18, 0 }
   0xa   : > { %s1435_s20 = scalar_select %p39_p4, %s1365_s13, %s41_s19  }
   0xe   : > { %165 = sbr.rel (!%p50_p3) target bundleno = 50 (0x32), region = 24  ;;  %s167_s21 = sand.u32 (%p50_p3), 1, %s1365_s13  }
   0xf   : > { %s1073_s22 = sshll.u32 (%p50_p3), %s1373_s15, 5  ;;  %s1059_s23 = sshll.u32 (%p50_p3), %s167_s21, 9 }
  0x10   : > { %s1443_s26 = scalar_lea.vmem (%p50_p3), %s1782_s0, %s1073_s22  ;;  %s1448_s27 = scalar_lea.vmem (%p50_p3), [#allocation3], %s1059_s23 }
  0x11   : > { %v188_v0 = vld [vmem:[%s1443_s26] sm:$0xff] (%p50_p3)  ;;  %v190_v1 = vld [vmem:[%s1443_s26 + $0x8] sm:$0xff] (%p50_p3)  ;;  %v192_v2 = vld [vmem:[%s1443_s26 + $0x10] sm:$0xff] (%p50_p3) }
  0x12   : > { %189 = vst [vmem:[%s1448_s27] sm:$0xff] (%p50_p3), %v188_v0  ;;  %191 = vst [vmem:[%s1448_s27 + $0x8] sm:$0xff] (%p50_p3), %v190_v1  ;;  %v194_v3 = vld [vmem:[%s1443_s26 + $0x18] sm:$0xff] (%p50_p3)  ;;  %v196_v4 = vld [vmem:[%s1443_s26 + $0x40] sm:$0xff] (%p50_p3) }
  0x13   : > { %193 = vst [vmem:[%s1448_s27 + $0x10] sm:$0xff] (%p50_p3), %v192_v2  ;;  %v198_v5 = vld [vmem:[%s1443_s26 + $0x48] sm:$0xff] (%p50_p3)  ;;  %195 = vst [vmem:[%s1448_s27 + $0x18] sm:$0xff] (%p50_p3), %v194_v3  ;;  %v200_v6 = vld [vmem:[%s1443_s26 + $0x50] sm:$0xff] (%p50_p3) }
  0x14   : > { %197 = vst [vmem:[%s1448_s27 + $0x20] sm:$0xff] (%p50_p3), %v196_v4  ;;  %199 = vst [vmem:[%s1448_s27 + $0x28] sm:$0xff] (%p50_p3), %v198_v5  ;;  %v202_v7 = vld [vmem:[%s1443_s26 + $0x58] sm:$0xff] (%p50_p3)  ;;  %v204_v8 = vld [vmem:[%s1443_s26 + $0x80] sm:$0xff] (%p50_p3) }
  0x15   : > { %201 = vst [vmem:[%s1448_s27 + $0x30] sm:$0xff] %v200_v6  ;;  %203 = vst [vmem:[%s1448_s27 + $0x38] sm:$0xff] %v202_v7  ;;  %v206_v9 = vld [vmem:[%s1443_s26 + $0x88] sm:$0xff]  ;;  %v208_v10 = vld [vmem:[%s1443_s26 + $0x90] sm:$0xff] }
  0x16   : > { %205 = vst [vmem:[%s1448_s27 + $0x40] sm:$0xff] %v204_v8  ;;  %v210_v11 = vld [vmem:[%s1443_s26 + $0x98] sm:$0xff]  ;;  %207 = vst [vmem:[%s1448_s27 + $0x48] sm:$0xff] %v206_v9  ;;  %v212_v12 = vld [vmem:[%s1443_s26 + $0xc0] sm:$0xff] }
  0x17   : > { %209 = vst [vmem:[%s1448_s27 + $0x50] sm:$0xff] %v208_v10  ;;  %211 = vst [vmem:[%s1448_s27 + $0x58] sm:$0xff] %v210_v11  ;;  %v214_v13 = vld [vmem:[%s1443_s26 + $0xc8] sm:$0xff]  ;;  %v216_v14 = vld [vmem:[%s1443_s26 + $0xd0] sm:$0xff] }
  0x18   : > { %213 = vst [vmem:[%s1448_s27 + $0x60] sm:$0xff] %v212_v12  ;;  %215 = vst [vmem:[%s1448_s27 + $0x68] sm:$0xff] %v214_v13  ;;  %v218_v15 = vld [vmem:[%s1443_s26 + $0xd8] sm:$0xff]  ;;  %v220_v16 = vld [vmem:[%s1443_s26 + $0x100] sm:$0xff] }
  0x19   : > { %217 = vst [vmem:[%s1448_s27 + $0x70] sm:$0xff] %v216_v14  ;;  %v222_v17 = vld [vmem:[%s1443_s26 + $0x108] sm:$0xff]  ;;  %219 = vst [vmem:[%s1448_s27 + $0x78] sm:$0xff] %v218_v15  ;;  %v224_v18 = vld [vmem:[%s1443_s26 + $0x110] sm:$0xff] }
  0x1a   : > { %221 = vst [vmem:[%s1448_s27 + $0x80] sm:$0xff] %v220_v16  ;;  %223 = vst [vmem:[%s1448_s27 + $0x88] sm:$0xff] %v222_v17  ;;  %v226_v19 = vld [vmem:[%s1443_s26 + $0x118] sm:$0xff]  ;;  %v228_v20 = vld [vmem:[%s1443_s26 + $0x140] sm:$0xff] }
  0x1b   : > { %225 = vst [vmem:[%s1448_s27 + $0x90] sm:$0xff] %v224_v18  ;;  %227 = vst [vmem:[%s1448_s27 + $0x98] sm:$0xff] %v226_v19  ;;  %v230_v21 = vld [vmem:[%s1443_s26 + $0x148] sm:$0xff]  ;;  %v232_v22 = vld [vmem:[%s1443_s26 + $0x150] sm:$0xff] }
  0x1c   : > { %229 = vst [vmem:[%s1448_s27 + $0xa0] sm:$0xff] %v228_v20  ;;  %v234_v23 = vld [vmem:[%s1443_s26 + $0x158] sm:$0xff]  ;;  %231 = vst [vmem:[%s1448_s27 + $0xa8] sm:$0xff] %v230_v21  ;;  %v236_v24 = vld [vmem:[%s1443_s26 + $0x180] sm:$0xff] }
  0x1d   : > { %233 = vst [vmem:[%s1448_s27 + $0xb0] sm:$0xff] %v232_v22  ;;  %235 = vst [vmem:[%s1448_s27 + $0xb8] sm:$0xff] %v234_v23  ;;  %v238_v25 = vld [vmem:[%s1443_s26 + $0x188] sm:$0xff]  ;;  %v240_v26 = vld [vmem:[%s1443_s26 + $0x190] sm:$0xff] }
  0x1e   : > { %237 = vst [vmem:[%s1448_s27 + $0xc0] sm:$0xff] %v236_v24  ;;  %239 = vst [vmem:[%s1448_s27 + $0xc8] sm:$0xff] %v238_v25  ;;  %v242_v27 = vld [vmem:[%s1443_s26 + $0x198] sm:$0xff]  ;;  %v244_v28 = vld [vmem:[%s1443_s26 + $0x1c0] sm:$0xff] }
  0x1f   : > { %241 = vst [vmem:[%s1448_s27 + $0xd0] sm:$0xff] %v240_v26  ;;  %v246_v29 = vld [vmem:[%s1443_s26 + $0x1c8] sm:$0xff]  ;;  %243 = vst [vmem:[%s1448_s27 + $0xd8] sm:$0xff] %v242_v27  ;;  %v248_v30 = vld [vmem:[%s1443_s26 + $0x1d0] sm:$0xff] }
  0x20   : > { %245 = vst [vmem:[%s1448_s27 + $0xe0] sm:$0xff] %v244_v28  ;;  %247 = vst [vmem:[%s1448_s27 + $0xe8] sm:$0xff] %v246_v29  ;;  %v250_v31 = vld [vmem:[%s1443_s26 + $0x1d8] sm:$0xff]  ;;  %v252_v32 = vld [vmem:[%s1443_s26 + $0x200] sm:$0xff] }
  0x21   : > { %249 = vst [vmem:[%s1448_s27 + $0xf0] sm:$0xff] %v248_v30  ;;  %251 = vst [vmem:[%s1448_s27 + $0xf8] sm:$0xff] %v250_v31  ;;  %v254_v33 = vld [vmem:[%s1443_s26 + $0x208] sm:$0xff]  ;;  %v256_v34 = vld [vmem:[%s1443_s26 + $0x210] sm:$0xff] }
  0x22   : > { %253 = vst [vmem:[%s1448_s27 + $0x100] sm:$0xff] %v252_v32  ;;  %v258_v35 = vld [vmem:[%s1443_s26 + $0x218] sm:$0xff]  ;;  %255 = vst [vmem:[%s1448_s27 + $0x108] sm:$0xff] %v254_v33  ;;  %v260_v36 = vld [vmem:[%s1443_s26 + $0x240] sm:$0xff] }
  0x23   : > { %257 = vst [vmem:[%s1448_s27 + $0x110] sm:$0xff] %v256_v34  ;;  %259 = vst [vmem:[%s1448_s27 + $0x118] sm:$0xff] %v258_v35  ;;  %v262_v37 = vld [vmem:[%s1443_s26 + $0x248] sm:$0xff]  ;;  %v264_v38 = vld [vmem:[%s1443_s26 + $0x250] sm:$0xff] }
  0x24   : > { %261 = vst [vmem:[%s1448_s27 + $0x120] sm:$0xff] %v260_v36  ;;  %263 = vst [vmem:[%s1448_s27 + $0x128] sm:$0xff] %v262_v37  ;;  %v266_v39 = vld [vmem:[%s1443_s26 + $0x258] sm:$0xff]  ;;  %v268_v40 = vld [vmem:[%s1443_s26 + $0x280] sm:$0xff] }
  0x25   : > { %265 = vst [vmem:[%s1448_s27 + $0x130] sm:$0xff] %v264_v38  ;;  %v270_v41 = vld [vmem:[%s1443_s26 + $0x288] sm:$0xff]  ;;  %267 = vst [vmem:[%s1448_s27 + $0x138] sm:$0xff] %v266_v39  ;;  %v272_v42 = vld [vmem:[%s1443_s26 + $0x290] sm:$0xff] }
  0x26   : > { %269 = vst [vmem:[%s1448_s27 + $0x140] sm:$0xff] %v268_v40  ;;  %271 = vst [vmem:[%s1448_s27 + $0x148] sm:$0xff] %v270_v41  ;;  %v274_v43 = vld [vmem:[%s1443_s26 + $0x298] sm:$0xff]  ;;  %v276_v44 = vld [vmem:[%s1443_s26 + $0x2c0] sm:$0xff] }
  0x27   : > { %273 = vst [vmem:[%s1448_s27 + $0x150] sm:$0xff] %v272_v42  ;;  %275 = vst [vmem:[%s1448_s27 + $0x158] sm:$0xff] %v274_v43  ;;  %v278_v45 = vld [vmem:[%s1443_s26 + $0x2c8] sm:$0xff]  ;;  %v280_v46 = vld [vmem:[%s1443_s26 + $0x2d0] sm:$0xff] }
  0x28   : > { %277 = vst [vmem:[%s1448_s27 + $0x160] sm:$0xff] %v276_v44  ;;  %v282_v47 = vld [vmem:[%s1443_s26 + $0x2d8] sm:$0xff]  ;;  %279 = vst [vmem:[%s1448_s27 + $0x168] sm:$0xff] %v278_v45  ;;  %v284_v48 = vld [vmem:[%s1443_s26 + $0x300] sm:$0xff] }
  0x29   : > { %281 = vst [vmem:[%s1448_s27 + $0x170] sm:$0xff] %v280_v46  ;;  %283 = vst [vmem:[%s1448_s27 + $0x178] sm:$0xff] %v282_v47  ;;  %v286_v49 = vld [vmem:[%s1443_s26 + $0x308] sm:$0xff]  ;;  %v288_v50 = vld [vmem:[%s1443_s26 + $0x310] sm:$0xff] }
  0x2a   : > { %285 = vst [vmem:[%s1448_s27 + $0x180] sm:$0xff] %v284_v48  ;;  %287 = vst [vmem:[%s1448_s27 + $0x188] sm:$0xff] %v286_v49  ;;  %v290_v51 = vld [vmem:[%s1443_s26 + $0x318] sm:$0xff]  ;;  %v292_v52 = vld [vmem:[%s1443_s26 + $0x340] sm:$0xff] }
  0x2b   : > { %289 = vst [vmem:[%s1448_s27 + $0x190] sm:$0xff] %v288_v50  ;;  %v294_v53 = vld [vmem:[%s1443_s26 + $0x348] sm:$0xff]  ;;  %291 = vst [vmem:[%s1448_s27 + $0x198] sm:$0xff] %v290_v51  ;;  %v296_v54 = vld [vmem:[%s1443_s26 + $0x350] sm:$0xff] }
  0x2c   : > { %293 = vst [vmem:[%s1448_s27 + $0x1a0] sm:$0xff] %v292_v52  ;;  %295 = vst [vmem:[%s1448_s27 + $0x1a8] sm:$0xff] %v294_v53  ;;  %v298_v55 = vld [vmem:[%s1443_s26 + $0x358] sm:$0xff]  ;;  %v300_v56 = vld [vmem:[%s1443_s26 + $0x380] sm:$0xff] }
  0x2d   : > { %297 = vst [vmem:[%s1448_s27 + $0x1b0] sm:$0xff] %v296_v54  ;;  %299 = vst [vmem:[%s1448_s27 + $0x1b8] sm:$0xff] %v298_v55  ;;  %v302_v57 = vld [vmem:[%s1443_s26 + $0x388] sm:$0xff]  ;;  %v304_v58 = vld [vmem:[%s1443_s26 + $0x390] sm:$0xff] }
  0x2e   : > { %301 = vst [vmem:[%s1448_s27 + $0x1c0] sm:$0xff] %v300_v56  ;;  %v306_v59 = vld [vmem:[%s1443_s26 + $0x398] sm:$0xff]  ;;  %303 = vst [vmem:[%s1448_s27 + $0x1c8] sm:$0xff] %v302_v57  ;;  %v308_v60 = vld [vmem:[%s1443_s26 + $0x3c0] sm:$0xff] }
  0x2f   : > { %305 = vst [vmem:[%s1448_s27 + $0x1d0] sm:$0xff] %v304_v58  ;;  %307 = vst [vmem:[%s1448_s27 + $0x1d8] sm:$0xff] %v306_v59  ;;  %v310_v61 = vld [vmem:[%s1443_s26 + $0x3c8] sm:$0xff]  ;;  %v312_v62 = vld [vmem:[%s1443_s26 + $0x3d0] sm:$0xff] }
  0x30   : > { %309 = vst [vmem:[%s1448_s27 + $0x1e0] sm:$0xff] %v308_v60  ;;  %311 = vst [vmem:[%s1448_s27 + $0x1e8] sm:$0xff] %v310_v61  ;;  %v314_v63 = vld [vmem:[%s1443_s26 + $0x3d8] sm:$0xff] }
  0x31   : > { %313 = vst [vmem:[%s1448_s27 + $0x1f0] sm:$0xff] %v312_v62  ;;  %315 = vst [vmem:[%s1448_s27 + $0x1f8] sm:$0xff] %v314_v63 }
  0x32 PF: > { %p1062_p6 = scmp.ge.s32.totalorder %s1377_s16, 1  ;;  %p332_p7 = scmp.lt.s32.totalorder %s1377_s16, 3 }
  0x34   : > { %p333_p8 = pnand %p1062_p6, %p332_p7 }
  0x35   : > { %s339_s28 = sand.u32 (!%p333_p8), 1, %s1361_s12   ;;  %s1064_s29 = sshll.u32 (!%p333_p8), %s1369_s14, 6 }
  0x36   : > { %336 = sbr.rel (%p333_p8) target bundleno = 398 (0x18e), region = 51  ;;  %s1063_s30 = sshll.u32 (!%p333_p8), %s339_s28, 9 }
  0x37   : > { %p379_p9 = scmp.lt.s32.totalorder (!%p333_p8), %s1064_s29, 127  ;;  %s1584_s8 = scalar_lea.vmem (!%p333_p8), [#allocation3], %s1063_s30 }
  0x38   : > { %p1066_p10 = scmp.ne.s32.totalorder (!%p333_p8), %s1369_s14, 0 }
  0x3d   : > { %s1793_s29 = smov (!%p379_p9, %s1064_s29), 127  ;;  %402 = sbr.rel (%p1066_p10) target bundleno = 71 (0x47), region = 59 }
  0x3e   : > { %s1065_s4 = sshll.u32 %s1793_s29, 3  ;;  %v1379_v0 = vmov (!%p1066_p10), 0.0  }
  0x3f   : > { %s1582_s7 = scalar_lea.vmem %s1783_s1, %s1065_s4  ;;  %403 = vst [vmem:[#allocation2] sm:$0xff] (!%p1066_p10), %v1379_v0  ;;  %404 = vst [vmem:[#allocation2 + $0x8] sm:$0xff] (!%p1066_p10), %v1379_v0 }
  0x40   : > { %405 = vst [vmem:[#allocation2 + $0x10] sm:$0xff] (!%p1066_p10), %v1379_v0  ;;  %406 = vst [vmem:[#allocation2 + $0x18] sm:$0xff] (!%p1066_p10), %v1379_v0 }
  0x41   : > { %407 = vst [vmem:[#allocation2 + $0x20] sm:$0xff] (!%p1066_p10), %v1379_v0  ;;  %408 = vst [vmem:[#allocation2 + $0x28] sm:$0xff] (!%p1066_p10), %v1379_v0 }
  0x42   : > { %409 = vst [vmem:[#allocation2 + $0x30] sm:$0xff] (!%p1066_p10), %v1379_v0  ;;  %410 = vst [vmem:[#allocation2 + $0x38] sm:$0xff] (!%p1066_p10), %v1379_v0 }
  0x43   : > { %411 = vst [vmem:[#allocation2 + $0x40] sm:$0xff] (!%p1066_p10), %v1379_v0  ;;  %412 = vst [vmem:[#allocation2 + $0x48] sm:$0xff] (!%p1066_p10), %v1379_v0 }
  0x44   : > { %413 = vst [vmem:[#allocation2 + $0x50] sm:$0xff] %v1379_v0  ;;  %414 = vst [vmem:[#allocation2 + $0x58] sm:$0xff] %v1379_v0 }
  0x45   : > { %415 = vst [vmem:[#allocation2 + $0x60] sm:$0xff] %v1379_v0  ;;  %416 = vst [vmem:[#allocation2 + $0x68] sm:$0xff] %v1379_v0 }
  0x46   : > { %417 = vst [vmem:[#allocation2 + $0x70] sm:$0xff] %v1379_v0  ;;  %418 = vst [vmem:[#allocation2 + $0x78] sm:$0xff] %v1379_v0 }
  0x47 PF: > { %v515_v1 = vld [vmem:[%s1582_s7 + $0x80] sm:$0xff]  ;;  %v516_v2 = vld [vmem:[%s1582_s7 + $0x88] sm:$0xff]  ;;  %v517_v12 = vld [vmem:[%s1582_s7 + $0x90] sm:$0xff]  ;;  %p1067_p11 = scmp.ne.s32.totalorder %s1369_s14, 1 }
  0x48   : > { %v547_v3 = vld [vmem:[%s1582_s7 + $0x180] sm:$0xff]  ;;  %v1234_v4 = vpack.c.bf16 %v516_v2, %v515_v1  ;;  %v548_v5 = vld [vmem:[%s1582_s7 + $0x188] sm:$0xff]  ;;  %v518_v14 = vld [vmem:[%s1582_s7 + $0x98] sm:$0xff] }
  0x49   : > { %v499_v6 = vld [vmem:[%s1582_s7] sm:$0xff]  ;;  %v500_v7 = vld [vmem:[%s1582_s7 + $0x8] sm:$0xff]  ;;  %v1266_v8 = vpack.c.bf16 %v548_v5, %v547_v3  ;;  %v549_v15 = vld [vmem:[%s1582_s7 + $0x190] sm:$0xff]  ;;  %v1238_v17 = vpack.c.bf16 %v518_v14, %v517_v12 }
  0x4a   : > { %v1236_v9 = vpack.c.bf16 %v500_v7, %v499_v6  ;;  %v531_v10 = vld [vmem:[%s1582_s7 + $0x100] sm:$0xff]  ;;  %v532_v11 = vld [vmem:[%s1582_s7 + $0x108] sm:$0xff]  ;;  %1235 = vmatprep.subr.bf16.mxu0 %v1234_v4  ;;  %v550_v16 = vld [vmem:[%s1582_s7 + $0x198] sm:$0xff] }
  0x4b   : > { %v1268_v13 = vpack.c.bf16 %v532_v11, %v531_v10  ;;  %1267 = vmatprep.subr.bf16.mxu1 %v1266_v8  ;;  %v1270_v18 = vpack.c.bf16 %v550_v16, %v549_v15  ;;  %v501_v19 = vld [vmem:[%s1582_s7 + $0x10] sm:$0xff]  ;;  %v502_v20 = vld [vmem:[%s1582_s7 + $0x18] sm:$0xff]  ;;  %v519_v24 = vld [vmem:[%s1582_s7 + $0xa0] sm:$0xff] }
  0x4c   : > { %1237 = vmatpush3.bf16.msra.mxu0 %v1236_v9  ;;  %v533_v21 = vld [vmem:[%s1582_s7 + $0x110] sm:$0xff]  ;;  %v1240_v22 = vpack.c.bf16 %v502_v20, %v501_v19  ;;  %v534_v23 = vld [vmem:[%s1582_s7 + $0x118] sm:$0xff]  ;;  %v520_v25 = vld [vmem:[%s1582_s7 + $0xa8] sm:$0xff] }
  0x4d   : > { %1269 = vmatpush3.bf16.msra.mxu1 %v1268_v13  ;;  %1239 = vmatprep.subr.bf16.mxu0 %v1238_v17  ;;  %v1272_v26 = vpack.c.bf16 %v534_v23, %v533_v21  ;;  %v1242_v27 = vpack.c.bf16 %v520_v25, %v519_v24  ;;  %v551_v28 = vld [vmem:[%s1582_s7 + $0x1a0] sm:$0xff]  ;;  %v552_v29 = vld [vmem:[%s1582_s7 + $0x1a8] sm:$0xff]  ;;  %v521_v36 = vld [vmem:[%s1582_s7 + $0xb0] sm:$0xff] }
  0x4e   : > { %1271 = vmatprep.subr.bf16.mxu1 %v1270_v18  ;;  %v503_v30 = vld [vmem:[%s1582_s7 + $0x20] sm:$0xff]  ;;  %v1274_v31 = vpack.c.bf16 %v552_v29, %v551_v28  ;;  %v504_v32 = vld [vmem:[%s1582_s7 + $0x28] sm:$0xff]  ;;  %v522_v37 = vld [vmem:[%s1582_s7 + $0xb8] sm:$0xff] }
  0x4f   : > { %v535_v33 = vld [vmem:[%s1582_s7 + $0x120] sm:$0xff]  ;;  %v536_v34 = vld [vmem:[%s1582_s7 + $0x128] sm:$0xff]  ;;  %v1244_v35 = vpack.c.bf16 %v504_v32, %v503_v30  ;;  %v553_v38 = vld [vmem:[%s1582_s7 + $0x1b0] sm:$0xff]  ;;  %v1246_v40 = vpack.c.bf16 %v522_v37, %v521_v36 }
  0x50   : > { %1241 = vmatpush3.bf16.msra.mxu0 %v1240_v22  ;;  %v1276_v39 = vpack.c.bf16 %v536_v34, %v535_v33  ;;  %v554_v41 = vld [vmem:[%s1582_s7 + $0x1b8] sm:$0xff]  ;;  %v505_v42 = vld [vmem:[%s1582_s7 + $0x30] sm:$0xff]  ;;  %v523_v47 = vld [vmem:[%s1582_s7 + $0xc0] sm:$0xff] }
  0x51   : > { %1273 = vmatpush3.bf16.msra.mxu1 %v1272_v26  ;;  %1243 = vmatprep.subr.bf16.mxu0 %v1242_v27  ;;  %v506_v43 = vld [vmem:[%s1582_s7 + $0x38] sm:$0xff]  ;;  %v1278_v44 = vpack.c.bf16 %v554_v41, %v553_v38  ;;  %v537_v45 = vld [vmem:[%s1582_s7 + $0x130] sm:$0xff]  ;;  %v524_v48 = vld [vmem:[%s1582_s7 + $0xc8] sm:$0xff] }
  0x52   : > { %1275 = vmatprep.subr.bf16.mxu1 %v1274_v31  ;;  %v538_v46 = vld [vmem:[%s1582_s7 + $0x138] sm:$0xff]  ;;  %v555_v49 = vld [vmem:[%s1582_s7 + $0x1c0] sm:$0xff]  ;;  %v556_v50 = vld [vmem:[%s1582_s7 + $0x1c8] sm:$0xff]  ;;  %v1248_v51 = vpack.c.bf16 %v506_v43, %v505_v42  ;;  %v1250_v53 = vpack.c.bf16 %v524_v48, %v523_v47 }
  0x53   : > { %v1280_v52 = vpack.c.bf16 %v538_v46, %v537_v45  ;;  %v507_v54 = vld [vmem:[%s1582_s7 + $0x40] sm:$0xff]  ;;  %v508_v55 = vld [vmem:[%s1582_s7 + $0x48] sm:$0xff]  ;;  %v1282_v57 = vpack.c.bf16 %v556_v50, %v555_v49  ;;  %v525_v59 = vld [vmem:[%s1582_s7 + $0xd0] sm:$0xff] }
  0x54   : > { %1245 = vmatpush3.bf16.msra.mxu0 %v1244_v35  ;;  %v539_v56 = vld [vmem:[%s1582_s7 + $0x140] sm:$0xff]  ;;  %v540_v58 = vld [vmem:[%s1582_s7 + $0x148] sm:$0xff]  ;;  %v526_v60 = vld [vmem:[%s1582_s7 + $0xd8] sm:$0xff]  ;;  %v1252_v63 = vpack.c.bf16 %v508_v55, %v507_v54 }
  0x55   : > { %1277 = vmatpush3.bf16.msra.mxu1 %v1276_v39  ;;  %1247 = vmatprep.subr.bf16.mxu0 %v1246_v40  ;;  %v557_v61 = vld [vmem:[%s1582_s7 + $0x1d0] sm:$0xff]  ;;  %v558_v62 = vld [vmem:[%s1582_s7 + $0x1d8] sm:$0xff]  ;;  %v1284_v0 = vpack.c.bf16 %v540_v58, %v539_v56  ;;  %v1254_v1 = vpack.c.bf16 %v526_v60, %v525_v59  ;;  %v527_v7 = vld [vmem:[%s1582_s7 + $0xe0] sm:$0xff] }
  0x56   : > { %1279 = vmatprep.subr.bf16.mxu1 %v1278_v44  ;;  %v509_v2 = vld [vmem:[%s1582_s7 + $0x50] sm:$0xff]  ;;  %v510_v3 = vld [vmem:[%s1582_s7 + $0x58] sm:$0xff]  ;;  %v1286_v5 = vpack.c.bf16 %v558_v62, %v557_v61  ;;  %v528_v8 = vld [vmem:[%s1582_s7 + $0xe8] sm:$0xff] }
  0x57   : > { %v541_v4 = vld [vmem:[%s1582_s7 + $0x150] sm:$0xff]  ;;  %v542_v6 = vld [vmem:[%s1582_s7 + $0x158] sm:$0xff]  ;;  %v559_v9 = vld [vmem:[%s1582_s7 + $0x1e0] sm:$0xff]  ;;  %v1256_v11 = vpack.c.bf16 %v510_v3, %v509_v2  ;;  %v1258_v15 = vpack.c.bf16 %v528_v8, %v527_v7 }
  0x58   : > { %1249 = vmatpush3.bf16.msra.mxu0 %v1248_v51  ;;  %v560_v10 = vld [vmem:[%s1582_s7 + $0x1e8] sm:$0xff]  ;;  %v511_v12 = vld [vmem:[%s1582_s7 + $0x60] sm:$0xff]  ;;  %v1288_v14 = vpack.c.bf16 %v542_v6, %v541_v4  ;;  %v438_v18 = vld [vmem:[%s1584_s8 + $0x18] sm:$0xff] }
  0x59   : > { %1281 = vmatpush3.bf16.msra.mxu1 %v1280_v52  ;;  %1251 = vmatprep.subr.bf16.mxu0 %v1250_v53  ;;  %v512_v13 = vld [vmem:[%s1582_s7 + $0x68] sm:$0xff]  ;;  %v543_v16 = vld [vmem:[%s1582_s7 + $0x160] sm:$0xff]  ;;  %v1290_v19 = vpack.c.bf16 %v560_v10, %v559_v9  ;;  %v529_v21 = vld [vmem:[%s1582_s7 + $0xf0] sm:$0xff] }
  0x5a   : > { %1283 = vmatprep.subr.bf16.mxu1 %v1282_v57  ;;  %v436_v17 = vld [vmem:[%s1584_s8 + $0x8] sm:$0xff]  ;;  %v530_v22 = vld [vmem:[%s1582_s7 + $0xf8] sm:$0xff]  ;;  %v561_v23 = vld [vmem:[%s1582_s7 + $0x1f0] sm:$0xff]  ;;  %772 = vmatprep.mubr.f32.mxu1 %v438_v18  ;;  %v1260_v25 = vpack.c.bf16 %v512_v13, %v511_v12 }
  0x5b   : > { %v544_v20 = vld [vmem:[%s1582_s7 + $0x168] sm:$0xff]  ;;  %627 = vmatprep.mubr.f32.mxu0 %v436_v17  ;;  %v562_v24 = vld [vmem:[%s1582_s7 + $0x1f8] sm:$0xff]  ;;  %v1262_v27 = vpack.c.bf16 %v530_v22, %v529_v21  ;;  %v513_v28 = vld [vmem:[%s1582_s7 + $0x70] sm:$0xff] }
  0x5c   : > { %1253 = vmatpush3.bf16.msra.mxu0 %v1252_v63  ;;  %v1292_v26 = vpack.c.bf16 %v544_v20, %v543_v16  ;;  %v514_v29 = vld [vmem:[%s1582_s7 + $0x78] sm:$0xff]  ;;  %v1294_v30 = vpack.c.bf16 %v562_v24, %v561_v23  ;;  %v545_v31 = vld [vmem:[%s1582_s7 + $0x170] sm:$0xff]  ;;  %v435_v35 = vld [vmem:[%s1584_s8] sm:$0xff] }
  0x5d   : > { %1285 = vmatpush3.bf16.msra.mxu1 %v1284_v0  ;;  %1255 = vmatprep.subr.bf16.mxu0 %v1254_v1  ;;  %v546_v32 = vld [vmem:[%s1582_s7 + $0x178] sm:$0xff]  ;;  %v1264_v33 = vpack.c.bf16 %v514_v29, %v513_v28  ;;  %v437_v36 = vld [vmem:[%s1584_s8 + $0x10] sm:$0xff]  ;;  %v440_v37 = vld [vmem:[%s1584_s8 + $0x28] sm:$0xff] }
  0x5e   : > { %1287 = vmatprep.subr.bf16.mxu1 %v1286_v5  ;;  %v1296_v34 = vpack.c.bf16 %v546_v32, %v545_v31  ;;  %v442_v38 = vld [vmem:[%s1584_s8 + $0x38] sm:$0xff]  ;;  %v439_v39 = vld [vmem:[%s1584_s8 + $0x20] sm:$0xff]  ;;  %v441_v40 = vld [vmem:[%s1584_s8 + $0x30] sm:$0xff] }
  0x5f   : > { %v444_v41 = vld [vmem:[%s1584_s8 + $0x48] sm:$0xff]  ;;  %v446_v42 = vld [vmem:[%s1584_s8 + $0x58] sm:$0xff]  ;;  %v443_v43 = vld [vmem:[%s1584_s8 + $0x40] sm:$0xff] }
  0x60   : > { %1257 = vmatpush3.bf16.msra.mxu0 %v1256_v11  ;;  %v445_v44 = vld [vmem:[%s1584_s8 + $0x50] sm:$0xff]  ;;  %v448_v45 = vld [vmem:[%s1584_s8 + $0x68] sm:$0xff]  ;;  %v450_v46 = vld [vmem:[%s1584_s8 + $0x78] sm:$0xff] }
  0x61   : > { %1289 = vmatpush3.bf16.msra.mxu1 %v1288_v14  ;;  %1259 = vmatprep.subr.bf16.mxu0 %v1258_v15  ;;  %v447_v47 = vld [vmem:[%s1584_s8 + $0x60] sm:$0xff]  ;;  %v449_v48 = vld [vmem:[%s1584_s8 + $0x70] sm:$0xff]  ;;  %v452_v49 = vld [vmem:[%s1584_s8 + $0x88] sm:$0xff] }
  0x62   : > { %1291 = vmatprep.subr.bf16.mxu1 %v1290_v19  ;;  %v454_v50 = vld [vmem:[%s1584_s8 + $0x98] sm:$0xff]  ;;  %v451_v51 = vld [vmem:[%s1584_s8 + $0x80] sm:$0xff]  ;;  %v453_v52 = vld [vmem:[%s1584_s8 + $0x90] sm:$0xff] }
  0x63   : > { %v456_v53 = vld [vmem:[%s1584_s8 + $0xa8] sm:$0xff]  ;;  %v458_v54 = vld [vmem:[%s1584_s8 + $0xb8] sm:$0xff]  ;;  %v455_v55 = vld [vmem:[%s1584_s8 + $0xa0] sm:$0xff] }
  0x64   : > { %1261 = vmatpush3.bf16.msra.mxu0 %v1260_v25  ;;  %v457_v56 = vld [vmem:[%s1584_s8 + $0xb0] sm:$0xff]  ;;  %v460_v57 = vld [vmem:[%s1584_s8 + $0xc8] sm:$0xff]  ;;  %v462_v58 = vld [vmem:[%s1584_s8 + $0xd8] sm:$0xff] }
  0x65   : > { %1293 = vmatpush3.bf16.msra.mxu1 %v1292_v26  ;;  %1263 = vmatprep.subr.bf16.mxu0 %v1262_v27  ;;  %v459_v59 = vld [vmem:[%s1584_s8 + $0xc0] sm:$0xff]  ;;  %v461_v60 = vld [vmem:[%s1584_s8 + $0xd0] sm:$0xff]  ;;  %v464_v61 = vld [vmem:[%s1584_s8 + $0xe8] sm:$0xff] }
  0x66   : > { %1295 = vmatprep.subr.bf16.mxu1 %v1294_v30  ;;  %v466_v62 = vld [vmem:[%s1584_s8 + $0xf8] sm:$0xff]  ;;  %v463_v63 = vld [vmem:[%s1584_s8 + $0xe0] sm:$0xff]  ;;  %v465_v0 = vld [vmem:[%s1584_s8 + $0xf0] sm:$0xff] }
  0x67   : > { %v468_v1 = vld [vmem:[%s1584_s8 + $0x108] sm:$0xff]  ;;  %v470_v2 = vld [vmem:[%s1584_s8 + $0x118] sm:$0xff]  ;;  %v467_v3 = vld [vmem:[%s1584_s8 + $0x100] sm:$0xff] }
  0x68   : > { %1265 = vmatpush3.bf16.msra.mxu0 %v1264_v33  ;;  %v469_v4 = vld [vmem:[%s1584_s8 + $0x110] sm:$0xff]  ;;  %v472_v5 = vld [vmem:[%s1584_s8 + $0x128] sm:$0xff]  ;;  %v474_v6 = vld [vmem:[%s1584_s8 + $0x138] sm:$0xff] }
  0x69   : > { %1297 = vmatpush3.bf16.msra.mxu1 %v1296_v34  ;;  %v471_v7 = vld [vmem:[%s1584_s8 + $0x120] sm:$0xff]  ;;  %v473_v8 = vld [vmem:[%s1584_s8 + $0x130] sm:$0xff]  ;;  %v476_v9 = vld [vmem:[%s1584_s8 + $0x148] sm:$0xff] }
  0x6a   : > { %v478_v10 = vld [vmem:[%s1584_s8 + $0x158] sm:$0xff]  ;;  %v475_v11 = vld [vmem:[%s1584_s8 + $0x140] sm:$0xff]  ;;  %v477_v12 = vld [vmem:[%s1584_s8 + $0x150] sm:$0xff] }
  0x6b   : > { %628 = vmatmul.mubr.f32.vlgmr.msra.gmra.mrb[0].mxu0 %v435_v35  ;;  %v480_v13 = vld [vmem:[%s1584_s8 + $0x168] sm:$0xff]  ;;  %v482_v14 = vld [vmem:[%s1584_s8 + $0x178] sm:$0xff]  ;;  %v479_v15 = vld [vmem:[%s1584_s8 + $0x160] sm:$0xff] }
  0x6c   : > { %773 = vmatmul.mubr.f32.vlgmr.msra.gmra.mrb[0].mxu1 %v437_v36  ;;  %632 = vmatprep.mubr.f32.mxu0 %v440_v37  ;;  %v481_v16 = vld [vmem:[%s1584_s8 + $0x170] sm:$0xff]  ;;  %v484_v17 = vld [vmem:[%s1584_s8 + $0x188] sm:$0xff]  ;;  %v486_v18 = vld [vmem:[%s1584_s8 + $0x198] sm:$0xff] }
  0x6d   : > { %777 = vmatprep.mubr.f32.mxu1 %v442_v38  ;;  %v483_v19 = vld [vmem:[%s1584_s8 + $0x180] sm:$0xff]  ;;  %v485_v20 = vld [vmem:[%s1584_s8 + $0x190] sm:$0xff]  ;;  %v488_v21 = vld [vmem:[%s1584_s8 + $0x1a8] sm:$0xff] }
  0x6e   : > { %v490_v22 = vld [vmem:[%s1584_s8 + $0x1b8] sm:$0xff]  ;;  %v487_v23 = vld [vmem:[%s1584_s8 + $0x1a0] sm:$0xff]  ;;  %v489_v24 = vld [vmem:[%s1584_s8 + $0x1b0] sm:$0xff] }
  0x6f   : > { %633 = vmatmul.mubr.f32.gmra.mrb[2].mxu0 %v439_v39  ;;  %v492_v25 = vld [vmem:[%s1584_s8 + $0x1c8] sm:$0xff]  ;;  %v494_v26 = vld [vmem:[%s1584_s8 + $0x1d8] sm:$0xff]  ;;  %v491_v27 = vld [vmem:[%s1584_s8 + $0x1c0] sm:$0xff] }
  0x70   : > { %778 = vmatmul.mubr.f32.gmra.mrb[2].mxu1 %v441_v40  ;;  %637 = vmatprep.mubr.f32.mxu0 %v444_v41  ;;  %v493_v28 = vld [vmem:[%s1584_s8 + $0x1d0] sm:$0xff]  ;;  %v496_v29 = vld [vmem:[%s1584_s8 + $0x1e8] sm:$0xff]  ;;  %v498_v30 = vld [vmem:[%s1584_s8 + $0x1f8] sm:$0xff] }
  0x71   : > { %782 = vmatprep.mubr.f32.mxu1 %v446_v42  ;;  %v495_v31 = vld [vmem:[%s1584_s8 + $0x1e0] sm:$0xff]  ;;  %v497_v32 = vld [vmem:[%s1584_s8 + $0x1f0] sm:$0xff] }
  0x72   : > { %v419_v39 = vld [vmem:[#allocation2] sm:$0xff] }
  0x73   : > { %638 = vmatmul.mubr.f32.gmra.mrb[4].mxu0 %v443_v43 }
  0x74   : > { %783 = vmatmul.mubr.f32.gmra.mrb[4].mxu1 %v445_v44  ;;  %642 = vmatprep.mubr.f32.mxu0 %v448_v45 }
  0x75   : > { %787 = vmatprep.mubr.f32.mxu1 %v450_v46 }
  0x77   : > { %643 = vmatmul.mubr.f32.gmra.mrb[6].mxu0 %v447_v47 }
  0x78   : > { %788 = vmatmul.mubr.f32.gmra.mrb[6].mxu1 %v449_v48  ;;  %647 = vmatprep.mubr.f32.mxu0 %v452_v49  ;;  %v420_v48 = vld [vmem:[#allocation2 + $0x8] sm:$0xff] }
  0x79   : > { %792 = vmatprep.mubr.f32.mxu1 %v454_v50 }
  0x7b   : > { %648 = vmatmul.mubr.f32.gmra.mrb[8].mxu0 %v451_v51 }
  0x7c   : > { %793 = vmatmul.mubr.f32.gmra.mrb[8].mxu1 %v453_v52  ;;  %652 = vmatprep.mubr.f32.mxu0 %v456_v53 }
  0x7d   : > { %797 = vmatprep.mubr.f32.mxu1 %v458_v54 }
  0x7f   : > { %653 = vmatmul.mubr.f32.gmra.mrb[10].mxu0 %v455_v55 }
  0x80   : > { %798 = vmatmul.mubr.f32.gmra.mrb[10].mxu1 %v457_v56  ;;  %657 = vmatprep.mubr.f32.mxu0 %v460_v57  ;;  %v421_v57 = vld [vmem:[#allocation2 + $0x10] sm:$0xff] }
  0x81   : > { %802 = vmatprep.mubr.f32.mxu1 %v462_v58 }
  0x83   : > { %658 = vmatmul.mubr.f32.gmra.mrb[12].mxu0 %v459_v59 }
  0x84   : > { %803 = vmatmul.mubr.f32.gmra.mrb[12].mxu1 %v461_v60  ;;  %662 = vmatprep.mubr.f32.mxu0 %v464_v61 }
  0x85   : > { %807 = vmatprep.mubr.f32.mxu1 %v466_v62 }
  0x87   : > { %663 = vmatmul.mubr.f32.gmra.mrb[14].mxu0 %v463_v63 }
  0x88   : > { %808 = vmatmul.mubr.f32.gmra.mrb[14].mxu1 %v465_v0  ;;  %667 = vmatprep.mubr.f32.mxu0 %v468_v1 }
  0x89   : > { %812 = vmatprep.mubr.f32.mxu1 %v470_v2  ;;  %v422_v2 = vld [vmem:[#allocation2 + $0x18] sm:$0xff] }
  0x8b   : > { %668 = vmatmul.mubr.f32.gmra.mrb[16].mxu0 %v467_v3 }
  0x8c   : > { %813 = vmatmul.mubr.f32.gmra.mrb[16].mxu1 %v469_v4  ;;  %672 = vmatprep.mubr.f32.mxu0 %v472_v5 }
  0x8d   : > { %817 = vmatprep.mubr.f32.mxu1 %v474_v6 }
  0x8f   : > { %673 = vmatmul.mubr.f32.gmra.mrb[18].mxu0 %v471_v7 }
  0x90   : > { %818 = vmatmul.mubr.f32.gmra.mrb[18].mxu1 %v473_v8  ;;  %677 = vmatprep.mubr.f32.mxu0 %v476_v9 }
  0x91   : > { %822 = vmatprep.mubr.f32.mxu1 %v478_v10 }
  0x93   : > { %678 = vmatmul.mubr.f32.gmra.mrb[20].mxu0 %v475_v11  ;;  %v423_v11 = vld [vmem:[#allocation2 + $0x20] sm:$0xff] }
  0x94   : > { %823 = vmatmul.mubr.f32.gmra.mrb[20].mxu1 %v477_v12  ;;  %682 = vmatprep.mubr.f32.mxu0 %v480_v13 }
  0x95   : > { %827 = vmatprep.mubr.f32.mxu1 %v482_v14 }
  0x97   : > { %683 = vmatmul.mubr.f32.gmra.mrb[22].mxu0 %v479_v15 }
  0x98   : > { %828 = vmatmul.mubr.f32.gmra.mrb[22].mxu1 %v481_v16  ;;  %687 = vmatprep.mubr.f32.mxu0 %v484_v17 }
  0x99   : > { %832 = vmatprep.mubr.f32.mxu1 %v486_v18 }
  0x9b   : > { %688 = vmatmul.mubr.f32.gmra.mrb[24].mxu0 %v483_v19 }
  0x9c   : > { %833 = vmatmul.mubr.f32.gmra.mrb[24].mxu1 %v485_v20  ;;  %692 = vmatprep.mubr.f32.mxu0 %v488_v21  ;;  %v424_v20 = vld [vmem:[#allocation2 + $0x28] sm:$0xff] }
  0x9d   : > { %837 = vmatprep.mubr.f32.mxu1 %v490_v22 }
  0x9f   : > { %693 = vmatmul.mubr.f32.gmra.mrb[26].mxu0 %v487_v23 }
  0xa0   : > { %838 = vmatmul.mubr.f32.gmra.mrb[26].mxu1 %v489_v24  ;;  %697 = vmatprep.mubr.f32.mxu0 %v492_v25 }
  0xa1   : > { %842 = vmatprep.mubr.f32.mxu1 %v494_v26 }
  0xa3   : > { %698 = vmatmul.mubr.f32.gmra.mrb[28].mxu0 %v491_v27 }
  0xa4   : > { %843 = vmatmul.mubr.f32.gmra.mrb[28].mxu1 %v493_v28  ;;  %702 = vmatprep.mubr.f32.mxu0 %v496_v29  ;;  %v425_v29 = vld [vmem:[#allocation2 + $0x30] sm:$0xff] }
  0xa5   : > { %847 = vmatprep.mubr.f32.mxu1 %v498_v30 }
  0xa7   : > { %703 = vmatmul.mubr.f32.gmra.mrb[30].mxu0 %v495_v31 }
  0xa8   : > { %848 = vmatmul.mubr.f32.gmra.mrb[30].mxu1 %v497_v32 }
 0x13e   : > { %v1106_v33 = vpop.f32.mrb[0].mxu0 }
 0x13f   : > { %v1186_v34 = vpop.f32.mrb[0].mxu1  ;;  %v1107_v35 = vpop.f32.mrb[1].mxu0 }
 0x140   : > { %v1108_v36 = vadd.f32 %v1107_v35, %v1106_v33  ;;  %v1187_v37 = vpop.f32.mrb[1].mxu1 }
 0x141   : > { %v1188_v38 = vadd.f32 %v1187_v37, %v1186_v34 }
 0x142   : > { %v1109_v40 = vpop.f32.mrb[2].mxu0 }
 0x143   : > { %v775_v41 = vadd.f32 %v1188_v38, %v1108_v36  ;;  %v1189_v42 = vpop.f32.mrb[2].mxu1  ;;  %v1110_v43 = vpop.f32.mrb[3].mxu0  ;;  %v426_v38 = vld [vmem:[#allocation2 + $0x38] sm:$0xff] }
 0x144   : > { %v1111_v44 = vadd.f32 %v1110_v43, %v1109_v40  ;;  %v1190_v45 = vpop.f32.mrb[3].mxu1 }
 0x145   : > { %v853_v46 = vadd.f32 %v775_v41, %v419_v39  ;;  %v1191_v47 = vadd.f32 %v1190_v45, %v1189_v42 }
 0x146   : > { %v1112_v49 = vpop.f32.mrb[4].mxu0 }
 0x147   : > { %869 = vst [vmem:[#allocation2] sm:$0xff] %v853_v46  ;;  %v780_v50 = vadd.f32 %v1191_v47, %v1111_v44  ;;  %v1192_v51 = vpop.f32.mrb[4].mxu1  ;;  %v1113_v52 = vpop.f32.mrb[5].mxu0  ;;  %v427_v47 = vld [vmem:[#allocation2 + $0x40] sm:$0xff] }
 0x148   : > { %v1114_v53 = vadd.f32 %v1113_v52, %v1112_v49  ;;  %v1193_v54 = vpop.f32.mrb[5].mxu1 }
 0x149   : > { %v854_v55 = vadd.f32 %v780_v50, %v420_v48  ;;  %v1194_v56 = vadd.f32 %v1193_v54, %v1192_v51 }
 0x14a   : > { %v1115_v58 = vpop.f32.mrb[6].mxu0 }
 0x14b   : > { %870 = vst [vmem:[#allocation2 + $0x8] sm:$0xff] %v854_v55  ;;  %v785_v59 = vadd.f32 %v1194_v56, %v1114_v53  ;;  %v1195_v60 = vpop.f32.mrb[6].mxu1  ;;  %v1116_v61 = vpop.f32.mrb[7].mxu0  ;;  %v428_v56 = vld [vmem:[#allocation2 + $0x48] sm:$0xff] }
 0x14c   : > { %v1117_v62 = vadd.f32 %v1116_v61, %v1115_v58  ;;  %v1196_v63 = vpop.f32.mrb[7].mxu1 }
 0x14d   : > { %v855_v0 = vadd.f32 %v785_v59, %v421_v57  ;;  %v1197_v1 = vadd.f32 %v1196_v63, %v1195_v60 }
 0x14e   : > { %v1118_v3 = vpop.f32.mrb[8].mxu0 }
 0x14f   : > { %871 = vst [vmem:[#allocation2 + $0x10] sm:$0xff] %v855_v0  ;;  %v790_v4 = vadd.f32 %v1197_v1, %v1117_v62  ;;  %v1198_v5 = vpop.f32.mrb[8].mxu1  ;;  %v1119_v6 = vpop.f32.mrb[9].mxu0  ;;  %v429_v1 = vld [vmem:[#allocation2 + $0x50] sm:$0xff] }
 0x150   : > { %v1120_v7 = vadd.f32 %v1119_v6, %v1118_v3  ;;  %v1199_v8 = vpop.f32.mrb[9].mxu1 }
 0x151   : > { %v856_v9 = vadd.f32 %v790_v4, %v422_v2  ;;  %v1200_v10 = vadd.f32 %v1199_v8, %v1198_v5 }
 0x152   : > { %v1121_v12 = vpop.f32.mrb[10].mxu0 }
 0x153   : > { %872 = vst [vmem:[#allocation2 + $0x18] sm:$0xff] %v856_v9  ;;  %v795_v13 = vadd.f32 %v1200_v10, %v1120_v7  ;;  %v1201_v14 = vpop.f32.mrb[10].mxu1  ;;  %v1122_v15 = vpop.f32.mrb[11].mxu0  ;;  %v430_v10 = vld [vmem:[#allocation2 + $0x58] sm:$0xff] }
 0x154   : > { %v1123_v16 = vadd.f32 %v1122_v15, %v1121_v12  ;;  %v1202_v17 = vpop.f32.mrb[11].mxu1 }
 0x155   : > { %v857_v18 = vadd.f32 %v795_v13, %v423_v11  ;;  %v1203_v19 = vadd.f32 %v1202_v17, %v1201_v14 }
 0x156   : > { %v1124_v21 = vpop.f32.mrb[12].mxu0 }
 0x157   : > { %873 = vst [vmem:[#allocation2 + $0x20] sm:$0xff] %v857_v18  ;;  %v800_v22 = vadd.f32 %v1203_v19, %v1123_v16  ;;  %v1204_v23 = vpop.f32.mrb[12].mxu1  ;;  %v1125_v24 = vpop.f32.mrb[13].mxu0  ;;  %v431_v19 = vld [vmem:[#allocation2 + $0x60] sm:$0xff] }
 0x158   : > { %v1126_v25 = vadd.f32 %v1125_v24, %v1124_v21  ;;  %v1205_v26 = vpop.f32.mrb[13].mxu1 }
 0x159   : > { %v858_v27 = vadd.f32 %v800_v22, %v424_v20  ;;  %v1206_v28 = vadd.f32 %v1205_v26, %v1204_v23 }
 0x15a   : > { %v1127_v30 = vpop.f32.mrb[14].mxu0 }
 0x15b   : > { %874 = vst [vmem:[#allocation2 + $0x28] sm:$0xff] %v858_v27  ;;  %v805_v31 = vadd.f32 %v1206_v28, %v1126_v25  ;;  %v1207_v32 = vpop.f32.mrb[14].mxu1  ;;  %v1128_v33 = vpop.f32.mrb[15].mxu0  ;;  %v432_v28 = vld [vmem:[#allocation2 + $0x68] sm:$0xff] }
 0x15c   : > { %v1129_v34 = vadd.f32 %v1128_v33, %v1127_v30  ;;  %v1208_v35 = vpop.f32.mrb[15].mxu1 }
 0x15d   : > { %v859_v36 = vadd.f32 %v805_v31, %v425_v29  ;;  %v1209_v37 = vadd.f32 %v1208_v35, %v1207_v32 }
 0x15e   : > { %v1130_v39 = vpop.f32.mrb[16].mxu0 }
 0x15f   : > { %875 = vst [vmem:[#allocation2 + $0x30] sm:$0xff] %v859_v36  ;;  %v810_v40 = vadd.f32 %v1209_v37, %v1129_v34  ;;  %v1210_v41 = vpop.f32.mrb[16].mxu1  ;;  %v1131_v42 = vpop.f32.mrb[17].mxu0  ;;  %v433_v37 = vld [vmem:[#allocation2 + $0x70] sm:$0xff] }
 0x160   : > { %v1132_v43 = vadd.f32 %v1131_v42, %v1130_v39  ;;  %v1211_v44 = vpop.f32.mrb[17].mxu1 }
 0x161   : > { %v860_v45 = vadd.f32 %v810_v40, %v426_v38  ;;  %v1212_v46 = vadd.f32 %v1211_v44, %v1210_v41 }
 0x162   : > { %v1133_v48 = vpop.f32.mrb[18].mxu0 }
 0x163   : > { %876 = vst [vmem:[#allocation2 + $0x38] sm:$0xff] %v860_v45  ;;  %v815_v49 = vadd.f32 %v1212_v46, %v1132_v43  ;;  %v1213_v50 = vpop.f32.mrb[18].mxu1  ;;  %v1134_v51 = vpop.f32.mrb[19].mxu0  ;;  %v434_v46 = vld [vmem:[#allocation2 + $0x78] sm:$0xff] }
 0x164   : > { %v1135_v52 = vadd.f32 %v1134_v51, %v1133_v48  ;;  %v1214_v53 = vpop.f32.mrb[19].mxu1  ;;  %v890_v51 = vld [vmem:[#allocation2 + $0x8] sm:$0xff] (!%p1067_p11) }
 0x165   : > { %v861_v54 = vadd.f32 %v815_v49, %v427_v47  ;;  %v1215_v55 = vadd.f32 %v1214_v53, %v1213_v50  ;;  %v889_v49 = vld [vmem:[#allocation2] sm:$0xff] (!%p1067_p11) }
 0x166   : > { %v1136_v57 = vpop.f32.mrb[20].mxu0  ;;  %v1068_v50 = vld [vmem:[%s1784_s2] ss:$0 sm:$0xff] (!%p1067_p11) }
 0x167   : > { %877 = vst [vmem:[#allocation2 + $0x40] sm:$0xff] %v861_v54  ;;  %v820_v58 = vadd.f32 %v1215_v55, %v1135_v52  ;;  %v1216_v59 = vpop.f32.mrb[20].mxu1  ;;  %v1137_v60 = vpop.f32.mrb[21].mxu0  ;;  %v912_v52 = vadd.f32 (!%p1067_p11), %v1068_v50, %v889_v49  ;;  %v913_v53 = vadd.f32 (!%p1067_p11), %v1068_v50, %v890_v51  ;;  %v891_v54 = vld [vmem:[#allocation2 + $0x10] sm:$0xff] (!%p1067_p11)  ;;  %v892_v55 = vld [vmem:[#allocation2 + $0x18] sm:$0xff] (!%p1067_p11) }
 0x168   : > { %v1138_v61 = vadd.f32 %v1137_v60, %v1136_v57  ;;  %v1217_v62 = vpop.f32.mrb[21].mxu1  ;;  %v914_v57 = vadd.f32 (!%p1067_p11), %v1068_v50, %v891_v54  ;;  %v894_v60 = vld [vmem:[#allocation2 + $0x28] sm:$0xff] (!%p1067_p11) }
 0x169   : > { %v862_v63 = vadd.f32 %v820_v58, %v428_v56  ;;  %v1218_v0 = vadd.f32 %v1217_v62, %v1216_v59  ;;  %v893_v56 = vld [vmem:[#allocation2 + $0x20] sm:$0xff] (!%p1067_p11)  ;;  %v915_v58 = vadd.f32 (!%p1067_p11), %v1068_v50, %v892_v55  ;;  %928 = vst [vmem:[%s1785_s3] sm:$0xff] (!%p1067_p11), %v912_v52  ;;  %929 = vst [vmem:[%s1785_s3 + $0x8] sm:$0xff] (!%p1067_p11), %v913_v53 }
 0x16a   : > { %v1139_v2 = vpop.f32.mrb[22].mxu0  ;;  %v916_v59 = vadd.f32 (!%p1067_p11), %v1068_v50, %v893_v56  ;;  %v896_v62 = vld [vmem:[#allocation2 + $0x38] sm:$0xff] (!%p1067_p11)  ;;  %930 = vst [vmem:[%s1785_s3 + $0x10] sm:$0xff] (!%p1067_p11), %v914_v57 }
 0x16b   : > { %878 = vst [vmem:[#allocation2 + $0x48] sm:$0xff] %v862_v63  ;;  %v825_v3 = vadd.f32 %v1218_v0, %v1138_v61  ;;  %v1219_v4 = vpop.f32.mrb[22].mxu1  ;;  %v1140_v5 = vpop.f32.mrb[23].mxu0  ;;  %v895_v61 = vld [vmem:[#allocation2 + $0x30] sm:$0xff] (!%p1067_p11)  ;;  %v917_v63 = vadd.f32 (!%p1067_p11), %v1068_v50, %v894_v60  ;;  %931 = vst [vmem:[%s1785_s3 + $0x18] sm:$0xff] (!%p1067_p11), %v915_v58 }
 0x16c   : > { %v1141_v6 = vadd.f32 %v1140_v5, %v1139_v2  ;;  %v1220_v7 = vpop.f32.mrb[23].mxu1  ;;  %v918_v0 = vadd.f32 (!%p1067_p11), %v1068_v50, %v895_v61  ;;  %932 = vst [vmem:[%s1785_s3 + $0x20] sm:$0xff] (!%p1067_p11), %v916_v59 }
 0x16d   : > { %v863_v8 = vadd.f32 %v825_v3, %v429_v1  ;;  %v1221_v9 = vadd.f32 %v1220_v7, %v1219_v4  ;;  %v919_v1 = vadd.f32 (!%p1067_p11), %v1068_v50, %v896_v62  ;;  %933 = vst [vmem:[%s1785_s3 + $0x28] sm:$0xff] (!%p1067_p11), %v917_v63 }
 0x16e   : > { %v1142_v11 = vpop.f32.mrb[24].mxu0  ;;  %v897_v2 = vld [vmem:[#allocation2 + $0x40] sm:$0xff] (!%p1067_p11)  ;;  %934 = vst [vmem:[%s1785_s3 + $0x30] sm:$0xff] (!%p1067_p11), %v918_v0 }
 0x16f   : > { %879 = vst [vmem:[#allocation2 + $0x50] sm:$0xff] %v863_v8  ;;  %v830_v12 = vadd.f32 %v1221_v9, %v1141_v6  ;;  %v1222_v13 = vpop.f32.mrb[24].mxu1  ;;  %v1143_v14 = vpop.f32.mrb[25].mxu0  ;;  %v920_v5 = vadd.f32 (!%p1067_p11), %v1068_v50, %v897_v2  ;;  %935 = vst [vmem:[%s1785_s3 + $0x38] sm:$0xff] (!%p1067_p11), %v919_v1 }
 0x170   : > { %v1144_v15 = vadd.f32 %v1143_v14, %v1142_v11  ;;  %v1223_v16 = vpop.f32.mrb[25].mxu1 }
 0x171   : > { %v864_v17 = vadd.f32 %v830_v12, %v430_v10  ;;  %v1224_v18 = vadd.f32 %v1223_v16, %v1222_v13  ;;  %936 = vst [vmem:[%s1785_s3 + $0x40] sm:$0xff] (!%p1067_p11), %v920_v5 }
 0x172   : > { %v1145_v20 = vpop.f32.mrb[26].mxu0  ;;  %v898_v3 = vld [vmem:[#allocation2 + $0x48] sm:$0xff] (!%p1067_p11) }
 0x173   : > { %880 = vst [vmem:[#allocation2 + $0x58] sm:$0xff] %v864_v17  ;;  %v835_v21 = vadd.f32 %v1224_v18, %v1144_v15  ;;  %v1225_v22 = vpop.f32.mrb[26].mxu1  ;;  %v1146_v23 = vpop.f32.mrb[27].mxu0  ;;  %v921_v6 = vadd.f32 (!%p1067_p11), %v1068_v50, %v898_v3 }
 0x174   : > { %v1147_v24 = vadd.f32 %v1146_v23, %v1145_v20  ;;  %v1226_v25 = vpop.f32.mrb[27].mxu1 }
 0x175   : > { %v865_v26 = vadd.f32 %v835_v21, %v431_v19  ;;  %v1227_v27 = vadd.f32 %v1226_v25, %v1225_v22  ;;  %937 = vst [vmem:[%s1785_s3 + $0x48] sm:$0xff] (!%p1067_p11), %v921_v6 }
 0x176   : > { %v1148_v29 = vpop.f32.mrb[28].mxu0  ;;  %v899_v4 = vld [vmem:[#allocation2 + $0x50] sm:$0xff] (!%p1067_p11) }
 0x177   : > { %881 = vst [vmem:[#allocation2 + $0x60] sm:$0xff] %v865_v26  ;;  %v840_v30 = vadd.f32 %v1227_v27, %v1147_v24  ;;  %v1228_v31 = vpop.f32.mrb[28].mxu1  ;;  %v1149_v32 = vpop.f32.mrb[29].mxu0  ;;  %v922_v7 = vadd.f32 (!%p1067_p11), %v1068_v50, %v899_v4 }
 0x178   : > { %v1150_v33 = vadd.f32 %v1149_v32, %v1148_v29  ;;  %v1229_v34 = vpop.f32.mrb[29].mxu1 }
 0x179   : > { %v866_v35 = vadd.f32 %v840_v30, %v432_v28  ;;  %v1230_v36 = vadd.f32 %v1229_v34, %v1228_v31  ;;  %938 = vst [vmem:[%s1785_s3 + $0x50] sm:$0xff] (!%p1067_p11), %v922_v7 }
 0x17a   : > { %v1151_v38 = vpop.f32.mrb[30].mxu0  ;;  %v900_v8 = vld [vmem:[#allocation2 + $0x58] sm:$0xff] (!%p1067_p11) }
 0x17b   : > { %882 = vst [vmem:[#allocation2 + $0x68] sm:$0xff] %v866_v35  ;;  %v845_v39 = vadd.f32 %v1230_v36, %v1150_v33  ;;  %v1231_v40 = vpop.f32.mrb[30].mxu1  ;;  %v1152_v41 = vpop.f32.mrb[31].mxu0  ;;  %v923_v11 = vadd.f32 (!%p1067_p11), %v1068_v50, %v900_v8 }
 0x17c   : > { %v1153_v42 = vadd.f32 %v1152_v41, %v1151_v38  ;;  %v1232_v43 = vpop.f32.mrb[31].mxu1 }
 0x17d   : > { %v867_v44 = vadd.f32 %v845_v39, %v433_v37  ;;  %v1233_v45 = vadd.f32 %v1232_v43, %v1231_v40  ;;  %888 = sbr.rel (%p1067_p11) target bundleno = 398 (0x18e), region = 63  ;;  %939 = vst [vmem:[%s1785_s3 + $0x58] sm:$0xff] (!%p1067_p11), %v923_v11 }
 0x17e   : > { %v901_v9 = vld [vmem:[#allocation2 + $0x60] sm:$0xff] (!%p1067_p11) }
 0x17f   : > { %883 = vst [vmem:[#allocation2 + $0x70] sm:$0xff] %v867_v44  ;;  %v850_v47 = vadd.f32 %v1233_v45, %v1153_v42  ;;  %v924_v12 = vadd.f32 (!%p1067_p11), %v1068_v50, %v901_v9 }
 0x181   : > { %v868_v48 = vadd.f32 %v850_v47, %v434_v46  ;;  %940 = vst [vmem:[%s1785_s3 + $0x60] sm:$0xff] (!%p1067_p11), %v924_v12 }
 0x182   : > { %v902_v10 = vld [vmem:[#allocation2 + $0x68] sm:$0xff] (!%p1067_p11) }
 0x183   : > { %884 = vst [vmem:[#allocation2 + $0x78] sm:$0xff] %v868_v48  ;;  %v925_v13 = vadd.f32 (!%p1067_p11), %v1068_v50, %v902_v10 }
 0x185   : > { %941 = vst [vmem:[%s1785_s3 + $0x68] sm:$0xff] %v925_v13 }
 0x186   : > { %v903_v14 = vld [vmem:[#allocation2 + $0x70] sm:$0xff] }
 0x187   : > { %v926_v16 = vadd.f32 %v1068_v50, %v903_v14 }
 0x189   : > { %942 = vst [vmem:[%s1785_s3 + $0x70] sm:$0xff] %v926_v16 }
 0x18a   : > { %v904_v15 = vld [vmem:[#allocation2 + $0x78] sm:$0xff] }
 0x18b   : > { %v927_v17 = vadd.f32 %v1068_v50, %v904_v15 }
 0x18d   : > { %943 = vst [vmem:[%s1785_s3 + $0x78] sm:$0xff] %v927_v17 }
 0x18e PF: > { %s13_s16 = sadd.s32 1, %s1377_s16   ;;  %s1786_s12 = smov %s1365_s13 }
 0x18f   : > { %p10_p12 = scmp.ge.s32.totalorder %s13_s16, 4   ;;  %s1787_s13 = smov %s1435_s20 }
 0x190   : > { %s1788_s14 = smov %s1373_s15  ;;  %s1789_s15 = smov %s1791_s17 }
 0x191   :  { %12 = sbr.rel (!%p10_p12) target bundleno = 3 (0x3), region = 104 }

// kernel: _apply_model.66
= control target key start
LH: loop header
LB: loop body
LE: loop exit
PB: predicated region body
PF: predicated region fallthrough
CT: control target
= control target key end

     0   :  { %s267_s6 = smov 0   ;;  %s304_s0 = inlined_call_operand.vmem [shape: f32[2,64,32], index: 0, kind: input, shape index: {}]   ;;  %s305_s1 = inlined_call_operand.vmem [shape: f32[2,2,32], index: 1, kind: output, shape index: {}]  }
   0x1 LB: > { %s230_s7 = sadd.s32 4294967295, %s255_s6   ;;  %p234_p0 = scmp.ge.s32.totalorder %s255_s6, 1  ;;  %s255_s6 = sphi %s267_s6, %s11_s6  }
   0x2   : > { %p87_p1 = scmp.lt.s32.totalorder %s255_s6, 3 }
   0x4   : > { %p88_p2 = pnand %p234_p0, %p87_p1 }
   0x5   : > { %p106_p3 = scmp.lt.s32.totalorder (!%p88_p2), %s230_s7, 1  ;;  %vm123_vm0 = vcmask (!%p88_p2), 261120   ;;  %vm145_vm1 = vcmask (!%p88_p2), 253952  }
   0x6   : > { %91 = sbr.rel (%p88_p2) target bundleno = 48 (0x30), region = 24 }
   0xd   : > { %s307_s7 = smov (!%p106_p3, %s230_s7), 1 }
   0xe   : > { %s240_s8 = sshll.u32 %s307_s7, 6  ;;  %s237_s12 = sshll.u32 %s307_s7, 1 }
   0xf   : > { %s110_s11 = scalar_lea.vmem %s304_s0, %s240_s8  ;;  %s114_s15 = scalar_lea.vmem %s305_s1, %s237_s12 }
  0x10   : > { %v115_v0 = vld [vmem:[%s110_s11] sm:$0xff]  ;;  %v116_v1 = vld [vmem:[%s110_s11 + $0x8] sm:$0xff]  ;;  %v117_v2 = vld [vmem:[%s110_s11 + $0x10] sm:$0xff] }
  0x11   : > { %v118_v3 = vld [vmem:[%s110_s11 + $0x18] sm:$0xff]  ;;  %v124_v4 = vsel %vm123_vm0, %v115_v0, 0.0  ;;  %v125_v5 = vsel %vm123_vm0, %v116_v1, 0.0  ;;  %v127_v6 = vsel %vm123_vm0, %v117_v2, 0.0  ;;  %v147_v7 = vmul.f32 %v115_v0, %v115_v0  ;;  %v119_v8 = vld [vmem:[%s110_s11 + $0x20] sm:$0xff]  ;;  %v120_v13 = vld [vmem:[%s110_s11 + $0x28] sm:$0xff] }
  0x12   : > { %v126_v9 = vadd.f32 %v125_v5, %v124_v4  ;;  %v129_v10 = vsel %vm123_vm0, %v118_v3, 0.0  ;;  %v148_v11 = vmul.f32 %v116_v1, %v116_v1  ;;  %v149_v12 = vmul.f32 %v117_v2, %v117_v2  ;;  %v121_v20 = vld [vmem:[%s110_s11 + $0x30] sm:$0xff]  ;;  %v122_v27 = vld [vmem:[%s110_s11 + $0x38] sm:$0xff] }
  0x13   : > { %v150_v15 = vmul.f32 %v118_v3, %v118_v3  ;;  %v131_v16 = vsel %vm123_vm0, %v119_v8, 0.0  ;;  %v151_v17 = vmul.f32 %v119_v8, %v119_v8  ;;  %v155_v18 = vsel %vm123_vm0, %v147_v7, 0.0 }
  0x14   : > { %v128_v14 = vadd.f32 %v127_v6, %v126_v9  ;;  %v156_v19 = vsel %vm123_vm0, %v148_v11, 0.0  ;;  %v158_v23 = vsel %vm123_vm0, %v149_v12, 0.0  ;;  %v133_v24 = vsel %vm123_vm0, %v120_v13, 0.0 }
  0x15   : > { %v157_v22 = vadd.f32 %v156_v19, %v155_v18  ;;  %v152_v25 = vmul.f32 %v120_v13, %v120_v13  ;;  %v160_v26 = vsel %vm123_vm0, %v150_v15, 0.0  ;;  %v135_v30 = vsel %vm123_vm0, %v121_v20, 0.0 }
  0x16   : > { %v130_v21 = vadd.f32 %v129_v10, %v128_v14  ;;  %v153_v31 = vmul.f32 %v121_v20, %v121_v20  ;;  %v162_v32 = vsel %vm123_vm0, %v151_v17, 0.0  ;;  %v137_v35 = vsel %vm123_vm0, %v122_v27, 0.0 }
  0x17   : > { %v159_v29 = vadd.f32 %v158_v23, %v157_v22  ;;  %v154_v36 = vmul.f32 %v122_v27, %v122_v27  ;;  %v164_v37 = vsel %vm123_vm0, %v152_v25, 0.0 }
  0x18   : > { %v132_v28 = vadd.f32 %v131_v16, %v130_v21  ;;  %v166_v40 = vsel %vm123_vm0, %v153_v31, 0.0 }
  0x19   : > { %v161_v34 = vadd.f32 %v160_v26, %v159_v29  ;;  %v168_v43 = vsel %vm123_vm0, %v154_v36, 0.0 }
  0x1a   : > { %v134_v33 = vadd.f32 %v133_v24, %v132_v28 }
  0x1b   : > { %v163_v39 = vadd.f32 %v162_v32, %v161_v34 }
  0x1c   : > { %v136_v38 = vadd.f32 %v135_v30, %v134_v33 }
  0x1d   : > { %v165_v42 = vadd.f32 %v164_v37, %v163_v39 }
  0x1e   : > { %v138_v41 = vadd.f32 %v137_v35, %v136_v38 }
  0x1f   : > { %v167_v45 = vadd.f32 %v166_v40, %v165_v42 }
  0x20   : > { %v139_v44 = vrot.slane %v138_v41, 4 }
  0x21   : > { %v169_v47 = vadd.f32 %v168_v43, %v167_v45 }
  0x22   : > { %v140_v46 = vadd.f32 %v139_v44, %v138_v41 }
  0x23   : > { %v170_v49 = vrot.slane %v169_v47, 4 }
  0x24   : > { %v141_v48 = vrot.slane %v140_v46, 2 }
  0x25   : > { %v171_v51 = vadd.f32 %v170_v49, %v169_v47 }
  0x26   : > { %v142_v50 = vadd.f32 %v141_v48, %v140_v46 }
  0x27   : > { %v172_v53 = vrot.slane %v171_v51, 2 }
  0x28   : > { %v143_v52 = vrot.slane %v142_v50, 1 }
  0x29   : > { %v173_v55 = vadd.f32 %v172_v53, %v171_v51 }
  0x2a   : > { %v144_v54 = vadd.f32 %v143_v52, %v142_v50 }
  0x2b   : > { %v174_v56 = vrot.slane %v173_v55, 1 }
  0x2c   : > { %146 = vst.msk [vmem:[%s114_s15] sm:$0x1] %vm145_vm1, %v144_v54 }
  0x2d   : > { %v175_v57 = vadd.f32 %v174_v56, %v173_v55 }
  0x2f   : > { %176 = vst.msk [vmem:[%s114_s15 + $0x1] sm:$0x1] %vm145_vm1, %v175_v57 }
  0x30 PF: > { %s11_s6 = sadd.s32 1, %s255_s6  }
  0x31   : > { %p8_p4 = scmp.ge.s32.totalorder %s11_s6, 4  }
  0x33   :  { %10 = sbr.rel (!%p8_p4) target bundleno = 1 (0x1), region = 54 }

// kernel: _apply_model.49
= control target key start
LH: loop header
LB: loop body
LE: loop exit
PB: predicated region body
PF: predicated region fallthrough
CT: control target
= control target key end

     0   :  { %s900_s12 = smov 0   ;;  %s1007_s0 = inlined_call_operand.vmem [shape: f32[2,64,64], index: 0, kind: input, shape index: {}]   ;;  %s1008_s1 = inlined_call_operand.vmem [shape: f32[2,64,64], index: 1, kind: input, shape index: {}]   ;;  %s1009_s2 = inlined_call_operand.vmem [shape: f32[2,64,64], index: 2, kind: input, shape index: {}]   ;;  %s1010_s3 = inlined_call_operand.vmem [shape: f32[2,64,64], index: 3, kind: output, shape index: {}]  }
   0x1 LB: > { %s677_s13 = sadd.s32 4294967295, %s878_s12   ;;  %p681_p0 = scmp.ge.s32.totalorder %s878_s12, 1  ;;  %s878_s12 = sphi %s900_s12, %s13_s12  }
   0x2   : > { %p157_p1 = scmp.lt.s32.totalorder %s878_s12, 3 }
   0x4   : > { %p158_p2 = pnand %p681_p0, %p157_p1 }
   0x5   : > { %p191_p3 = scmp.lt.s32.totalorder (!%p158_p2), %s677_s13, 1  ;;  %vm235_vm0 = vcmask (!%p158_p2), 523264  }
   0x6   : > { %161 = sbr.rel (%p158_p2) target bundleno = 794 (0x31a), region = 32 }
   0xd   : > { %s1012_s13 = smov (!%p191_p3, %s677_s13), 1 }
   0xe   : > { %s908_s14 = sshll.u32 %s1012_s13, 6 }
   0xf   : > { %s200_s17 = scalar_lea.vmem %s1008_s1, %s908_s14  ;;  %s918_s20 = scalar_lea.vmem %s1007_s0, %s908_s14 }
  0x10   : > { %v219_v0 = vld [vmem:[%s200_s17] sm:$0xff]  ;;  %v220_v1 = vld [vmem:[%s200_s17 + $0x8] sm:$0xff]  ;;  %v221_v2 = vld [vmem:[%s200_s17 + $0x10] sm:$0xff]  ;;  %s205_s23 = scalar_lea.vmem %s1009_s2, %s908_s14  ;;  %s210_s26 = scalar_lea.vmem %s1010_s3, %s908_s14 }
  0x11   : > { %v800_v3 = vpack.c.bf16 %v220_v1, %v219_v0  ;;  %v222_v4 = vld [vmem:[%s200_s17 + $0x18] sm:$0xff]  ;;  %v223_v6 = vld [vmem:[%s200_s17 + $0x20] sm:$0xff]  ;;  %v224_v7 = vld [vmem:[%s200_s17 + $0x28] sm:$0xff] }
  0x12   : > { %v804_v5 = vpack.c.bf16 %v222_v4, %v221_v2  ;;  %v211_v8 = vld [vmem:[%s918_s20] sm:$0xff]  ;;  %v808_v9 = vpack.c.bf16 %v224_v7, %v223_v6  ;;  %v225_v10 = vld [vmem:[%s200_s17 + $0x30] sm:$0xff]  ;;  %v226_v11 = vld [vmem:[%s200_s17 + $0x38] sm:$0xff] }
  0x13   : > { %801 = vmatprep.subr.bf16.mxu0 %v800_v3  ;;  %760 = vmatprep.mubr.msk.f32.mxu0 %vm235_vm0, %v211_v8  ;;  %v812_v12 = vpack.c.bf16 %v226_v11, %v225_v10  ;;  %v212_v13 = vld [vmem:[%s918_s20 + $0x8] sm:$0xff]  ;;  %v213_v14 = vld [vmem:[%s918_s20 + $0x10] sm:$0xff]  ;;  %v214_v15 = vld [vmem:[%s918_s20 + $0x18] sm:$0xff] }
  0x14   : > { %803 = vmatpush3.bf16.msra.mxu0 %v800_v3  ;;  %v215_v16 = vld [vmem:[%s918_s20 + $0x20] sm:$0xff]  ;;  %v216_v17 = vld [vmem:[%s918_s20 + $0x28] sm:$0xff]  ;;  %v217_v18 = vld [vmem:[%s918_s20 + $0x30] sm:$0xff] }
  0x15   : > { %805 = vmatprep.subr.bf16.mxu0 %v804_v5  ;;  %v218_v19 = vld [vmem:[%s918_s20 + $0x38] sm:$0xff] }
  0x18   : > { %807 = vmatpush3.bf16.msra.mxu0 %v804_v5 }
  0x19   : > { %809 = vmatprep.subr.bf16.mxu0 %v808_v9 }
  0x1c   : > { %811 = vmatpush3.bf16.msra.mxu0 %v808_v9 }
  0x1d   : > { %813 = vmatprep.subr.bf16.mxu0 %v812_v12 }
  0x20   : > { %815 = vmatpush3.bf16.msra.mxu0 %v812_v12 }
  0x23   : > { %761 = vmatmul.mubr.msk.f32.vlgmr.msra.gmra.mrb[0].mxu0 %vm235_vm0, %v212_v13 }
  0x24   : > { %763 = vmatprep.mubr.msk.f32.mxu0 %vm235_vm0, %v213_v14 }
  0x27   : > { %764 = vmatmul.mubr.msk.f32.gmra.mrb[2].mxu0 %vm235_vm0, %v214_v15 }
  0x28   : > { %766 = vmatprep.mubr.msk.f32.mxu0 %vm235_vm0, %v215_v16 }
  0x2b   : > { %767 = vmatmul.mubr.msk.f32.gmra.mrb[4].mxu0 %vm235_vm0, %v216_v17 }
  0x2c   : > { %769 = vmatprep.mubr.msk.f32.mxu0 %vm235_vm0, %v217_v18  ;;  %v227_v18 = vld [vmem:[%s205_s23] sm:$0xff] }
  0x2f   : > { %770 = vmatmul.mubr.msk.f32.gmra.mrb[6].mxu0 %vm235_vm0, %v218_v19  ;;  %v228_v19 = vld [vmem:[%s205_s23 + $0x8] sm:$0xff] }
  0xf6   : > { %v762_v20 = vpop.f32.mrb[0].mxu0 }
  0xf7   : > { %v326_v21 = vpop.f32.mrb[1].mxu0  ;;  %v366_v23 = vmul.f32 0.125, %v762_v20 }
  0xf8   : > { %v365_v22 = vmul.f32 0.125, %v326_v21  ;;  %v816_v21 = vpack.c.bf16 %v228_v19, %v227_v18 }
  0xf9   : > { %v376_v30 = vsel %vm235_vm0, %v366_v23, -inf }
  0xfa   : > { %v765_v24 = vpop.f32.mrb[2].mxu0  ;;  %v373_v25 = vsel %vm235_vm0, %v365_v22, -inf  ;;  %817 = vmatprep.subr.bf16.mxu1 %v816_v21 }
  0xfb   : > { %374 = vmax.xlane.f32.xlu0 %v373_v25  ;;  %v336_v26 = vpop.f32.mrb[3].mxu0  ;;  %v368_v28 = vmul.f32 0.125, %v765_v24  ;;  %819 = vmatpush3.bf16.msra.mxu1 %v816_v21  ;;  %v230_v24 = vld [vmem:[%s205_s23 + $0x18] sm:$0xff] }
  0xfc   : > { %v367_v27 = vmul.f32 0.125, %v336_v26  ;;  %v231_v26 = vld [vmem:[%s205_s23 + $0x20] sm:$0xff] }
  0xfd   : > { %v382_v36 = vsel %vm235_vm0, %v368_v28, -inf }
  0xfe   : > { %v768_v29 = vpop.f32.mrb[4].mxu0  ;;  %v379_v31 = vsel %vm235_vm0, %v367_v27, -inf }
  0xff   : > { %377 = vmax.xlane.f32.xlu0 %v376_v30  ;;  %380 = vmax.xlane.f32.xlu1 %v379_v31  ;;  %v346_v32 = vpop.f32.mrb[5].mxu0  ;;  %v370_v34 = vmul.f32 0.125, %v768_v29  ;;  %v233_v29 = vld [vmem:[%s205_s23 + $0x30] sm:$0xff]  ;;  %v234_v30 = vld [vmem:[%s205_s23 + $0x38] sm:$0xff] }
 0x100   : > { %v369_v33 = vmul.f32 0.125, %v346_v32  ;;  %v828_v31 = vpack.c.bf16 %v234_v30, %v233_v29 }
 0x101   : > { %v388_v41 = vsel %vm235_vm0, %v370_v34, -inf }
 0x102   : > { %v771_v35 = vpop.f32.mrb[6].mxu0  ;;  %v385_v37 = vsel %vm235_vm0, %v369_v33, -inf }
 0x103   : > { %383 = vmax.xlane.f32.xlu1 %v382_v36  ;;  %386 = vmax.xlane.f32.xlu0 %v385_v37  ;;  %v356_v38 = vpop.f32.mrb[7].mxu0  ;;  %v372_v40 = vmul.f32 0.125, %v771_v35 }
 0x104   : > { %v371_v39 = vmul.f32 0.125, %v356_v38 }
 0x105   : > { %v394_v43 = vsel %vm235_vm0, %v372_v40, -inf }
 0x106   : > { %v391_v42 = vsel %vm235_vm0, %v371_v39, -inf }
 0x107   : > { %389 = vmax.xlane.f32.xlu1 %v388_v41  ;;  %392 = vmax.xlane.f32.xlu0 %v391_v42 }
 0x10b   : > { %395 = vmax.xlane.f32.xlu1 %v394_v43 }
 0x188   : > { %v375_v44 = vpop.xlane.xlu0 %374 }
 0x189   : > { %v397_v45 = vsub.f32 %v365_v22, %v375_v44 }
 0x18b   : > { %v405_v46 = vmul.f32 1.442695, %v397_v45 }
 0x18c   : > { %v378_v47 = vpop.xlane.xlu0 %377  ;;  %v381_v48 = vpop.xlane.xlu1 %380 }
 0x18d   : > { %840 = vpow2.f32 %v405_v46  ;;  %v398_v49 = vsub.f32 %v366_v23, %v378_v47  ;;  %v399_v50 = vsub.f32 %v367_v27, %v381_v48  ;;  %v229_v23 = vld [vmem:[%s205_s23 + $0x10] sm:$0xff]  ;;  %v232_v27 = vld [vmem:[%s205_s23 + $0x28] sm:$0xff] }
 0x18e   : > { %v820_v25 = vpack.c.bf16 %v230_v24, %v229_v23 }
 0x18f   : > { %v407_v51 = vmul.f32 1.442695, %v398_v49  ;;  %v409_v52 = vmul.f32 1.442695, %v399_v50 }
 0x190   : > { %v384_v53 = vpop.xlane.xlu1 %383  ;;  %v387_v54 = vpop.xlane.xlu0 %386  ;;  %821 = vmatprep.subr.bf16.mxu1 %v820_v25 }
 0x191   : > { %842 = vpow2.f32 %v407_v51  ;;  %v400_v55 = vsub.f32 %v368_v28, %v384_v53  ;;  %v401_v56 = vsub.f32 %v369_v33, %v387_v54  ;;  %823 = vmatpush3.bf16.msra.mxu1 %v820_v25  ;;  %v824_v28 = vpack.c.bf16 %v232_v27, %v231_v26 }
 0x192   : > { %844 = vpow2.f32 %v409_v52 }
 0x193   : > { %v411_v57 = vmul.f32 1.442695, %v400_v55  ;;  %v413_v58 = vmul.f32 1.442695, %v401_v56  ;;  %825 = vmatprep.subr.bf16.mxu1 %v824_v28 }
 0x194   : > { %v390_v59 = vpop.xlane.xlu1 %389  ;;  %v393_v60 = vpop.xlane.xlu0 %392 }
 0x195   : > { %846 = vpow2.f32 %v411_v57  ;;  %v402_v61 = vsub.f32 %v370_v34, %v390_v59  ;;  %v403_v62 = vsub.f32 %v371_v39, %v393_v60  ;;  %827 = vmatpush3.bf16.msra.mxu1 %v824_v28 }
 0x196   : > { %848 = vpow2.f32 %v413_v58  ;;  %829 = vmatprep.subr.bf16.mxu1 %v828_v31 }
 0x197   : > { %v944_v63 = vpop.eup %840  ;;  %v415_v0 = vmul.f32 1.442695, %v402_v61  ;;  %v417_v1 = vmul.f32 1.442695, %v403_v62 }
 0x198   : > { %v396_v2 = vpop.xlane.xlu1 %395  ;;  %v421_v3 = vsel %vm235_vm0, %v944_v63, 0.0 }
 0x199   : > { %850 = vpow2.f32 %v415_v0  ;;  %v404_v4 = vsub.f32 %v372_v40, %v396_v2  ;;  %422 = vadd.xlane.f32.xlu0 %v421_v3  ;;  %831 = vmatpush3.bf16.msra.mxu1 %v828_v31 }
 0x19a   : > { %852 = vpow2.f32 %v417_v1 }
 0x19b   : > { %v948_v5 = vpop.eup %842  ;;  %v419_v6 = vmul.f32 1.442695, %v404_v4 }
 0x19c   : > { %v950_v7 = vpop.eup %844  ;;  %v424_v8 = vsel %vm235_vm0, %v948_v5, 0.0 }
 0x19d   : > { %854 = vpow2.f32 %v419_v6  ;;  %425 = vadd.xlane.f32.xlu1 %v424_v8  ;;  %v427_v9 = vsel %vm235_vm0, %v950_v7, 0.0 }
 0x19e   : > { %428 = vadd.xlane.f32.xlu0 %v427_v9 }
 0x19f   : > { %v956_v10 = vpop.eup %846 }
 0x1a0   : > { %v958_v11 = vpop.eup %848  ;;  %v430_v12 = vsel %vm235_vm0, %v956_v10, 0.0 }
 0x1a1   : > { %431 = vadd.xlane.f32.xlu1 %v430_v12  ;;  %v433_v13 = vsel %vm235_vm0, %v958_v11, 0.0 }
 0x1a2   : > { %434 = vadd.xlane.f32.xlu0 %v433_v13 }
 0x1a3   : > { %v964_v14 = vpop.eup %850 }
 0x1a4   : > { %v966_v15 = vpop.eup %852  ;;  %v436_v16 = vsel %vm235_vm0, %v964_v14, 0.0 }
 0x1a5   : > { %437 = vadd.xlane.f32.xlu1 %v436_v16  ;;  %v439_v17 = vsel %vm235_vm0, %v966_v15, 0.0 }
 0x1a6   : > { %440 = vadd.xlane.f32.xlu0 %v439_v17 }
 0x1a7   : > { %v855_v20 = vpop.eup %854 }
 0x1a8   : > { %v442_v22 = vsel %vm235_vm0, %v855_v20, 0.0 }
 0x1a9   : > { %443 = vadd.xlane.f32.xlu1 %v442_v22 }
 0x226   : > { %v423_v32 = vpop.xlane.xlu0 %422 }
 0x227   : > { %856 = vrcp.f32 %v423_v32 }
 0x22a   : > { %v426_v33 = vpop.xlane.xlu1 %425 }
 0x22b   : > { %858 = vrcp.f32 %v426_v33  ;;  %v429_v34 = vpop.xlane.xlu0 %428 }
 0x22c   : > { %860 = vrcp.f32 %v429_v34 }
 0x22e   : > { %v432_v35 = vpop.xlane.xlu1 %431 }
 0x22f   : > { %862 = vrcp.f32 %v432_v35  ;;  %v435_v36 = vpop.xlane.xlu0 %434 }
 0x230   : > { %864 = vrcp.f32 %v435_v36 }
 0x231   : > { %v857_v37 = vpop.eup %856 }
 0x232   : > { %v438_v38 = vpop.xlane.xlu1 %437  ;;  %v446_v39 = vmul.f32 %v857_v37, %v944_v63 }
 0x233   : > { %866 = vrcp.f32 %v438_v38  ;;  %v441_v40 = vpop.xlane.xlu0 %440 }
 0x234   : > { %868 = vrcp.f32 %v441_v40  ;;  %788 = vmatprep.mubr.msk.f32.mxu1 %vm235_vm0, %v446_v39 }
 0x235   : > { %v859_v41 = vpop.eup %858 }
 0x236   : > { %v861_v42 = vpop.eup %860  ;;  %v444_v43 = vpop.xlane.xlu1 %443  ;;  %v448_v44 = vmul.f32 %v859_v41, %v948_v5 }
 0x237   : > { %870 = vrcp.f32 %v444_v43  ;;  %v450_v45 = vmul.f32 %v861_v42, %v950_v7 }
 0x238   : > { %789 = vmatmul.mubr.msk.f32.vlgmr.msra.gmra.mrb[0].mxu1 %vm235_vm0, %v448_v44 }
 0x239   : > { %v863_v46 = vpop.eup %862  ;;  %791 = vmatprep.mubr.msk.f32.mxu1 %vm235_vm0, %v450_v45 }
 0x23a   : > { %v865_v47 = vpop.eup %864  ;;  %v452_v48 = vmul.f32 %v863_v46, %v956_v10 }
 0x23b   : > { %v454_v49 = vmul.f32 %v865_v47, %v958_v11 }
 0x23c   : > { %792 = vmatmul.mubr.msk.f32.gmra.mrb[2].mxu1 %vm235_vm0, %v452_v48 }
 0x23d   : > { %v867_v50 = vpop.eup %866  ;;  %794 = vmatprep.mubr.msk.f32.mxu1 %vm235_vm0, %v454_v49 }
 0x23e   : > { %v869_v51 = vpop.eup %868  ;;  %v456_v52 = vmul.f32 %v867_v50, %v964_v14 }
 0x23f   : > { %v458_v53 = vmul.f32 %v869_v51, %v966_v15 }
 0x240   : > { %795 = vmatmul.mubr.msk.f32.gmra.mrb[4].mxu1 %vm235_vm0, %v456_v52 }
 0x241   : > { %v871_v54 = vpop.eup %870  ;;  %797 = vmatprep.mubr.msk.f32.mxu1 %vm235_vm0, %v458_v53 }
 0x242   : > { %v460_v55 = vmul.f32 %v871_v54, %v855_v20 }
 0x244   : > { %798 = vmatmul.mubr.msk.f32.gmra.mrb[6].mxu1 %vm235_vm0, %v460_v55 }
 0x30b   : > { %v790_v56 = vpop.f32.mrb[0].mxu1 }
 0x30c   : > { %591 = vst.msk [vmem:[%s210_s26 + $0x8] sm:$0xff] %vm235_vm0, %v790_v56  ;;  %v551_v57 = vpop.f32.mrb[1].mxu1 }
 0x30d   : > { %590 = vst.msk [vmem:[%s210_s26] sm:$0xff] %vm235_vm0, %v551_v57 }
 0x30f   : > { %v793_v58 = vpop.f32.mrb[2].mxu1 }
 0x310   : > { %593 = vst.msk [vmem:[%s210_s26 + $0x18] sm:$0xff] %vm235_vm0, %v793_v58  ;;  %v561_v59 = vpop.f32.mrb[3].mxu1 }
 0x311   : > { %592 = vst.msk [vmem:[%s210_s26 + $0x10] sm:$0xff] %vm235_vm0, %v561_v59 }
 0x313   : > { %v796_v60 = vpop.f32.mrb[4].mxu1 }
 0x314   : > { %595 = vst.msk [vmem:[%s210_s26 + $0x28] sm:$0xff] %vm235_vm0, %v796_v60  ;;  %v571_v61 = vpop.f32.mrb[5].mxu1 }
 0x315   : > { %594 = vst.msk [vmem:[%s210_s26 + $0x20] sm:$0xff] %vm235_vm0, %v571_v61 }
 0x317   : > { %v799_v62 = vpop.f32.mrb[6].mxu1 }
 0x318   : > { %597 = vst.msk [vmem:[%s210_s26 + $0x38] sm:$0xff] %vm235_vm0, %v799_v62  ;;  %v581_v63 = vpop.f32.mrb[7].mxu1 }
 0x319   : > { %596 = vst.msk [vmem:[%s210_s26 + $0x30] sm:$0xff] %vm235_vm0, %v581_v63 }
 0x31a PF: > { %s13_s12 = sadd.s32 1, %s878_s12  }
 0x31b   : > { %p10_p4 = scmp.ge.s32.totalorder %s13_s12, 4  }
 0x31d   :  { %12 = sbr.rel (!%p10_p4) target bundleno = 1 (0x1), region = 68 }

// kernel: _apply_model.67
= control target key start
LH: loop header
LB: loop body
LE: loop exit
PB: predicated region body
PF: predicated region fallthrough
CT: control target
= control target key end

     0   :  { %s554_s18 = smov 0   ;;  %s632_s0 = inlined_call_operand.vmem [shape: f32[2,64,32], index: 0, kind: input, shape index: {}]   ;;  %s633_s1 = inlined_call_operand.vmem [shape: f32[2,1,32], index: 1, kind: input, shape index: {}]   ;;  %s634_s2 = inlined_call_operand.vmem [shape: f32[2,1,32], index: 2, kind: input, shape index: {}]   ;;  %s635_s3 = inlined_call_operand.vmem [shape: f32[1,32], index: 3, kind: input, shape index: {}]   ;;  %s636_s4 = inlined_call_operand.vmem [shape: f32[1,32], index: 4, kind: input, shape index: {}]   ;;  %s637_s5 = inlined_call_operand.vmem [shape: f32[2,64,32], index: 5, kind: output, shape index: {}]  }
   0x1 LB: > { %s459_s19 = sadd.s32 4294967295, %s522_s18   ;;  %p463_p0 = scmp.ge.s32.totalorder %s522_s18, 1  ;;  %s522_s18 = sphi %s554_s18, %s15_s18  }
   0x2   : > { %p203_p1 = scmp.lt.s32.totalorder %s522_s18, 3 }
   0x4   : > { %p204_p2 = pnand %p463_p0, %p203_p1 }
   0x5   : > { %p237_p3 = scmp.lt.s32.totalorder (!%p204_p2), %s459_s19, 1  ;;  %v470_v3 = vld [vmem:[%s635_s3] ss:$0 sm:$0xff] (!%p204_p2)  ;;  %vm377_vm0 = vcmask (!%p204_p2), 261120  }
   0x6   : > { %207 = sbr.rel (%p204_p2) target bundleno = 63 (0x3f), region = 40  ;;  %v471_v20 = vld [vmem:[%s636_s4] ss:$0 sm:$0xff] (!%p204_p2) }
   0xd   : > { %s639_s19 = smov (!%p237_p3, %s459_s19), 1 }
   0xe   : > { %s474_s20 = sshll.u32 %s639_s19, 6  ;;  %s244_s23 = scalar_lea.vmem %s633_s1, %s639_s19 }
   0xf   : > { %s241_s26 = scalar_lea.vmem %s632_s0, %s474_s20  ;;  %s247_s29 = scalar_lea.vmem %s634_s2, %s639_s19  ;;  %v468_v0 = vld [vmem:[%s244_s23] ss:$0 sm:$0xff] }
  0x10   : > { %v253_v1 = vld [vmem:[%s241_s26] sm:$0xff]  ;;  %v254_v4 = vld [vmem:[%s241_s26 + $0x8] sm:$0xff]  ;;  %v255_v7 = vld [vmem:[%s241_s26 + $0x10] sm:$0xff]  ;;  %s252_s11 = scalar_lea.vmem %s637_s5, %s474_s20 }
  0x11   : > { %v469_v2 = vld [vmem:[%s247_s29] ss:$0 sm:$0xff]  ;;  %v268_v5 = vsub.f32 %v253_v1, %v468_v0  ;;  %v269_v6 = vsub.f32 %v254_v4, %v468_v0  ;;  %v256_v8 = vld [vmem:[%s241_s26 + $0x18] sm:$0xff]  ;;  %v270_v10 = vsub.f32 %v255_v7, %v468_v0  ;;  %v258_v13 = vld [vmem:[%s241_s26 + $0x28] sm:$0xff] }
  0x12   : > { %v257_v9 = vld [vmem:[%s241_s26 + $0x20] sm:$0xff]  ;;  %v271_v11 = vsub.f32 %v256_v8, %v468_v0  ;;  %v259_v14 = vld [vmem:[%s241_s26 + $0x30] sm:$0xff]  ;;  %v260_v15 = vld [vmem:[%s241_s26 + $0x38] sm:$0xff]  ;;  %v273_v18 = vsub.f32 %v258_v13, %v468_v0 }
  0x13   : > { %v272_v12 = vsub.f32 %v257_v9, %v468_v0  ;;  %v283_v16 = vmul.f32 %v469_v2, %v268_v5  ;;  %v284_v17 = vmul.f32 %v469_v2, %v269_v6  ;;  %v274_v19 = vsub.f32 %v259_v14, %v468_v0 }
  0x14   : > { %v285_v21 = vmul.f32 %v469_v2, %v270_v10  ;;  %v286_v22 = vmul.f32 %v469_v2, %v271_v11  ;;  %v275_v24 = vsub.f32 %v260_v15, %v468_v0  ;;  %v288_v27 = vmul.f32 %v469_v2, %v273_v18 }
  0x15   : > { %v287_v23 = vmul.f32 %v469_v2, %v272_v12  ;;  %v298_v25 = vmul.f32 %v470_v3, %v283_v16  ;;  %v299_v26 = vmul.f32 %v470_v3, %v284_v17  ;;  %v289_v28 = vmul.f32 %v469_v2, %v274_v19 }
  0x16   : > { %v300_v29 = vmul.f32 %v470_v3, %v285_v21  ;;  %v301_v30 = vmul.f32 %v470_v3, %v286_v22  ;;  %v290_v32 = vmul.f32 %v469_v2, %v275_v24  ;;  %v303_v35 = vmul.f32 %v470_v3, %v288_v27 }
  0x17   : > { %v302_v31 = vmul.f32 %v470_v3, %v287_v23  ;;  %v584_v33 = vadd.f32 %v471_v20, %v298_v25  ;;  %v586_v34 = vadd.f32 %v471_v20, %v299_v26  ;;  %v304_v36 = vmul.f32 %v470_v3, %v289_v28 }
  0x18   : > { %v588_v37 = vadd.f32 %v471_v20, %v300_v29  ;;  %v590_v38 = vadd.f32 %v471_v20, %v301_v30  ;;  %v305_v40 = vmul.f32 %v470_v3, %v290_v32  ;;  %v596_v43 = vadd.f32 %v471_v20, %v303_v35 }
  0x19   : > { %v592_v39 = vadd.f32 %v471_v20, %v302_v31  ;;  %v321_v41 = vsub.f32 0.0, %v584_v33  ;;  %v322_v42 = vsub.f32 0.0, %v586_v34  ;;  %v598_v44 = vadd.f32 %v471_v20, %v304_v36 }
  0x1a   : > { %v323_v45 = vsub.f32 0.0, %v588_v37  ;;  %v324_v46 = vsub.f32 0.0, %v590_v38  ;;  %v603_v48 = vadd.f32 %v471_v20, %v305_v40  ;;  %v326_v51 = vsub.f32 0.0, %v596_v43 }
  0x1b   : > { %v325_v47 = vsub.f32 0.0, %v592_v39  ;;  %v329_v49 = vmul.f32 1.442695, %v321_v41  ;;  %v331_v50 = vmul.f32 1.442695, %v322_v42  ;;  %v327_v52 = vsub.f32 0.0, %v598_v44 }
  0x1c   : > { %v333_v53 = vmul.f32 1.442695, %v323_v45  ;;  %v335_v54 = vmul.f32 1.442695, %v324_v46  ;;  %v328_v56 = vsub.f32 0.0, %v603_v48 }
  0x1d   : > { %484 = vpow2.f32 %v329_v49  ;;  %v337_v55 = vmul.f32 1.442695, %v325_v47  ;;  %v339_v57 = vmul.f32 1.442695, %v326_v51  ;;  %v341_v58 = vmul.f32 1.442695, %v327_v52 }
  0x1e   : > { %486 = vpow2.f32 %v331_v50  ;;  %v343_v59 = vmul.f32 1.442695, %v328_v56 }
  0x1f   : > { %488 = vpow2.f32 %v333_v53 }
  0x20   : > { %490 = vpow2.f32 %v335_v54 }
  0x21   : > { %492 = vpow2.f32 %v337_v55 }
  0x22   : > { %494 = vpow2.f32 %v339_v57 }
  0x23   : > { %496 = vpow2.f32 %v341_v58 }
  0x24   : > { %498 = vpow2.f32 %v343_v59 }
  0x27   : > { %v485_v60 = vpop.eup %484 }
  0x28   : > { %v487_v61 = vpop.eup %486  ;;  %v345_v62 = vadd.f32 1.0, %v485_v60 }
  0x29   : > { %v489_v63 = vpop.eup %488  ;;  %v346_v0 = vadd.f32 1.0, %v487_v61 }
  0x2a   : > { %v491_v1 = vpop.eup %490  ;;  %500 = vrcp.f32 %v345_v62  ;;  %v347_v2 = vadd.f32 1.0, %v489_v63 }
  0x2b   : > { %v493_v3 = vpop.eup %492  ;;  %502 = vrcp.f32 %v346_v0  ;;  %v348_v4 = vadd.f32 1.0, %v491_v1 }
  0x2c   : > { %v495_v5 = vpop.eup %494  ;;  %504 = vrcp.f32 %v347_v2  ;;  %v349_v6 = vadd.f32 1.0, %v493_v3 }
  0x2d   : > { %v497_v7 = vpop.eup %496  ;;  %506 = vrcp.f32 %v348_v4  ;;  %v350_v8 = vadd.f32 1.0, %v495_v5 }
  0x2e   : > { %v499_v9 = vpop.eup %498  ;;  %508 = vrcp.f32 %v349_v6  ;;  %v351_v10 = vadd.f32 1.0, %v497_v7 }
  0x2f   : > { %510 = vrcp.f32 %v350_v8  ;;  %v352_v11 = vadd.f32 1.0, %v499_v9 }
  0x30   : > { %512 = vrcp.f32 %v351_v10 }
  0x31   : > { %514 = vrcp.f32 %v352_v11 }
  0x34   : > { %v501_v12 = vpop.eup %500 }
  0x35   : > { %v503_v13 = vpop.eup %502  ;;  %v369_v14 = vmul.f32 %v501_v12, %v584_v33 }
  0x36   : > { %v505_v15 = vpop.eup %504  ;;  %v370_v16 = vmul.f32 %v503_v13, %v586_v34 }
  0x37   : > { %v507_v17 = vpop.eup %506  ;;  %378 = vst.msk [vmem:[%s252_s11] sm:$0xff] %vm377_vm0, %v369_v14  ;;  %v371_v18 = vmul.f32 %v505_v15, %v588_v37 }
  0x38   : > { %v509_v19 = vpop.eup %508  ;;  %379 = vst.msk [vmem:[%s252_s11 + $0x8] sm:$0xff] %vm377_vm0, %v370_v16  ;;  %v372_v20 = vmul.f32 %v507_v17, %v590_v38 }
  0x39   : > { %v511_v21 = vpop.eup %510  ;;  %380 = vst.msk [vmem:[%s252_s11 + $0x10] sm:$0xff] %vm377_vm0, %v371_v18  ;;  %v373_v22 = vmul.f32 %v509_v19, %v592_v39 }
  0x3a   : > { %v513_v23 = vpop.eup %512  ;;  %381 = vst.msk [vmem:[%s252_s11 + $0x18] sm:$0xff] %vm377_vm0, %v372_v20  ;;  %v374_v24 = vmul.f32 %v511_v21, %v596_v43 }
  0x3b   : > { %v515_v25 = vpop.eup %514  ;;  %382 = vst.msk [vmem:[%s252_s11 + $0x20] sm:$0xff] %vm377_vm0, %v373_v22  ;;  %v375_v26 = vmul.f32 %v513_v23, %v598_v44 }
  0x3c   : > { %383 = vst.msk [vmem:[%s252_s11 + $0x28] sm:$0xff] %vm377_vm0, %v374_v24  ;;  %v376_v27 = vmul.f32 %v515_v25, %v603_v48 }
  0x3d   : > { %384 = vst.msk [vmem:[%s252_s11 + $0x30] sm:$0xff] %vm377_vm0, %v375_v26 }
  0x3e   : > { %385 = vst.msk [vmem:[%s252_s11 + $0x38] sm:$0xff] %vm377_vm0, %v376_v27 }
  0x3f PF: > { %s15_s18 = sadd.s32 1, %s522_s18  }
  0x40   : > { %p12_p4 = scmp.ge.s32.totalorder %s15_s18, 4  }
  0x42   :  { %14 = sbr.rel (!%p12_p4) target bundleno = 1 (0x1), region = 76 }

// kernel: _apply_model.68
= control target key start
LH: loop header
LB: loop body
LE: loop exit
PB: predicated region body
PF: predicated region fallthrough
CT: control target
= control target key end

     0   :  { %s1140_s1 = inlined_call_operand.vmem [shape: f32[384,128], index: 1, kind: input, shape index: {}]   ;;  %s1141_s0 = inlined_call_operand.vmem [shape: f32[128,384], index: 0, kind: input, shape index: {}]   ;;  %s1142_s2 = inlined_call_operand.vmem [shape: f32[1,128], index: 2, kind: input, shape index: {}]   ;;  %s1143_s3 = inlined_call_operand.vmem [shape: f32[128,128], index: 3, kind: output, shape index: {}]  }
   0x1   :  { %v114_v0 = vld [vmem:[%s1140_s1 + $0x80] sm:$0xff]  ;;  %v115_v1 = vld [vmem:[%s1140_s1 + $0x88] sm:$0xff]  ;;  %v116_v9 = vld [vmem:[%s1140_s1 + $0x90] sm:$0xff] }
   0x2   :  { %v98_v2 = vld [vmem:[%s1140_s1] sm:$0xff]  ;;  %v699_v3 = vpack.c.bf16 %v115_v1, %v114_v0  ;;  %v99_v4 = vld [vmem:[%s1140_s1 + $0x8] sm:$0xff]  ;;  %v117_v10 = vld [vmem:[%s1140_s1 + $0x98] sm:$0xff] }
   0x3   :  { %v130_v5 = vld [vmem:[%s1140_s1 + $0x100] sm:$0xff]  ;;  %v131_v6 = vld [vmem:[%s1140_s1 + $0x108] sm:$0xff]  ;;  %v701_v7 = vpack.c.bf16 %v99_v4, %v98_v2  ;;  %v100_v11 = vld [vmem:[%s1140_s1 + $0x10] sm:$0xff]  ;;  %v703_v12 = vpack.c.bf16 %v117_v10, %v116_v9 }
   0x4   :  { %v731_v8 = vpack.c.bf16 %v131_v6, %v130_v5  ;;  %700 = vmatprep.subr.bf16.mxu0 %v699_v3  ;;  %v101_v13 = vld [vmem:[%s1140_s1 + $0x18] sm:$0xff]  ;;  %v132_v14 = vld [vmem:[%s1140_s1 + $0x110] sm:$0xff]  ;;  %v118_v18 = vld [vmem:[%s1140_s1 + $0xa0] sm:$0xff] }
   0x5   :  { %v133_v15 = vld [vmem:[%s1140_s1 + $0x118] sm:$0xff]  ;;  %702 = vmatpush3.bf16.msra.mxu0 %v701_v7  ;;  %v705_v16 = vpack.c.bf16 %v101_v13, %v100_v11  ;;  %v119_v19 = vld [vmem:[%s1140_s1 + $0xa8] sm:$0xff]  ;;  %v102_v20 = vld [vmem:[%s1140_s1 + $0x20] sm:$0xff] }
   0x6   :  { %732 = vmatprep.subr.bf16.mxu1 %v731_v8  ;;  %v735_v17 = vpack.c.bf16 %v133_v15, %v132_v14  ;;  %704 = vmatprep.subr.bf16.mxu0 %v703_v12  ;;  %v707_v21 = vpack.c.bf16 %v119_v19, %v118_v18  ;;  %v103_v22 = vld [vmem:[%s1140_s1 + $0x28] sm:$0xff]  ;;  %v134_v23 = vld [vmem:[%s1140_s1 + $0x120] sm:$0xff]  ;;  %v120_v26 = vld [vmem:[%s1140_s1 + $0xb0] sm:$0xff] }
   0x7   :  { %734 = vmatpush3.bf16.msra.mxu1 %v731_v8  ;;  %v135_v24 = vld [vmem:[%s1140_s1 + $0x128] sm:$0xff]  ;;  %v121_v27 = vld [vmem:[%s1140_s1 + $0xb8] sm:$0xff]  ;;  %v136_v28 = vld [vmem:[%s1140_s1 + $0x130] sm:$0xff]  ;;  %v709_v30 = vpack.c.bf16 %v103_v22, %v102_v20 }
   0x8   :  { %736 = vmatprep.subr.bf16.mxu1 %v735_v17  ;;  %v739_v25 = vpack.c.bf16 %v135_v24, %v134_v23  ;;  %v137_v29 = vld [vmem:[%s1140_s1 + $0x138] sm:$0xff]  ;;  %v711_v31 = vpack.c.bf16 %v121_v27, %v120_v26  ;;  %v104_v32 = vld [vmem:[%s1140_s1 + $0x30] sm:$0xff]  ;;  %v122_v35 = vld [vmem:[%s1140_s1 + $0xc0] sm:$0xff] }
   0x9   :  { %706 = vmatpush3.bf16.msra.mxu0 %v705_v16  ;;  %v105_v33 = vld [vmem:[%s1140_s1 + $0x38] sm:$0xff]  ;;  %v743_v34 = vpack.c.bf16 %v137_v29, %v136_v28  ;;  %v123_v36 = vld [vmem:[%s1140_s1 + $0xc8] sm:$0xff]  ;;  %v138_v37 = vld [vmem:[%s1140_s1 + $0x140] sm:$0xff] }
   0xa   :  { %708 = vmatprep.subr.bf16.mxu0 %v707_v21  ;;  %v139_v38 = vld [vmem:[%s1140_s1 + $0x148] sm:$0xff]  ;;  %v713_v39 = vpack.c.bf16 %v105_v33, %v104_v32  ;;  %v715_v40 = vpack.c.bf16 %v123_v36, %v122_v35  ;;  %v106_v41 = vld [vmem:[%s1140_s1 + $0x40] sm:$0xff]  ;;  %v124_v44 = vld [vmem:[%s1140_s1 + $0xd0] sm:$0xff] }
   0xb   :  { %738 = vmatpush3.bf16.msra.mxu1 %v735_v17  ;;  %v107_v42 = vld [vmem:[%s1140_s1 + $0x48] sm:$0xff]  ;;  %v747_v43 = vpack.c.bf16 %v139_v38, %v138_v37  ;;  %v125_v45 = vld [vmem:[%s1140_s1 + $0xd8] sm:$0xff]  ;;  %v140_v46 = vld [vmem:[%s1140_s1 + $0x150] sm:$0xff] }
   0xc   :  { %740 = vmatprep.subr.bf16.mxu1 %v739_v25  ;;  %v141_v47 = vld [vmem:[%s1140_s1 + $0x158] sm:$0xff]  ;;  %v717_v48 = vpack.c.bf16 %v107_v42, %v106_v41  ;;  %v51_v49 = vld [vmem:[%s1141_s0 + $0x8] sm:$0xff]  ;;  %v52_v50 = vld [vmem:[%s1141_s0 + $0x10] sm:$0xff]  ;;  %v719_v51 = vpack.c.bf16 %v125_v45, %v124_v44 }
   0xd   :  { %710 = vmatpush3.bf16.msra.mxu0 %v709_v30  ;;  %v108_v52 = vld [vmem:[%s1140_s1 + $0x50] sm:$0xff]  ;;  %v109_v53 = vld [vmem:[%s1140_s1 + $0x58] sm:$0xff]  ;;  %v751_v54 = vpack.c.bf16 %v141_v47, %v140_v46  ;;  %v126_v55 = vld [vmem:[%s1140_s1 + $0xe0] sm:$0xff]  ;;  %210 = vmatprep.mubr.f32.mxu0 %v51_v49 }
   0xe   :  { %712 = vmatprep.subr.bf16.mxu0 %v711_v31  ;;  %v127_v56 = vld [vmem:[%s1140_s1 + $0xe8] sm:$0xff]  ;;  %v142_v57 = vld [vmem:[%s1140_s1 + $0x160] sm:$0xff]  ;;  %675 = vmatprep.mubr.f32.mxu1 %v52_v50  ;;  %v721_v59 = vpack.c.bf16 %v109_v53, %v108_v52  ;;  %v128_v0 = vld [vmem:[%s1140_s1 + $0xf0] sm:$0xff] }
   0xf   :  { %742 = vmatpush3.bf16.msra.mxu1 %v739_v25  ;;  %v143_v58 = vld [vmem:[%s1140_s1 + $0x168] sm:$0xff]  ;;  %v723_v60 = vpack.c.bf16 %v127_v56, %v126_v55  ;;  %v110_v61 = vld [vmem:[%s1140_s1 + $0x60] sm:$0xff]  ;;  %v129_v1 = vld [vmem:[%s1140_s1 + $0xf8] sm:$0xff] }
  0x10   :  { %744 = vmatprep.subr.bf16.mxu1 %v743_v34  ;;  %v111_v62 = vld [vmem:[%s1140_s1 + $0x68] sm:$0xff]  ;;  %v755_v63 = vpack.c.bf16 %v143_v58, %v142_v57  ;;  %v144_v2 = vld [vmem:[%s1140_s1 + $0x170] sm:$0xff]  ;;  %v145_v3 = vld [vmem:[%s1140_s1 + $0x178] sm:$0xff]  ;;  %v727_v5 = vpack.c.bf16 %v129_v1, %v128_v0 }
  0x11   :  { %714 = vmatpush3.bf16.msra.mxu0 %v713_v39  ;;  %v725_v4 = vpack.c.bf16 %v111_v62, %v110_v61  ;;  %v112_v6 = vld [vmem:[%s1140_s1 + $0x70] sm:$0xff]  ;;  %v113_v7 = vld [vmem:[%s1140_s1 + $0x78] sm:$0xff]  ;;  %v759_v8 = vpack.c.bf16 %v145_v3, %v144_v2  ;;  %v50_v10 = vld [vmem:[%s1141_s0] sm:$0xff] }
  0x12   :  { %716 = vmatprep.subr.bf16.mxu0 %v715_v40  ;;  %v729_v9 = vpack.c.bf16 %v113_v7, %v112_v6  ;;  %v55_v11 = vld [vmem:[%s1141_s0 + $0x28] sm:$0xff]  ;;  %v54_v12 = vld [vmem:[%s1141_s0 + $0x20] sm:$0xff]  ;;  %v53_v14 = vld [vmem:[%s1141_s0 + $0x18] sm:$0xff] }
  0x13   :  { %746 = vmatpush3.bf16.msra.mxu1 %v743_v34  ;;  %v58_v13 = vld [vmem:[%s1141_s0 + $0x40] sm:$0xff]  ;;  %v57_v15 = vld [vmem:[%s1141_s0 + $0x38] sm:$0xff]  ;;  %v64_v17 = vld [vmem:[%s1141_s0 + $0x70] sm:$0xff] }
  0x14   :  { %748 = vmatprep.subr.bf16.mxu1 %v747_v43  ;;  %v61_v16 = vld [vmem:[%s1141_s0 + $0x58] sm:$0xff]  ;;  %v56_v18 = vld [vmem:[%s1141_s0 + $0x30] sm:$0xff]  ;;  %v67_v20 = vld [vmem:[%s1141_s0 + $0x88] sm:$0xff] }
  0x15   :  { %718 = vmatpush3.bf16.msra.mxu0 %v717_v48  ;;  %v60_v19 = vld [vmem:[%s1141_s0 + $0x50] sm:$0xff]  ;;  %v70_v21 = vld [vmem:[%s1141_s0 + $0xa0] sm:$0xff]  ;;  %v59_v22 = vld [vmem:[%s1141_s0 + $0x48] sm:$0xff] }
  0x16   :  { %720 = vmatprep.subr.bf16.mxu0 %v719_v51  ;;  %v63_v23 = vld [vmem:[%s1141_s0 + $0x68] sm:$0xff]  ;;  %v73_v24 = vld [vmem:[%s1141_s0 + $0xb8] sm:$0xff]  ;;  %v76_v25 = vld [vmem:[%s1141_s0 + $0xd0] sm:$0xff] }
  0x17   :  { %750 = vmatpush3.bf16.msra.mxu1 %v747_v43  ;;  %v62_v26 = vld [vmem:[%s1141_s0 + $0x60] sm:$0xff]  ;;  %v79_v28 = vld [vmem:[%s1141_s0 + $0xe8] sm:$0xff]  ;;  %v65_v30 = vld [vmem:[%s1141_s0 + $0x78] sm:$0xff] }
  0x18   :  { %752 = vmatprep.subr.bf16.mxu1 %v751_v54  ;;  %v66_v27 = vld [vmem:[%s1141_s0 + $0x80] sm:$0xff]  ;;  %v69_v31 = vld [vmem:[%s1141_s0 + $0x98] sm:$0xff]  ;;  %v88_v33 = vld [vmem:[%s1141_s0 + $0x130] sm:$0xff] }
  0x19   :  { %722 = vmatpush3.bf16.msra.mxu0 %v721_v59  ;;  %v82_v29 = vld [vmem:[%s1141_s0 + $0x100] sm:$0xff]  ;;  %v85_v32 = vld [vmem:[%s1141_s0 + $0x118] sm:$0xff]  ;;  %v68_v34 = vld [vmem:[%s1141_s0 + $0x90] sm:$0xff] }
  0x1a   :  { %724 = vmatprep.subr.bf16.mxu0 %v723_v60  ;;  %v72_v35 = vld [vmem:[%s1141_s0 + $0xb0] sm:$0xff]  ;;  %v91_v36 = vld [vmem:[%s1141_s0 + $0x148] sm:$0xff]  ;;  %v94_v37 = vld [vmem:[%s1141_s0 + $0x160] sm:$0xff] }
  0x1b   :  { %754 = vmatpush3.bf16.msra.mxu1 %v751_v54  ;;  %v71_v38 = vld [vmem:[%s1141_s0 + $0xa8] sm:$0xff]  ;;  %v97_v40 = vld [vmem:[%s1141_s0 + $0x178] sm:$0xff]  ;;  %v74_v41 = vld [vmem:[%s1141_s0 + $0xc0] sm:$0xff] }
  0x1c   :  { %756 = vmatprep.subr.bf16.mxu1 %v755_v63  ;;  %v75_v39 = vld [vmem:[%s1141_s0 + $0xc8] sm:$0xff]  ;;  %v78_v42 = vld [vmem:[%s1141_s0 + $0xe0] sm:$0xff]  ;;  %v77_v43 = vld [vmem:[%s1141_s0 + $0xd8] sm:$0xff] }
  0x1d   :  { %726 = vmatpush3.bf16.msra.mxu0 %v725_v4  ;;  %v81_v44 = vld [vmem:[%s1141_s0 + $0xf8] sm:$0xff]  ;;  %v80_v45 = vld [vmem:[%s1141_s0 + $0xf0] sm:$0xff]  ;;  %v83_v47 = vld [vmem:[%s1141_s0 + $0x108] sm:$0xff] }
  0x1e   :  { %728 = vmatprep.subr.bf16.mxu0 %v727_v5  ;;  %v84_v46 = vld [vmem:[%s1141_s0 + $0x110] sm:$0xff]  ;;  %v87_v48 = vld [vmem:[%s1141_s0 + $0x128] sm:$0xff]  ;;  %v86_v49 = vld [vmem:[%s1141_s0 + $0x120] sm:$0xff] }
  0x1f   :  { %758 = vmatpush3.bf16.msra.mxu1 %v755_v63  ;;  %v90_v50 = vld [vmem:[%s1141_s0 + $0x140] sm:$0xff]  ;;  %v89_v51 = vld [vmem:[%s1141_s0 + $0x138] sm:$0xff]  ;;  %v92_v53 = vld [vmem:[%s1141_s0 + $0x150] sm:$0xff] }
  0x20   :  { %760 = vmatprep.subr.bf16.mxu1 %v759_v8  ;;  %v93_v52 = vld [vmem:[%s1141_s0 + $0x158] sm:$0xff]  ;;  %v96_v54 = vld [vmem:[%s1141_s0 + $0x170] sm:$0xff]  ;;  %v95_v55 = vld [vmem:[%s1141_s0 + $0x168] sm:$0xff] }
  0x21   :  { %730 = vmatpush3.bf16.msra.mxu0 %v729_v9  ;;  %v1074_v61 = vld [vmem:[%s1142_s2] ss:$0 sm:$0xff] }
  0x23   :  { %762 = vmatpush3.bf16.msra.mxu1 %v759_v8 }
  0x24   :  { %211 = vmatmul.mubr.f32.vlgmr.msra.gmra.mrb[0].mxu0 %v50_v10 }
  0x25   :  { %215 = vmatprep.mubr.f32.mxu0 %v54_v12 }
  0x26   :  { %676 = vmatmul.mubr.f32.vlgmr.msra.gmra.mrb[0].mxu1 %v55_v11 }
  0x27   :  { %678 = vmatprep.mubr.f32.mxu1 %v58_v13 }
  0x28   :  { %216 = vmatmul.mubr.f32.gmra.mrb[2].mxu0 %v53_v14 }
  0x29   :  { %220 = vmatprep.mubr.f32.mxu0 %v57_v15 }
  0x2a   :  { %679 = vmatmul.mubr.f32.gmra.mrb[2].mxu1 %v61_v16 }
  0x2b   :  { %681 = vmatprep.mubr.f32.mxu1 %v64_v17 }
  0x2c   :  { %221 = vmatmul.mubr.f32.gmra.mrb[4].mxu0 %v56_v18 }
  0x2d   :  { %225 = vmatprep.mubr.f32.mxu0 %v60_v19 }
  0x2e   :  { %682 = vmatmul.mubr.f32.gmra.mrb[4].mxu1 %v67_v20 }
  0x2f   :  { %684 = vmatprep.mubr.f32.mxu1 %v70_v21 }
  0x30   :  { %226 = vmatmul.mubr.f32.gmra.mrb[6].mxu0 %v59_v22 }
  0x31   :  { %230 = vmatprep.mubr.f32.mxu0 %v63_v23 }
  0x32   :  { %685 = vmatmul.mubr.f32.gmra.mrb[6].mxu1 %v73_v24 }
  0x33   :  { %687 = vmatprep.mubr.f32.mxu1 %v76_v25 }
  0x34   :  { %231 = vmatmul.mubr.f32.gmra.mrb[8].mxu0 %v62_v26 }
  0x35   :  { %235 = vmatprep.mubr.f32.mxu0 %v66_v27 }
  0x36   :  { %688 = vmatmul.mubr.f32.gmra.mrb[8].mxu1 %v79_v28 }
  0x37   :  { %690 = vmatprep.mubr.f32.mxu1 %v82_v29 }
  0x38   :  { %236 = vmatmul.mubr.f32.gmra.mrb[10].mxu0 %v65_v30 }
  0x39   :  { %240 = vmatprep.mubr.f32.mxu0 %v69_v31 }
  0x3a   :  { %691 = vmatmul.mubr.f32.gmra.mrb[10].mxu1 %v85_v32 }
  0x3b   :  { %693 = vmatprep.mubr.f32.mxu1 %v88_v33 }
  0x3c   :  { %241 = vmatmul.mubr.f32.gmra.mrb[12].mxu0 %v68_v34 }
  0x3d   :  { %245 = vmatprep.mubr.f32.mxu0 %v72_v35 }
  0x3e   :  { %694 = vmatmul.mubr.f32.gmra.mrb[12].mxu1 %v91_v36 }
  0x3f   :  { %696 = vmatprep.mubr.f32.mxu1 %v94_v37 }
  0x40   :  { %246 = vmatmul.mubr.f32.gmra.mrb[14].mxu0 %v71_v38 }
  0x41   :  { %250 = vmatprep.mubr.f32.mxu0 %v75_v39 }
  0x42   :  { %697 = vmatmul.mubr.f32.gmra.mrb[14].mxu1 %v97_v40 }
  0x44   :  { %251 = vmatmul.mubr.f32.gmra.mrb[16].mxu0 %v74_v41 }
  0x45   :  { %255 = vmatprep.mubr.f32.mxu0 %v78_v42 }
  0x48   :  { %256 = vmatmul.mubr.f32.gmra.mrb[18].mxu0 %v77_v43 }
  0x49   :  { %260 = vmatprep.mubr.f32.mxu0 %v81_v44 }
  0x4c   :  { %261 = vmatmul.mubr.f32.gmra.mrb[20].mxu0 %v80_v45 }
  0x4d   :  { %265 = vmatprep.mubr.f32.mxu0 %v84_v46 }
  0x50   :  { %266 = vmatmul.mubr.f32.gmra.mrb[22].mxu0 %v83_v47 }
  0x51   :  { %270 = vmatprep.mubr.f32.mxu0 %v87_v48 }
  0x54   :  { %271 = vmatmul.mubr.f32.gmra.mrb[24].mxu0 %v86_v49 }
  0x55   :  { %275 = vmatprep.mubr.f32.mxu0 %v90_v50 }
  0x58   :  { %276 = vmatmul.mubr.f32.gmra.mrb[26].mxu0 %v89_v51 }
  0x59   :  { %280 = vmatprep.mubr.f32.mxu0 %v93_v52 }
  0x5c   :  { %281 = vmatmul.mubr.f32.gmra.mrb[28].mxu0 %v92_v53 }
  0x5d   :  { %285 = vmatprep.mubr.f32.mxu0 %v96_v54 }
  0x60   :  { %286 = vmatmul.mubr.f32.gmra.mrb[30].mxu0 %v95_v55 }
  0xf7   :  { %v563_v56 = vpop.f32.mrb[0].mxu0 }
  0xf8   :  { %v564_v57 = vpop.f32.mrb[1].mxu0 }
  0xf9   :  { %v677_v58 = vpop.f32.mrb[0].mxu1  ;;  %v565_v59 = vadd.f32 %v564_v57, %v563_v56 }
  0xfa   :  { %v357_v60 = vpop.f32.mrb[1].mxu1 }
  0xfb   :  { %v358_v62 = vadd.f32 %v565_v59, %v357_v60  ;;  %v566_v63 = vpop.f32.mrb[2].mxu0 }
  0xfc   :  { %v567_v0 = vpop.f32.mrb[3].mxu0 }
  0xfd   :  { %v680_v1 = vpop.f32.mrb[2].mxu1  ;;  %v494_v2 = vadd.f32 %v1074_v61, %v358_v62  ;;  %v568_v3 = vadd.f32 %v567_v0, %v566_v63 }
  0xfe   :  { %v367_v4 = vpop.f32.mrb[3].mxu1 }
  0xff   :  { %510 = vst [vmem:[%s1143_s3] sm:$0xff] %v494_v2  ;;  %v363_v5 = vadd.f32 %v677_v58, %v568_v3  ;;  %v569_v6 = vpop.f32.mrb[4].mxu0 }
 0x100   :  { %v570_v7 = vpop.f32.mrb[5].mxu0 }
 0x101   :  { %v683_v8 = vpop.f32.mrb[4].mxu1  ;;  %v495_v9 = vadd.f32 %v1074_v61, %v363_v5  ;;  %v571_v10 = vadd.f32 %v570_v7, %v569_v6 }
 0x102   :  { %v377_v11 = vpop.f32.mrb[5].mxu1 }
 0x103   :  { %511 = vst [vmem:[%s1143_s3 + $0x8] sm:$0xff] %v495_v9  ;;  %v368_v12 = vadd.f32 %v571_v10, %v367_v4  ;;  %v572_v13 = vpop.f32.mrb[6].mxu0 }
 0x104   :  { %v573_v14 = vpop.f32.mrb[7].mxu0 }
 0x105   :  { %v686_v15 = vpop.f32.mrb[6].mxu1  ;;  %v496_v16 = vadd.f32 %v1074_v61, %v368_v12  ;;  %v574_v17 = vadd.f32 %v573_v14, %v572_v13 }
 0x106   :  { %v387_v18 = vpop.f32.mrb[7].mxu1 }
 0x107   :  { %512 = vst [vmem:[%s1143_s3 + $0x10] sm:$0xff] %v496_v16  ;;  %v373_v19 = vadd.f32 %v680_v1, %v574_v17  ;;  %v575_v20 = vpop.f32.mrb[8].mxu0 }
 0x108   :  { %v576_v21 = vpop.f32.mrb[9].mxu0 }
 0x109   :  { %v689_v22 = vpop.f32.mrb[8].mxu1  ;;  %v497_v23 = vadd.f32 %v1074_v61, %v373_v19  ;;  %v577_v24 = vadd.f32 %v576_v21, %v575_v20 }
 0x10a   :  { %v397_v25 = vpop.f32.mrb[9].mxu1 }
 0x10b   :  { %513 = vst [vmem:[%s1143_s3 + $0x18] sm:$0xff] %v497_v23  ;;  %v378_v26 = vadd.f32 %v577_v24, %v377_v11  ;;  %v578_v27 = vpop.f32.mrb[10].mxu0 }
 0x10c   :  { %v579_v28 = vpop.f32.mrb[11].mxu0 }
 0x10d   :  { %v692_v29 = vpop.f32.mrb[10].mxu1  ;;  %v498_v30 = vadd.f32 %v1074_v61, %v378_v26  ;;  %v580_v31 = vadd.f32 %v579_v28, %v578_v27 }
 0x10e   :  { %v407_v32 = vpop.f32.mrb[11].mxu1 }
 0x10f   :  { %514 = vst [vmem:[%s1143_s3 + $0x20] sm:$0xff] %v498_v30  ;;  %v383_v33 = vadd.f32 %v683_v8, %v580_v31  ;;  %v581_v34 = vpop.f32.mrb[12].mxu0 }
 0x110   :  { %v582_v35 = vpop.f32.mrb[13].mxu0 }
 0x111   :  { %v695_v36 = vpop.f32.mrb[12].mxu1  ;;  %v499_v37 = vadd.f32 %v1074_v61, %v383_v33  ;;  %v583_v38 = vadd.f32 %v582_v35, %v581_v34 }
 0x112   :  { %v417_v39 = vpop.f32.mrb[13].mxu1 }
 0x113   :  { %515 = vst [vmem:[%s1143_s3 + $0x28] sm:$0xff] %v499_v37  ;;  %v388_v40 = vadd.f32 %v583_v38, %v387_v18  ;;  %v584_v41 = vpop.f32.mrb[14].mxu0 }
 0x114   :  { %v585_v42 = vpop.f32.mrb[15].mxu0 }
 0x115   :  { %v698_v43 = vpop.f32.mrb[14].mxu1  ;;  %v500_v44 = vadd.f32 %v1074_v61, %v388_v40  ;;  %v586_v45 = vadd.f32 %v585_v42, %v584_v41 }
 0x116   :  { %v427_v46 = vpop.f32.mrb[15].mxu1 }
 0x117   :  { %516 = vst [vmem:[%s1143_s3 + $0x30] sm:$0xff] %v500_v44  ;;  %v393_v47 = vadd.f32 %v686_v15, %v586_v45  ;;  %v587_v48 = vpop.f32.mrb[16].mxu0 }
 0x118   :  { %v588_v49 = vpop.f32.mrb[17].mxu0 }
 0x119   :  { %v501_v50 = vadd.f32 %v1074_v61, %v393_v47  ;;  %v589_v51 = vadd.f32 %v588_v49, %v587_v48 }
 0x11b   :  { %517 = vst [vmem:[%s1143_s3 + $0x38] sm:$0xff] %v501_v50  ;;  %v398_v52 = vadd.f32 %v589_v51, %v397_v25  ;;  %v590_v53 = vpop.f32.mrb[18].mxu0 }
 0x11c   :  { %v591_v54 = vpop.f32.mrb[19].mxu0 }
 0x11d   :  { %v502_v55 = vadd.f32 %v1074_v61, %v398_v52  ;;  %v592_v56 = vadd.f32 %v591_v54, %v590_v53 }
 0x11f   :  { %518 = vst [vmem:[%s1143_s3 + $0x40] sm:$0xff] %v502_v55  ;;  %v403_v57 = vadd.f32 %v689_v22, %v592_v56  ;;  %v593_v58 = vpop.f32.mrb[20].mxu0 }
 0x120   :  { %v594_v59 = vpop.f32.mrb[21].mxu0 }
 0x121   :  { %v503_v60 = vadd.f32 %v1074_v61, %v403_v57  ;;  %v595_v62 = vadd.f32 %v594_v59, %v593_v58 }
 0x123   :  { %519 = vst [vmem:[%s1143_s3 + $0x48] sm:$0xff] %v503_v60  ;;  %v408_v63 = vadd.f32 %v595_v62, %v407_v32  ;;  %v596_v0 = vpop.f32.mrb[22].mxu0 }
 0x124   :  { %v597_v1 = vpop.f32.mrb[23].mxu0 }
 0x125   :  { %v504_v2 = vadd.f32 %v1074_v61, %v408_v63  ;;  %v598_v3 = vadd.f32 %v597_v1, %v596_v0 }
 0x127   :  { %520 = vst [vmem:[%s1143_s3 + $0x50] sm:$0xff] %v504_v2  ;;  %v413_v4 = vadd.f32 %v692_v29, %v598_v3  ;;  %v599_v5 = vpop.f32.mrb[24].mxu0 }
 0x128   :  { %v600_v6 = vpop.f32.mrb[25].mxu0 }
 0x129   :  { %v505_v7 = vadd.f32 %v1074_v61, %v413_v4  ;;  %v601_v8 = vadd.f32 %v600_v6, %v599_v5 }
 0x12b   :  { %521 = vst [vmem:[%s1143_s3 + $0x58] sm:$0xff] %v505_v7  ;;  %v418_v9 = vadd.f32 %v601_v8, %v417_v39  ;;  %v602_v10 = vpop.f32.mrb[26].mxu0 }
 0x12c   :  { %v603_v11 = vpop.f32.mrb[27].mxu0 }
 0x12d   :  { %v506_v12 = vadd.f32 %v1074_v61, %v418_v9  ;;  %v604_v13 = vadd.f32 %v603_v11, %v602_v10 }
 0x12f   :  { %522 = vst [vmem:[%s1143_s3 + $0x60] sm:$0xff] %v506_v12  ;;  %v423_v14 = vadd.f32 %v695_v36, %v604_v13  ;;  %v605_v15 = vpop.f32.mrb[28].mxu0 }
 0x130   :  { %v606_v16 = vpop.f32.mrb[29].mxu0 }
 0x131   :  { %v507_v17 = vadd.f32 %v1074_v61, %v423_v14  ;;  %v607_v18 = vadd.f32 %v606_v16, %v605_v15 }
 0x133   :  { %523 = vst [vmem:[%s1143_s3 + $0x68] sm:$0xff] %v507_v17  ;;  %v428_v19 = vadd.f32 %v607_v18, %v427_v46  ;;  %v608_v20 = vpop.f32.mrb[30].mxu0 }
 0x134   :  { %v609_v21 = vpop.f32.mrb[31].mxu0 }
 0x135   :  { %v508_v22 = vadd.f32 %v1074_v61, %v428_v19  ;;  %v610_v23 = vadd.f32 %v609_v21, %v608_v20 }
 0x137   :  { %524 = vst [vmem:[%s1143_s3 + $0x70] sm:$0xff] %v508_v22  ;;  %v433_v24 = vadd.f32 %v698_v43, %v610_v23 }
 0x139   :  { %v509_v25 = vadd.f32 %v1074_v61, %v433_v24 }
 0x13b   :  { %525 = vst [vmem:[%s1143_s3 + $0x78] sm:$0xff] %v509_v25 }

// kernel: _apply_model.71
= control target key start
LH: loop header
LB: loop body
LE: loop exit
PB: predicated region body
PF: predicated region fallthrough
CT: control target
= control target key end

     0   :  { %s411_s6 = smov 0   ;;  %s532_s0 = inlined_call_operand.vmem [shape: f32[2,256,32], index: 0, kind: input, shape index: {}]   ;;  %s533_s1 = inlined_call_operand.vmem [shape: f32[2,2,32], index: 1, kind: output, shape index: {}]  }
   0x1 LB: > { %s374_s7 = sadd.s32 4294967295, %s399_s6   ;;  %p378_p0 = scmp.ge.s32.totalorder %s399_s6, 1  ;;  %s399_s6 = sphi %s411_s6, %s11_s6  }
   0x2   : > { %p87_p1 = scmp.lt.s32.totalorder %s399_s6, 3 }
   0x4   : > { %p88_p2 = pnand %p378_p0, %p87_p1 }
   0x5   : > { %p106_p3 = scmp.lt.s32.totalorder (!%p88_p2), %s374_s7, 1  ;;  %vm147_vm0 = vcmask (!%p88_p2), 261120   ;;  %vm217_vm1 = vcmask (!%p88_p2), 253952  }
   0x6   : > { %91 = sbr.rel (%p88_p2) target bundleno = 98 (0x62), region = 24 }
   0xd   : > { %s535_s7 = smov (!%p106_p3, %s374_s7), 1 }
   0xe   : > { %s384_s8 = sshll.u32 %s535_s7, 8  ;;  %s381_s12 = sshll.u32 %s535_s7, 1 }
   0xf   : > { %s425_s11 = scalar_lea.vmem %s532_s0, %s384_s8  ;;  %s114_s15 = scalar_lea.vmem %s533_s1, %s381_s12 }
  0x10   : > { %v115_v0 = vld [vmem:[%s425_s11] sm:$0xff]  ;;  %v116_v1 = vld [vmem:[%s425_s11 + $0x8] sm:$0xff]  ;;  %v117_v2 = vld [vmem:[%s425_s11 + $0x10] sm:$0xff] }
  0x11   : > { %v148_v3 = vsel %vm147_vm0, %v115_v0, 0.0  ;;  %v149_v4 = vsel %vm147_vm0, %v116_v1, 0.0  ;;  %v151_v5 = vsel %vm147_vm0, %v117_v2, 0.0  ;;  %v118_v6 = vld [vmem:[%s425_s11 + $0x18] sm:$0xff]  ;;  %v119_v9 = vld [vmem:[%s425_s11 + $0x20] sm:$0xff]  ;;  %v120_v12 = vld [vmem:[%s425_s11 + $0x28] sm:$0xff]  ;;  %v219_v27 = vmul.f32 %v115_v0, %v115_v0 }
  0x12   : > { %v150_v7 = vadd.f32 %v149_v4, %v148_v3  ;;  %v153_v8 = vsel %vm147_vm0, %v118_v6, 0.0  ;;  %v155_v11 = vsel %vm147_vm0, %v119_v9, 0.0  ;;  %v157_v14 = vsel %vm147_vm0, %v120_v12, 0.0  ;;  %v121_v15 = vld [vmem:[%s425_s11 + $0x30] sm:$0xff]  ;;  %v122_v18 = vld [vmem:[%s425_s11 + $0x38] sm:$0xff]  ;;  %v123_v21 = vld [vmem:[%s425_s11 + $0x40] sm:$0xff] }
  0x13   : > { %v159_v17 = vsel %vm147_vm0, %v121_v15, 0.0  ;;  %v161_v20 = vsel %vm147_vm0, %v122_v18, 0.0  ;;  %v163_v23 = vsel %vm147_vm0, %v123_v21, 0.0  ;;  %v124_v24 = vld [vmem:[%s425_s11 + $0x48] sm:$0xff]  ;;  %v220_v28 = vmul.f32 %v116_v1, %v116_v1  ;;  %v125_v30 = vld [vmem:[%s425_s11 + $0x50] sm:$0xff]  ;;  %v126_v32 = vld [vmem:[%s425_s11 + $0x58] sm:$0xff] }
  0x14   : > { %v152_v10 = vadd.f32 %v151_v5, %v150_v7  ;;  %v165_v26 = vsel %vm147_vm0, %v124_v24, 0.0  ;;  %v221_v29 = vmul.f32 %v117_v2, %v117_v2  ;;  %v167_v33 = vsel %vm147_vm0, %v125_v30, 0.0  ;;  %v127_v41 = vld [vmem:[%s425_s11 + $0x60] sm:$0xff]  ;;  %v128_v47 = vld [vmem:[%s425_s11 + $0x68] sm:$0xff]  ;;  %v129_v53 = vld [vmem:[%s425_s11 + $0x70] sm:$0xff] }
  0x15   : > { %v222_v34 = vmul.f32 %v118_v6, %v118_v6  ;;  %v169_v36 = vsel %vm147_vm0, %v126_v32, 0.0  ;;  %v223_v37 = vmul.f32 %v119_v9, %v119_v9  ;;  %v251_v38 = vsel %vm147_vm0, %v219_v27, 0.0  ;;  %v130_v59 = vld [vmem:[%s425_s11 + $0x78] sm:$0xff]  ;;  %v131_v1 = vld [vmem:[%s425_s11 + $0x80] sm:$0xff]  ;;  %v132_v7 = vld [vmem:[%s425_s11 + $0x88] sm:$0xff] }
  0x16   : > { %v154_v13 = vadd.f32 %v153_v8, %v152_v10  ;;  %v252_v39 = vsel %vm147_vm0, %v220_v28, 0.0  ;;  %v254_v40 = vsel %vm147_vm0, %v221_v29, 0.0  ;;  %v171_v44 = vsel %vm147_vm0, %v127_v41, 0.0 }
  0x17   : > { %v253_v43 = vadd.f32 %v252_v39, %v251_v38  ;;  %v224_v45 = vmul.f32 %v120_v12, %v120_v12  ;;  %v256_v46 = vsel %vm147_vm0, %v222_v34, 0.0  ;;  %v173_v50 = vsel %vm147_vm0, %v128_v47, 0.0 }
  0x18   : > { %v156_v16 = vadd.f32 %v155_v11, %v154_v13  ;;  %v225_v51 = vmul.f32 %v121_v15, %v121_v15  ;;  %v258_v52 = vsel %vm147_vm0, %v223_v37, 0.0  ;;  %v175_v56 = vsel %vm147_vm0, %v129_v53, 0.0  ;;  %v133_v13 = vld [vmem:[%s425_s11 + $0x90] sm:$0xff] }
  0x19   : > { %v255_v49 = vadd.f32 %v254_v40, %v253_v43  ;;  %v226_v57 = vmul.f32 %v122_v18, %v122_v18  ;;  %v260_v58 = vsel %vm147_vm0, %v224_v45, 0.0  ;;  %v177_v62 = vsel %vm147_vm0, %v130_v59, 0.0  ;;  %v137_v37 = vld [vmem:[%s425_s11 + $0xb0] sm:$0xff]  ;;  %v138_v43 = vld [vmem:[%s425_s11 + $0xb8] sm:$0xff] }
  0x1a   : > { %v158_v19 = vadd.f32 %v157_v14, %v156_v16  ;;  %v227_v63 = vmul.f32 %v123_v21, %v123_v21  ;;  %v262_v0 = vsel %vm147_vm0, %v225_v51, 0.0  ;;  %v179_v4 = vsel %vm147_vm0, %v131_v1, 0.0 }
  0x1b   : > { %v257_v55 = vadd.f32 %v256_v46, %v255_v49  ;;  %v228_v5 = vmul.f32 %v124_v24, %v124_v24  ;;  %v264_v6 = vsel %vm147_vm0, %v226_v57, 0.0  ;;  %v181_v10 = vsel %vm147_vm0, %v132_v7, 0.0  ;;  %v139_v49 = vld [vmem:[%s425_s11 + $0xc0] sm:$0xff] }
  0x1c   : > { %v160_v22 = vadd.f32 %v159_v17, %v158_v19  ;;  %v229_v11 = vmul.f32 %v125_v30, %v125_v30  ;;  %v266_v12 = vsel %vm147_vm0, %v227_v63, 0.0  ;;  %v183_v16 = vsel %vm147_vm0, %v133_v13, 0.0  ;;  %v134_v19 = vld [vmem:[%s425_s11 + $0x98] sm:$0xff] }
  0x1d   : > { %v259_v61 = vadd.f32 %v258_v52, %v257_v55  ;;  %v230_v17 = vmul.f32 %v126_v32, %v126_v32  ;;  %v268_v18 = vsel %vm147_vm0, %v228_v5, 0.0  ;;  %v232_v29 = vmul.f32 %v128_v47, %v128_v47  ;;  %v140_v55 = vld [vmem:[%s425_s11 + $0xc8] sm:$0xff] }
  0x1e   : > { %v162_v25 = vadd.f32 %v161_v20, %v160_v22  ;;  %v185_v22 = vsel %vm147_vm0, %v134_v19, 0.0  ;;  %v270_v24 = vsel %vm147_vm0, %v229_v11, 0.0  ;;  %v191_v40 = vsel %vm147_vm0, %v137_v37, 0.0 }
  0x1f   : > { %v261_v3 = vadd.f32 %v260_v58, %v259_v61  ;;  %v272_v30 = vsel %vm147_vm0, %v230_v17, 0.0  ;;  %v193_v46 = vsel %vm147_vm0, %v138_v43, 0.0  ;;  %v235_v47 = vmul.f32 %v131_v1, %v131_v1  ;;  %v141_v61 = vld [vmem:[%s425_s11 + $0xd0] sm:$0xff] }
  0x20   : > { %v164_v31 = vadd.f32 %v163_v23, %v162_v25  ;;  %v231_v23 = vmul.f32 %v127_v41, %v127_v41  ;;  %v135_v25 = vld [vmem:[%s425_s11 + $0xa0] sm:$0xff]  ;;  %v234_v41 = vmul.f32 %v130_v59, %v130_v59  ;;  %v195_v52 = vsel %vm147_vm0, %v139_v49, 0.0 }
  0x21   : > { %v263_v9 = vadd.f32 %v262_v0, %v261_v3  ;;  %v187_v28 = vsel %vm147_vm0, %v135_v25, 0.0  ;;  %v197_v58 = vsel %vm147_vm0, %v140_v55, 0.0  ;;  %v237_v59 = vmul.f32 %v133_v13, %v133_v13  ;;  %v142_v3 = vld [vmem:[%s425_s11 + $0xd8] sm:$0xff] }
  0x22   : > { %v166_v35 = vadd.f32 %v165_v26, %v164_v31  ;;  %v136_v31 = vld [vmem:[%s425_s11 + $0xa8] sm:$0xff]  ;;  %v199_v0 = vsel %vm147_vm0, %v141_v61, 0.0  ;;  %v238_v1 = vmul.f32 %v134_v19, %v134_v19  ;;  %v241_v19 = vmul.f32 %v137_v37, %v137_v37 }
  0x23   : > { %v265_v15 = vadd.f32 %v264_v6, %v263_v9  ;;  %v189_v34 = vsel %vm147_vm0, %v136_v31, 0.0  ;;  %v201_v6 = vsel %vm147_vm0, %v142_v3, 0.0  ;;  %v143_v9 = vld [vmem:[%s425_s11 + $0xe0] sm:$0xff]  ;;  %v240_v13 = vmul.f32 %v136_v31, %v136_v31 }
  0x24   : > { %v168_v42 = vadd.f32 %v167_v33, %v166_v35  ;;  %v233_v35 = vmul.f32 %v129_v53, %v129_v53  ;;  %v236_v53 = vmul.f32 %v132_v7, %v132_v7  ;;  %v239_v7 = vmul.f32 %v135_v25, %v135_v25 }
  0x25   : > { %v267_v21 = vadd.f32 %v266_v12, %v265_v15  ;;  %v203_v12 = vsel %vm147_vm0, %v143_v9, 0.0  ;;  %v144_v15 = vld [vmem:[%s425_s11 + $0xe8] sm:$0xff]  ;;  %v242_v25 = vmul.f32 %v138_v43, %v138_v43  ;;  %v243_v31 = vmul.f32 %v139_v49, %v139_v49 }
  0x26   : > { %v170_v48 = vadd.f32 %v169_v36, %v168_v42  ;;  %v274_v36 = vsel %vm147_vm0, %v231_v23, 0.0  ;;  %v276_v42 = vsel %vm147_vm0, %v232_v29, 0.0  ;;  %v246_v43 = vmul.f32 %v142_v3, %v142_v3 }
  0x27   : > { %v269_v27 = vadd.f32 %v268_v18, %v267_v21  ;;  %v205_v18 = vsel %vm147_vm0, %v144_v15, 0.0  ;;  %v145_v21 = vld [vmem:[%s425_s11 + $0xf0] sm:$0xff] }
  0x28   : > { %v172_v54 = vadd.f32 %v171_v44, %v170_v48  ;;  %v278_v48 = vsel %vm147_vm0, %v233_v35, 0.0  ;;  %v244_v35 = vmul.f32 %v140_v55, %v140_v55  ;;  %v249_v55 = vmul.f32 %v145_v21, %v145_v21 }
  0x29   : > { %v271_v33 = vadd.f32 %v270_v24, %v269_v27  ;;  %v207_v24 = vsel %vm147_vm0, %v145_v21, 0.0  ;;  %v146_v27 = vld [vmem:[%s425_s11 + $0xf8] sm:$0xff] }
  0x2a   : > { %v174_v60 = vadd.f32 %v173_v50, %v172_v54  ;;  %v280_v54 = vsel %vm147_vm0, %v234_v41, 0.0 }
  0x2b   : > { %v273_v39 = vadd.f32 %v272_v30, %v271_v33  ;;  %v209_v30 = vsel %vm147_vm0, %v146_v27, 0.0 }
  0x2c   : > { %v176_v2 = vadd.f32 %v175_v56, %v174_v60  ;;  %v282_v60 = vsel %vm147_vm0, %v235_v47, 0.0  ;;  %v247_v47 = vmul.f32 %v143_v9, %v143_v9 }
  0x2d   : > { %v275_v45 = vadd.f32 %v274_v36, %v273_v39  ;;  %v296_v36 = vsel %vm147_vm0, %v242_v25, 0.0  ;;  %v245_v39 = vmul.f32 %v141_v61, %v141_v61 }
  0x2e   : > { %v178_v8 = vadd.f32 %v177_v62, %v176_v2  ;;  %v284_v2 = vsel %vm147_vm0, %v236_v53, 0.0 }
  0x2f   : > { %v277_v51 = vadd.f32 %v276_v42, %v275_v45 }
  0x30   : > { %v180_v14 = vadd.f32 %v179_v4, %v178_v8  ;;  %v286_v8 = vsel %vm147_vm0, %v237_v59, 0.0  ;;  %v250_v59 = vmul.f32 %v146_v27, %v146_v27 }
  0x31   : > { %v279_v57 = vadd.f32 %v278_v48, %v277_v51  ;;  %v302_v48 = vsel %vm147_vm0, %v245_v39, 0.0  ;;  %v248_v51 = vmul.f32 %v144_v15, %v144_v15 }
  0x32   : > { %v182_v20 = vadd.f32 %v181_v10, %v180_v14  ;;  %v288_v14 = vsel %vm147_vm0, %v238_v1, 0.0  ;;  %v312_v1 = vsel %vm147_vm0, %v250_v59, 0.0 }
  0x33   : > { %v281_v63 = vadd.f32 %v280_v54, %v279_v57 }
  0x34   : > { %v184_v26 = vadd.f32 %v183_v16, %v182_v20  ;;  %v290_v20 = vsel %vm147_vm0, %v239_v7, 0.0 }
  0x35   : > { %v283_v5 = vadd.f32 %v282_v60, %v281_v63  ;;  %v308_v60 = vsel %vm147_vm0, %v248_v51, 0.0  ;;  %v310_v63 = vsel %vm147_vm0, %v249_v55, 0.0 }
  0x36   : > { %v186_v32 = vadd.f32 %v185_v22, %v184_v26  ;;  %v292_v26 = vsel %vm147_vm0, %v240_v13, 0.0 }
  0x37   : > { %v285_v11 = vadd.f32 %v284_v2, %v283_v5 }
  0x38   : > { %v188_v38 = vadd.f32 %v187_v28, %v186_v32  ;;  %v294_v32 = vsel %vm147_vm0, %v241_v19, 0.0 }
  0x39   : > { %v287_v17 = vadd.f32 %v286_v8, %v285_v11 }
  0x3a   : > { %v190_v44 = vadd.f32 %v189_v34, %v188_v38 }
  0x3b   : > { %v289_v23 = vadd.f32 %v288_v14, %v287_v17 }
  0x3c   : > { %v192_v50 = vadd.f32 %v191_v40, %v190_v44  ;;  %v298_v40 = vsel %vm147_vm0, %v243_v31, 0.0  ;;  %v300_v44 = vsel %vm147_vm0, %v244_v35, 0.0 }
  0x3d   : > { %v291_v29 = vadd.f32 %v290_v20, %v289_v23 }
  0x3e   : > { %v194_v56 = vadd.f32 %v193_v46, %v192_v50 }
  0x3f   : > { %v293_v34 = vadd.f32 %v292_v26, %v291_v29 }
  0x40   : > { %v196_v62 = vadd.f32 %v195_v52, %v194_v56  ;;  %v304_v52 = vsel %vm147_vm0, %v246_v43, 0.0  ;;  %v306_v56 = vsel %vm147_vm0, %v247_v47, 0.0 }
  0x41   : > { %v295_v38 = vadd.f32 %v294_v32, %v293_v34 }
  0x42   : > { %v198_v4 = vadd.f32 %v197_v58, %v196_v62 }
  0x43   : > { %v297_v42 = vadd.f32 %v296_v36, %v295_v38 }
  0x44   : > { %v200_v10 = vadd.f32 %v199_v0, %v198_v4 }
  0x45   : > { %v299_v46 = vadd.f32 %v298_v40, %v297_v42 }
  0x46   : > { %v202_v16 = vadd.f32 %v201_v6, %v200_v10 }
  0x47   : > { %v301_v50 = vadd.f32 %v300_v44, %v299_v46 }
  0x48   : > { %v204_v22 = vadd.f32 %v203_v12, %v202_v16 }
  0x49   : > { %v303_v54 = vadd.f32 %v302_v48, %v301_v50 }
  0x4a   : > { %v206_v28 = vadd.f32 %v205_v18, %v204_v22 }
  0x4b   : > { %v305_v58 = vadd.f32 %v304_v52, %v303_v54 }
  0x4c   : > { %v208_v33 = vadd.f32 %v207_v24, %v206_v28 }
  0x4d   : > { %v307_v62 = vadd.f32 %v306_v56, %v305_v58 }
  0x4e   : > { %v210_v37 = vadd.f32 %v209_v30, %v208_v33 }
  0x4f   : > { %v309_v0 = vadd.f32 %v308_v60, %v307_v62 }
  0x50   : > { %v211_v41 = vrot.slane %v210_v37, 4 }
  0x51   : > { %v311_v2 = vadd.f32 %v310_v63, %v309_v0 }
  0x52   : > { %v212_v45 = vadd.f32 %v211_v41, %v210_v37 }
  0x53   : > { %v313_v3 = vadd.f32 %v312_v1, %v311_v2 }
  0x54   : > { %v213_v49 = vrot.slane %v212_v45, 2 }
  0x55   : > { %v314_v4 = vrot.slane %v313_v3, 4 }
  0x56   : > { %v214_v53 = vadd.f32 %v213_v49, %v212_v45 }
  0x57   : > { %v315_v5 = vadd.f32 %v314_v4, %v313_v3 }
  0x58   : > { %v215_v57 = vrot.slane %v214_v53, 1 }
  0x59   : > { %v316_v6 = vrot.slane %v315_v5, 2 }
  0x5a   : > { %v216_v61 = vadd.f32 %v215_v57, %v214_v53 }
  0x5b   : > { %v317_v7 = vadd.f32 %v316_v6, %v315_v5 }
  0x5c   : > { %218 = vst.msk [vmem:[%s114_s15] sm:$0x1] %vm217_vm1, %v216_v61 }
  0x5d   : > { %v318_v8 = vrot.slane %v317_v7, 1 }
  0x5f   : > { %v319_v9 = vadd.f32 %v318_v8, %v317_v7 }
  0x61   : > { %320 = vst.msk [vmem:[%s114_s15 + $0x1] sm:$0x1] %vm217_vm1, %v319_v9 }
  0x62 PF: > { %s11_s6 = sadd.s32 1, %s399_s6  }
  0x63   : > { %p8_p4 = scmp.ge.s32.totalorder %s11_s6, 4  }
  0x65   :  { %10 = sbr.rel (!%p8_p4) target bundleno = 1 (0x1), region = 54 }

// kernel: _apply_model.72
= control target key start
LH: loop header
LB: loop body
LE: loop exit
PB: predicated region body
PF: predicated region fallthrough
CT: control target
= control target key end

     0   :  { %s962_s18 = smov 0   ;;  %s1367_s0 = inlined_call_operand.vmem [shape: f32[2,256,32], index: 0, kind: input, shape index: {}]   ;;  %s1368_s1 = inlined_call_operand.vmem [shape: f32[2,1,32], index: 1, kind: input, shape index: {}]   ;;  %s1369_s2 = inlined_call_operand.vmem [shape: f32[2,1,32], index: 2, kind: input, shape index: {}]   ;;  %s1370_s3 = inlined_call_operand.vmem [shape: f32[1,32], index: 3, kind: input, shape index: {}]   ;;  %s1371_s4 = inlined_call_operand.vmem [shape: f32[1,32], index: 4, kind: input, shape index: {}]   ;;  %s1372_s5 = inlined_call_operand.vmem [shape: f32[2,256,32], index: 5, kind: output, shape index: {}]  }
   0x1 LB: > { %s771_s19 = sadd.s32 4294967295, %s930_s18   ;;  %p775_p0 = scmp.ge.s32.totalorder %s930_s18, 1  ;;  %s930_s18 = sphi %s962_s18, %s15_s18  }
   0x2   : > { %p203_p1 = scmp.lt.s32.totalorder %s930_s18, 3 }
   0x4   : > { %p204_p2 = pnand %p775_p0, %p203_p1 }
   0x5   : > { %p237_p3 = scmp.lt.s32.totalorder (!%p204_p2), %s771_s19, 1  ;;  %v996_v3 = vld [vmem:[%s1370_s3] ss:$0 sm:$0xff] (!%p204_p2)  ;;  %vm665_vm0 = vcmask (!%p204_p2), 261120  }
   0x6   : > { %207 = sbr.rel (%p204_p2) target bundleno = 122 (0x7a), region = 40  ;;  %v1017_v20 = vld [vmem:[%s1371_s4] ss:$0 sm:$0xff] (!%p204_p2) }
   0xd   : > { %s1374_s19 = smov (!%p237_p3, %s771_s19), 1 }
   0xe   : > { %s786_s20 = sshll.u32 %s1374_s19, 8  ;;  %s244_s23 = scalar_lea.vmem %s1368_s1, %s1374_s19 }
   0xf   : > { %s982_s26 = scalar_lea.vmem %s1367_s0, %s786_s20  ;;  %s247_s29 = scalar_lea.vmem %s1369_s2, %s1374_s19  ;;  %v988_v0 = vld [vmem:[%s244_s23] ss:$0 sm:$0xff] }
  0x10   : > { %v253_v1 = vld [vmem:[%s982_s26] sm:$0xff]  ;;  %v254_v4 = vld [vmem:[%s982_s26 + $0x8] sm:$0xff]  ;;  %v255_v7 = vld [vmem:[%s982_s26 + $0x10] sm:$0xff]  ;;  %s1159_s11 = scalar_lea.vmem %s1372_s5, %s786_s20 }
  0x11   : > { %v991_v2 = vld [vmem:[%s247_s29] ss:$0 sm:$0xff]  ;;  %v292_v5 = vsub.f32 %v253_v1, %v988_v0  ;;  %v293_v6 = vsub.f32 %v254_v4, %v988_v0  ;;  %v256_v8 = vld [vmem:[%s982_s26 + $0x18] sm:$0xff]  ;;  %v294_v10 = vsub.f32 %v255_v7, %v988_v0  ;;  %v258_v13 = vld [vmem:[%s982_s26 + $0x28] sm:$0xff] }
  0x12   : > { %v257_v9 = vld [vmem:[%s982_s26 + $0x20] sm:$0xff]  ;;  %v295_v11 = vsub.f32 %v256_v8, %v988_v0  ;;  %v259_v14 = vld [vmem:[%s982_s26 + $0x30] sm:$0xff]  ;;  %v260_v15 = vld [vmem:[%s982_s26 + $0x38] sm:$0xff]  ;;  %v297_v18 = vsub.f32 %v258_v13, %v988_v0 }
  0x13   : > { %v296_v12 = vsub.f32 %v257_v9, %v988_v0  ;;  %v331_v16 = vmul.f32 %v991_v2, %v292_v5  ;;  %v332_v17 = vmul.f32 %v991_v2, %v293_v6  ;;  %v298_v19 = vsub.f32 %v259_v14, %v988_v0  ;;  %v261_v45 = vld [vmem:[%s982_s26 + $0x40] sm:$0xff]  ;;  %v262_v46 = vld [vmem:[%s982_s26 + $0x48] sm:$0xff]  ;;  %v263_v51 = vld [vmem:[%s982_s26 + $0x50] sm:$0xff] }
  0x14   : > { %v333_v21 = vmul.f32 %v991_v2, %v294_v10  ;;  %v334_v22 = vmul.f32 %v991_v2, %v295_v11  ;;  %v299_v24 = vsub.f32 %v260_v15, %v988_v0  ;;  %v336_v27 = vmul.f32 %v991_v2, %v297_v18  ;;  %v264_v52 = vld [vmem:[%s982_s26 + $0x58] sm:$0xff]  ;;  %v265_v53 = vld [vmem:[%s982_s26 + $0x60] sm:$0xff]  ;;  %v266_v7 = vld [vmem:[%s982_s26 + $0x68] sm:$0xff] }
  0x15   : > { %v335_v23 = vmul.f32 %v991_v2, %v296_v12  ;;  %v370_v25 = vmul.f32 %v996_v3, %v331_v16  ;;  %v371_v26 = vmul.f32 %v996_v3, %v332_v17  ;;  %v337_v28 = vmul.f32 %v991_v2, %v298_v19 }
  0x16   : > { %v372_v29 = vmul.f32 %v996_v3, %v333_v21  ;;  %v373_v30 = vmul.f32 %v996_v3, %v334_v22  ;;  %v338_v32 = vmul.f32 %v991_v2, %v299_v24  ;;  %v375_v35 = vmul.f32 %v996_v3, %v336_v27  ;;  %v267_v21 = vld [vmem:[%s982_s26 + $0x70] sm:$0xff] }
  0x17   : > { %v374_v31 = vmul.f32 %v996_v3, %v335_v23  ;;  %v1032_v33 = vadd.f32 %v1017_v20, %v370_v25  ;;  %v1035_v34 = vadd.f32 %v1017_v20, %v371_v26  ;;  %v376_v36 = vmul.f32 %v996_v3, %v337_v28  ;;  %v268_v25 = vld [vmem:[%s982_s26 + $0x78] sm:$0xff] }
  0x18   : > { %v1040_v37 = vadd.f32 %v1017_v20, %v372_v29  ;;  %v1043_v38 = vadd.f32 %v1017_v20, %v373_v30  ;;  %v377_v40 = vmul.f32 %v996_v3, %v338_v32  ;;  %v1052_v43 = vadd.f32 %v1017_v20, %v375_v35 }
  0x19   : > { %v1046_v39 = vadd.f32 %v1017_v20, %v374_v31  ;;  %v441_v41 = vsub.f32 0.0, %v1032_v33  ;;  %v442_v42 = vsub.f32 0.0, %v1035_v34  ;;  %v1055_v44 = vadd.f32 %v1017_v20, %v376_v36 }
  0x1a   : > { %v443_v47 = vsub.f32 0.0, %v1040_v37  ;;  %v444_v48 = vsub.f32 0.0, %v1043_v38  ;;  %v1063_v50 = vadd.f32 %v1017_v20, %v377_v40  ;;  %v446_v56 = vsub.f32 0.0, %v1052_v43 }
  0x1b   : > { %v445_v49 = vsub.f32 0.0, %v1046_v39  ;;  %v473_v54 = vmul.f32 1.442695, %v441_v41  ;;  %v475_v55 = vmul.f32 1.442695, %v442_v42  ;;  %v447_v57 = vsub.f32 0.0, %v1055_v44 }
  0x1c   : > { %v477_v58 = vmul.f32 1.442695, %v443_v47  ;;  %v479_v59 = vmul.f32 1.442695, %v444_v48  ;;  %v300_v61 = vsub.f32 %v261_v45, %v988_v0  ;;  %v483_v62 = vmul.f32 1.442695, %v446_v56 }
  0x1d   : > { %v481_v60 = vmul.f32 1.442695, %v445_v49  ;;  %796 = vpow2.f32 %v473_v54  ;;  %v485_v63 = vmul.f32 1.442695, %v447_v57  ;;  %v448_v1 = vsub.f32 0.0, %v1063_v50  ;;  %v269_v54 = vld [vmem:[%s982_s26 + $0x80] sm:$0xff] }
  0x1e   : > { %798 = vpow2.f32 %v475_v55  ;;  %v339_v4 = vmul.f32 %v991_v2, %v300_v61  ;;  %v301_v5 = vsub.f32 %v262_v46, %v988_v0  ;;  %v302_v6 = vsub.f32 %v263_v51, %v988_v0 }
  0x1f   : > { %800 = vpow2.f32 %v477_v58  ;;  %v487_v8 = vmul.f32 1.442695, %v448_v1  ;;  %v303_v9 = vsub.f32 %v264_v52, %v988_v0  ;;  %v304_v10 = vsub.f32 %v265_v53, %v988_v0  ;;  %v270_v1 = vld [vmem:[%s982_s26 + $0x88] sm:$0xff] }
  0x20   : > { %802 = vpow2.f32 %v479_v59  ;;  %v378_v11 = vmul.f32 %v996_v3, %v339_v4  ;;  %v340_v12 = vmul.f32 %v991_v2, %v301_v5  ;;  %v341_v13 = vmul.f32 %v991_v2, %v302_v6 }
  0x21   : > { %804 = vpow2.f32 %v481_v60  ;;  %v342_v14 = vmul.f32 %v991_v2, %v303_v9  ;;  %v343_v15 = vmul.f32 %v991_v2, %v304_v10  ;;  %v305_v16 = vsub.f32 %v266_v7, %v988_v0 }
  0x22   : > { %806 = vpow2.f32 %v483_v62  ;;  %v1085_v17 = vadd.f32 %v1017_v20, %v378_v11  ;;  %v379_v18 = vmul.f32 %v996_v3, %v340_v12  ;;  %v380_v19 = vmul.f32 %v996_v3, %v341_v13 }
  0x23   : > { %808 = vpow2.f32 %v485_v63  ;;  %v381_v22 = vmul.f32 %v996_v3, %v342_v14  ;;  %v382_v23 = vmul.f32 %v996_v3, %v343_v15  ;;  %v344_v24 = vmul.f32 %v991_v2, %v305_v16  ;;  %v271_v16 = vld [vmem:[%s982_s26 + $0x90] sm:$0xff] }
  0x24   : > { %810 = vpow2.f32 %v487_v8  ;;  %v449_v26 = vsub.f32 0.0, %v1085_v17  ;;  %v1096_v27 = vadd.f32 %v1017_v20, %v379_v18  ;;  %v1099_v28 = vadd.f32 %v1017_v20, %v380_v19 }
  0x25   : > { %v1102_v29 = vadd.f32 %v1017_v20, %v381_v22  ;;  %v1105_v30 = vadd.f32 %v1017_v20, %v382_v23  ;;  %v383_v31 = vmul.f32 %v996_v3, %v344_v24  ;;  %v306_v32 = vsub.f32 %v267_v21, %v988_v0  ;;  %v272_v23 = vld [vmem:[%s982_s26 + $0x98] sm:$0xff] }
  0x26   : > { %v489_v35 = vmul.f32 1.442695, %v449_v26  ;;  %v450_v36 = vsub.f32 0.0, %v1096_v27  ;;  %v451_v40 = vsub.f32 0.0, %v1099_v28  ;;  %v307_v41 = vsub.f32 %v268_v25, %v988_v0 }
  0x27   : > { %v797_v42 = vpop.eup %796  ;;  %v452_v45 = vsub.f32 0.0, %v1102_v29  ;;  %v453_v46 = vsub.f32 0.0, %v1105_v30  ;;  %v1115_v47 = vadd.f32 %v1017_v20, %v383_v31  ;;  %v345_v48 = vmul.f32 %v991_v2, %v306_v32  ;;  %v273_v31 = vld [vmem:[%s982_s26 + $0xa0] sm:$0xff] }
  0x28   : > { %v799_v49 = vpop.eup %798  ;;  %v537_v51 = vadd.f32 1.0, %v797_v42  ;;  %812 = vpow2.f32 %v489_v35  ;;  %v491_v52 = vmul.f32 1.442695, %v450_v36  ;;  %v493_v53 = vmul.f32 1.442695, %v451_v40 }
  0x29   : > { %v801_v55 = vpop.eup %800  ;;  %v538_v56 = vadd.f32 1.0, %v799_v49  ;;  %v495_v57 = vmul.f32 1.442695, %v452_v45  ;;  %v1119_v58 = vmul.f32 1.442695, %v453_v46  ;;  %v454_v59 = vsub.f32 0.0, %v1115_v47 }
  0x2a   : > { %v803_v60 = vpop.eup %802  ;;  %814 = vrcp.f32 %v537_v51  ;;  %v539_v61 = vadd.f32 1.0, %v801_v55  ;;  %v384_v62 = vmul.f32 %v996_v3, %v345_v48  ;;  %v346_v63 = vmul.f32 %v991_v2, %v307_v41 }
  0x2b   : > { %v805_v4 = vpop.eup %804  ;;  %816 = vrcp.f32 %v538_v56  ;;  %v540_v5 = vadd.f32 1.0, %v803_v60  ;;  %v499_v6 = vmul.f32 1.442695, %v454_v59  ;;  %v308_v7 = vsub.f32 %v269_v54, %v988_v0 }
  0x2c   : > { %v807_v8 = vpop.eup %806  ;;  %818 = vrcp.f32 %v539_v61  ;;  %v541_v9 = vadd.f32 1.0, %v805_v4  ;;  %v1127_v10 = vadd.f32 %v1017_v20, %v384_v62  ;;  %v385_v11 = vmul.f32 %v996_v3, %v346_v63 }
  0x2d   : > { %v809_v12 = vpop.eup %808  ;;  %820 = vrcp.f32 %v540_v5  ;;  %v542_v13 = vadd.f32 1.0, %v807_v8  ;;  %v347_v14 = vmul.f32 %v991_v2, %v308_v7  ;;  %v309_v15 = vsub.f32 %v270_v1, %v988_v0  ;;  %v274_v7 = vld [vmem:[%s982_s26 + $0xa8] sm:$0xff] }
  0x2e   : > { %v811_v18 = vpop.eup %810  ;;  %822 = vrcp.f32 %v541_v9  ;;  %v543_v19 = vadd.f32 1.0, %v809_v12  ;;  %v455_v21 = vsub.f32 0.0, %v1127_v10  ;;  %v1135_v22 = vadd.f32 %v1017_v20, %v385_v11 }
  0x2f   : > { %824 = vrcp.f32 %v542_v13  ;;  %v544_v24 = vadd.f32 1.0, %v811_v18  ;;  %v386_v25 = vmul.f32 %v996_v3, %v347_v14  ;;  %v348_v26 = vmul.f32 %v991_v2, %v309_v15  ;;  %v275_v15 = vld [vmem:[%s982_s26 + $0xb0] sm:$0xff] }
  0x30   : > { %826 = vrcp.f32 %v543_v19  ;;  %v501_v32 = vmul.f32 1.442695, %v455_v21  ;;  %v456_v35 = vsub.f32 0.0, %v1135_v22  ;;  %v310_v36 = vsub.f32 %v271_v16, %v988_v0 }
  0x31   : > { %828 = vrcp.f32 %v544_v24  ;;  %v1144_v40 = vadd.f32 %v1017_v20, %v386_v25  ;;  %v387_v41 = vmul.f32 %v996_v3, %v348_v26  ;;  %v311_v42 = vsub.f32 %v272_v23, %v988_v0 }
  0x32   : > { %v813_v45 = vpop.eup %812  ;;  %830 = vpow2.f32 %v491_v52  ;;  %v503_v46 = vmul.f32 1.442695, %v456_v35  ;;  %v349_v48 = vmul.f32 %v991_v2, %v310_v36  ;;  %v312_v49 = vsub.f32 %v273_v31, %v988_v0  ;;  %v277_v31 = vld [vmem:[%s982_s26 + $0xc0] sm:$0xff] }
  0x33   : > { %v545_v51 = vadd.f32 1.0, %v813_v45  ;;  %832 = vpow2.f32 %v493_v53  ;;  %v457_v54 = vsub.f32 0.0, %v1144_v40  ;;  %v1152_v55 = vadd.f32 %v1017_v20, %v387_v41 }
  0x34   : > { %v815_v56 = vpop.eup %814  ;;  %834 = vpow2.f32 %v495_v57  ;;  %v388_v52 = vmul.f32 %v996_v3, %v349_v48  ;;  %v350_v59 = vmul.f32 %v991_v2, %v311_v42  ;;  %v351_v53 = vmul.f32 %v991_v2, %v312_v49 }
  0x35   : > { %v817_v60 = vpop.eup %816  ;;  %v633_v61 = vmul.f32 %v815_v56, %v1032_v33  ;;  %836 = vrcp.f32 %v545_v51  ;;  %v505_v62 = vmul.f32 1.442695, %v457_v54  ;;  %v458_v63 = vsub.f32 0.0, %v1152_v55 }
  0x36   : > { %v819_v1 = vpop.eup %818  ;;  %v634_v4 = vmul.f32 %v817_v60, %v1035_v34  ;;  %838 = vpow2.f32 %v1119_v58  ;;  %v1169_v57 = vadd.f32 %v1017_v20, %v388_v52  ;;  %v389_v5 = vmul.f32 %v996_v3, %v350_v59 }
  0x37   : > { %v821_v8 = vpop.eup %820  ;;  %666 = vst.msk [vmem:[%s1159_s11] sm:$0xff] %vm665_vm0, %v633_v61  ;;  %v635_v33 = vmul.f32 %v819_v1, %v1040_v37  ;;  %840 = vpow2.f32 %v499_v6  ;;  %v507_v9 = vmul.f32 1.442695, %v458_v63  ;;  %v390_v34 = vmul.f32 %v996_v3, %v351_v53 }
  0x38   : > { %v823_v11 = vpop.eup %822  ;;  %667 = vst.msk [vmem:[%s1159_s11 + $0x8] sm:$0xff] %vm665_vm0, %v634_v4  ;;  %v636_v58 = vmul.f32 %v821_v8, %v1043_v38  ;;  %842 = vpow2.f32 %v501_v32  ;;  %v459_v12 = vsub.f32 0.0, %v1169_v57  ;;  %v1182_v13 = vadd.f32 %v1017_v20, %v389_v5 }
  0x39   : > { %v825_v37 = vpop.eup %824  ;;  %668 = vst.msk [vmem:[%s1159_s11 + $0x10] sm:$0xff] %vm665_vm0, %v635_v33  ;;  %v637_v6 = vmul.f32 %v823_v11, %v1046_v39  ;;  %844 = vpow2.f32 %v503_v46  ;;  %v1188_v14 = vadd.f32 %v1017_v20, %v390_v34  ;;  %v313_v38 = vsub.f32 %v274_v7, %v988_v0  ;;  %v276_v39 = vld [vmem:[%s982_s26 + $0xb8] sm:$0xff] }
  0x3a   : > { %v827_v16 = vpop.eup %826  ;;  %669 = vst.msk [vmem:[%s1159_s11 + $0x18] sm:$0xff] %vm665_vm0, %v636_v58  ;;  %v638_v18 = vmul.f32 %v825_v37, %v1052_v43  ;;  %846 = vpow2.f32 %v505_v62  ;;  %v509_v19 = vmul.f32 1.442695, %v459_v12  ;;  %v460_v21 = vsub.f32 0.0, %v1182_v13 }
  0x3b   : > { %v829_v23 = vpop.eup %828  ;;  %670 = vst.msk [vmem:[%s1159_s11 + $0x20] sm:$0xff] %vm665_vm0, %v637_v6  ;;  %v639_v24 = vmul.f32 %v827_v16, %v1055_v44  ;;  %848 = vpow2.f32 %v507_v9  ;;  %v461_v25 = vsub.f32 0.0, %v1188_v14  ;;  %v352_v26 = vmul.f32 %v991_v2, %v313_v38  ;;  %v278_v9 = vld [vmem:[%s982_s26 + $0xc8] sm:$0xff] }
  0x3c   : > { %v831_v32 = vpop.eup %830  ;;  %671 = vst.msk [vmem:[%s1159_s11 + $0x28] sm:$0xff] %vm665_vm0, %v638_v18  ;;  %v640_v43 = vmul.f32 %v829_v23, %v1063_v50  ;;  %850 = vpow2.f32 %v509_v19  ;;  %v511_v35 = vmul.f32 1.442695, %v460_v21  ;;  %v314_v36 = vsub.f32 %v275_v15, %v988_v0  ;;  %v280_v23 = vld [vmem:[%s982_s26 + $0xd8] sm:$0xff] }
  0x3d   : > { %v833_v41 = vpop.eup %832  ;;  %672 = vst.msk [vmem:[%s1159_s11 + $0x30] sm:$0xff] %vm665_vm0, %v639_v24  ;;  %v546_v44 = vadd.f32 1.0, %v831_v32  ;;  %v513_v42 = vmul.f32 1.442695, %v461_v25  ;;  %v391_v45 = vmul.f32 %v996_v3, %v352_v26  ;;  %v315_v46 = vsub.f32 %v276_v39, %v988_v0  ;;  %v279_v39 = vld [vmem:[%s982_s26 + $0xd0] sm:$0xff]  ;;  %v281_v32 = vld [vmem:[%s982_s26 + $0xe0] sm:$0xff] }
  0x3e   : > { %v835_v48 = vpop.eup %834  ;;  %673 = vst.msk [vmem:[%s1159_s11 + $0x38] sm:$0xff] %vm665_vm0, %v640_v43  ;;  %v547_v49 = vadd.f32 1.0, %v833_v41  ;;  %852 = vpow2.f32 %v511_v35  ;;  %v353_v50 = vmul.f32 %v991_v2, %v314_v36  ;;  %v316_v51 = vsub.f32 %v277_v31, %v988_v0 }
  0x3f   : > { %v837_v54 = vpop.eup %836  ;;  %854 = vrcp.f32 %v546_v44  ;;  %v548_v56 = vadd.f32 1.0, %v835_v48  ;;  %v1216_v52 = vadd.f32 %v1017_v20, %v391_v45  ;;  %v354_v59 = vmul.f32 %v991_v2, %v315_v46 }
  0x40   : > { %v839_v53 = vpop.eup %838  ;;  %v641_v60 = vmul.f32 %v837_v54, %v1085_v17  ;;  %856 = vrcp.f32 %v547_v49  ;;  %v392_v61 = vmul.f32 %v996_v3, %v353_v50  ;;  %v355_v62 = vmul.f32 %v991_v2, %v316_v51 }
  0x41   : > { %v841_v63 = vpop.eup %840  ;;  %858 = vrcp.f32 %v548_v56  ;;  %v549_v1 = vadd.f32 1.0, %v839_v53  ;;  %v462_v4 = vsub.f32 0.0, %v1216_v52  ;;  %v393_v5 = vmul.f32 %v996_v3, %v354_v59 }
  0x42   : > { %v843_v7 = vpop.eup %842  ;;  %674 = vst.msk [vmem:[%s1159_s11 + $0x40] sm:$0xff] %vm665_vm0, %v641_v60  ;;  %v550_v8 = vadd.f32 1.0, %v841_v63  ;;  %860 = vpow2.f32 %v513_v42  ;;  %v1227_v33 = vadd.f32 %v1017_v20, %v392_v61  ;;  %v394_v17 = vmul.f32 %v996_v3, %v355_v62 }
  0x43   : > { %v845_v34 = vpop.eup %844  ;;  %862 = vrcp.f32 %v549_v1  ;;  %v551_v11 = vadd.f32 1.0, %v843_v7  ;;  %v515_v58 = vmul.f32 1.442695, %v462_v4  ;;  %v1232_v12 = vadd.f32 %v1017_v20, %v393_v5 }
  0x44   : > { %v847_v37 = vpop.eup %846  ;;  %864 = vrcp.f32 %v550_v8  ;;  %v552_v6 = vadd.f32 1.0, %v845_v34  ;;  %v463_v38 = vsub.f32 0.0, %v1227_v33  ;;  %v1236_v15 = vadd.f32 %v1017_v20, %v394_v17  ;;  %v282_v17 = vld [vmem:[%s982_s26 + $0xe8] sm:$0xff] }
  0x45   : > { %v849_v16 = vpop.eup %848  ;;  %866 = vrcp.f32 %v551_v11  ;;  %v553_v18 = vadd.f32 1.0, %v847_v37  ;;  %v464_v19 = vsub.f32 0.0, %v1232_v12  ;;  %v317_v21 = vsub.f32 %v278_v9, %v988_v0 }
  0x46   : > { %v851_v24 = vpop.eup %850  ;;  %868 = vrcp.f32 %v552_v6  ;;  %v554_v25 = vadd.f32 1.0, %v849_v16  ;;  %v517_v26 = vmul.f32 1.442695, %v463_v38  ;;  %v465_v31 = vsub.f32 0.0, %v1236_v15 }
  0x47   : > { %870 = vrcp.f32 %v553_v18  ;;  %v555_v43 = vadd.f32 1.0, %v851_v24  ;;  %v519_v35 = vmul.f32 1.442695, %v464_v19  ;;  %v356_v36 = vmul.f32 %v991_v2, %v317_v21 }
  0x48   : > { %v853_v41 = vpop.eup %852  ;;  %872 = vrcp.f32 %v554_v25  ;;  %v521_v44 = vmul.f32 1.442695, %v465_v31  ;;  %v318_v42 = vsub.f32 %v279_v39, %v988_v0  ;;  %v319_v45 = vsub.f32 %v280_v23, %v988_v0  ;;  %v284_v23 = vld [vmem:[%s982_s26 + $0xf8] sm:$0xff] }
  0x49   : > { %v855_v46 = vpop.eup %854  ;;  %874 = vrcp.f32 %v555_v43  ;;  %v556_v48 = vadd.f32 1.0, %v853_v41  ;;  %v395_v49 = vmul.f32 %v996_v3, %v356_v36  ;;  %v320_v50 = vsub.f32 %v281_v32, %v988_v0 }
  0x4a   : > { %v857_v51 = vpop.eup %856  ;;  %v642_v54 = vmul.f32 %v855_v46, %v1096_v27  ;;  %876 = vpow2.f32 %v515_v58  ;;  %v357_v56 = vmul.f32 %v991_v2, %v318_v42  ;;  %v358_v59 = vmul.f32 %v991_v2, %v319_v45  ;;  %v283_v58 = vld [vmem:[%s982_s26 + $0xf0] sm:$0xff] }
  0x4b   : > { %v859_v53 = vpop.eup %858  ;;  %v643_v60 = vmul.f32 %v857_v51, %v1099_v28  ;;  %878 = vrcp.f32 %v556_v48  ;;  %v1254_v61 = vadd.f32 %v1017_v20, %v395_v49  ;;  %v359_v62 = vmul.f32 %v991_v2, %v320_v50 }
  0x4c   : > { %v861_v63 = vpop.eup %860  ;;  %675 = vst.msk [vmem:[%s1159_s11 + $0x48] sm:$0xff] %vm665_vm0, %v642_v54  ;;  %v644_v27 = vmul.f32 %v859_v53, %v1102_v29  ;;  %880 = vpow2.f32 %v517_v26  ;;  %v396_v1 = vmul.f32 %v996_v3, %v357_v56  ;;  %v397_v4 = vmul.f32 %v996_v3, %v358_v59 }
  0x4d   : > { %v863_v28 = vpop.eup %862  ;;  %676 = vst.msk [vmem:[%s1159_s11 + $0x50] sm:$0xff] %vm665_vm0, %v643_v60  ;;  %v557_v5 = vadd.f32 1.0, %v861_v63  ;;  %882 = vpow2.f32 %v519_v35  ;;  %v466_v7 = vsub.f32 0.0, %v1254_v61  ;;  %v398_v8 = vmul.f32 %v996_v3, %v359_v62 }
  0x4e   : > { %v865_v9 = vpop.eup %864  ;;  %677 = vst.msk [vmem:[%s1159_s11 + $0x58] sm:$0xff] %vm665_vm0, %v644_v27  ;;  %v645_v29 = vmul.f32 %v863_v28, %v1105_v30  ;;  %884 = vpow2.f32 %v521_v44  ;;  %v1271_v34 = vadd.f32 %v1017_v20, %v396_v1  ;;  %v1274_v11 = vadd.f32 %v1017_v20, %v397_v4 }
  0x4f   : > { %v867_v37 = vpop.eup %866  ;;  %v646_v6 = vmul.f32 %v865_v9, %v1115_v47  ;;  %886 = vrcp.f32 %v557_v5  ;;  %v523_v38 = vmul.f32 1.442695, %v466_v7  ;;  %v1279_v16 = vadd.f32 %v1017_v20, %v398_v8 }
  0x50   : > { %v869_v30 = vpop.eup %868  ;;  %678 = vst.msk [vmem:[%s1159_s11 + $0x60] sm:$0xff] %vm665_vm0, %v645_v29  ;;  %v647_v18 = vmul.f32 %v867_v37, %v1127_v10  ;;  %v467_v19 = vsub.f32 0.0, %v1271_v34  ;;  %v468_v21 = vsub.f32 0.0, %v1274_v11  ;;  %v321_v39 = vsub.f32 %v282_v17, %v988_v0 }
  0x51   : > { %v871_v47 = vpop.eup %870  ;;  %679 = vst.msk [vmem:[%s1159_s11 + $0x68] sm:$0xff] %vm665_vm0, %v646_v6  ;;  %v648_v24 = vmul.f32 %v869_v30, %v1135_v22  ;;  %888 = vpow2.f32 %v523_v38  ;;  %v469_v25 = vsub.f32 0.0, %v1279_v16  ;;  %v322_v26 = vsub.f32 %v283_v58, %v988_v0 }
  0x52   : > { %v873_v10 = vpop.eup %872  ;;  %680 = vst.msk [vmem:[%s1159_s11 + $0x70] sm:$0xff] %vm665_vm0, %v647_v18  ;;  %v649_v31 = vmul.f32 %v871_v47, %v1144_v40  ;;  %v525_v32 = vmul.f32 1.442695, %v467_v19  ;;  %v527_v43 = vmul.f32 1.442695, %v468_v21  ;;  %v360_v35 = vmul.f32 %v991_v2, %v321_v39 }
  0x53   : > { %v875_v36 = vpop.eup %874  ;;  %681 = vst.msk [vmem:[%s1159_s11 + $0x78] sm:$0xff] %vm665_vm0, %v648_v24  ;;  %v650_v22 = vmul.f32 %v873_v10, %v1152_v55  ;;  %v529_v41 = vmul.f32 1.442695, %v469_v25  ;;  %v361_v44 = vmul.f32 %v991_v2, %v322_v26  ;;  %v323_v42 = vsub.f32 %v284_v23, %v988_v0 }
  0x54   : > { %v877_v45 = vpop.eup %876  ;;  %682 = vst.msk [vmem:[%s1159_s11 + $0x80] sm:$0xff] %vm665_vm0, %v649_v31  ;;  %v651_v40 = vmul.f32 %v875_v36, %v1169_v57  ;;  %890 = vpow2.f32 %v525_v32  ;;  %v399_v46 = vmul.f32 %v996_v3, %v360_v35 }
  0x55   : > { %v879_v48 = vpop.eup %878  ;;  %683 = vst.msk [vmem:[%s1159_s11 + $0x88] sm:$0xff] %vm665_vm0, %v650_v22  ;;  %v558_v49 = vadd.f32 1.0, %v877_v45  ;;  %892 = vpow2.f32 %v527_v43  ;;  %v400_v55 = vmul.f32 %v996_v3, %v361_v44  ;;  %v362_v50 = vmul.f32 %v991_v2, %v323_v42 }
  0x56   : > { %v881_v51 = vpop.eup %880  ;;  %684 = vst.msk [vmem:[%s1159_s11 + $0x90] sm:$0xff] %vm665_vm0, %v651_v40  ;;  %v652_v0 = vmul.f32 %v879_v48, %v1182_v13  ;;  %894 = vpow2.f32 %v529_v41  ;;  %v1314_v57 = vadd.f32 %v1017_v20, %v399_v46 }
  0x57   : > { %v883_v54 = vpop.eup %882  ;;  %896 = vrcp.f32 %v558_v49  ;;  %v559_v56 = vadd.f32 1.0, %v881_v51  ;;  %v1317_v59 = vadd.f32 %v1017_v20, %v400_v55  ;;  %v401_v53 = vmul.f32 %v996_v3, %v362_v50 }
  0x58   : > { %v885_v60 = vpop.eup %884  ;;  %685 = vst.msk [vmem:[%s1159_s11 + $0x98] sm:$0xff] %vm665_vm0, %v652_v0  ;;  %v560_v2 = vadd.f32 1.0, %v883_v54  ;;  %v470_v62 = vsub.f32 0.0, %v1314_v57 }
  0x59   : > { %v887_v13 = vpop.eup %886  ;;  %898 = vrcp.f32 %v559_v56  ;;  %v561_v63 = vadd.f32 1.0, %v885_v60  ;;  %v471_v27 = vsub.f32 0.0, %v1317_v59  ;;  %v1325_v1 = vadd.f32 %v1017_v20, %v401_v53 }
  0x5a   : > { %v653_v4 = vmul.f32 %v887_v13, %v1188_v14  ;;  %900 = vrcp.f32 %v560_v2  ;;  %v531_v28 = vmul.f32 1.442695, %v470_v62 }
  0x5b   : > { %v889_v3 = vpop.eup %888  ;;  %902 = vrcp.f32 %v561_v63  ;;  %v533_v5 = vmul.f32 1.442695, %v471_v27  ;;  %v472_v7 = vsub.f32 0.0, %v1325_v1 }
  0x5c   : > { %686 = vst.msk [vmem:[%s1159_s11 + $0xa0] sm:$0xff] %vm665_vm0, %v653_v4  ;;  %v562_v8 = vadd.f32 1.0, %v889_v3  ;;  %904 = vpow2.f32 %v531_v28 }
  0x5d   : > { %906 = vpow2.f32 %v533_v5  ;;  %v535_v17 = vmul.f32 1.442695, %v472_v7 }
  0x5e   : > { %v891_v9 = vpop.eup %890  ;;  %908 = vrcp.f32 %v562_v8 }
  0x5f   : > { %v893_v20 = vpop.eup %892  ;;  %v563_v29 = vadd.f32 1.0, %v891_v9  ;;  %910 = vpow2.f32 %v535_v17 }
  0x60   : > { %v895_v14 = vpop.eup %894  ;;  %v564_v58 = vadd.f32 1.0, %v893_v20 }
  0x61   : > { %v897_v37 = vpop.eup %896  ;;  %912 = vrcp.f32 %v563_v29  ;;  %v565_v6 = vadd.f32 1.0, %v895_v14 }
  0x62   : > { %v654_v38 = vmul.f32 %v897_v37, %v1216_v52  ;;  %914 = vrcp.f32 %v564_v58 }
  0x63   : > { %v899_v30 = vpop.eup %898  ;;  %916 = vrcp.f32 %v565_v6 }
  0x64   : > { %v901_v18 = vpop.eup %900  ;;  %687 = vst.msk [vmem:[%s1159_s11 + $0xa8] sm:$0xff] %vm665_vm0, %v654_v38  ;;  %v655_v19 = vmul.f32 %v899_v30, %v1227_v33 }
  0x65   : > { %v903_v21 = vpop.eup %902  ;;  %v656_v39 = vmul.f32 %v901_v18, %v1232_v12 }
  0x66   : > { %v905_v23 = vpop.eup %904  ;;  %688 = vst.msk [vmem:[%s1159_s11 + $0xb0] sm:$0xff] %vm665_vm0, %v655_v19  ;;  %v657_v47 = vmul.f32 %v903_v21, %v1236_v15 }
  0x67   : > { %v907_v24 = vpop.eup %906  ;;  %689 = vst.msk [vmem:[%s1159_s11 + $0xb8] sm:$0xff] %vm665_vm0, %v656_v39  ;;  %v566_v52 = vadd.f32 1.0, %v905_v23 }
  0x68   : > { %v909_v25 = vpop.eup %908  ;;  %690 = vst.msk [vmem:[%s1159_s11 + $0xc0] sm:$0xff] %vm665_vm0, %v657_v47  ;;  %v567_v26 = vadd.f32 1.0, %v907_v24 }
  0x69   : > { %v911_v33 = vpop.eup %910  ;;  %v658_v12 = vmul.f32 %v909_v25, %v1254_v61  ;;  %918 = vrcp.f32 %v566_v52 }
  0x6a   : > { %920 = vrcp.f32 %v567_v26  ;;  %v568_v10 = vadd.f32 1.0, %v911_v33 }
  0x6b   : > { %v913_v31 = vpop.eup %912  ;;  %691 = vst.msk [vmem:[%s1159_s11 + $0xc8] sm:$0xff] %vm665_vm0, %v658_v12 }
  0x6c   : > { %v915_v15 = vpop.eup %914  ;;  %v659_v32 = vmul.f32 %v913_v31, %v1271_v34  ;;  %922 = vrcp.f32 %v568_v10 }
  0x6d   : > { %v917_v43 = vpop.eup %916  ;;  %v660_v35 = vmul.f32 %v915_v15, %v1274_v11 }
  0x6e   : > { %692 = vst.msk [vmem:[%s1159_s11 + $0xd0] sm:$0xff] %vm665_vm0, %v659_v32  ;;  %v661_v61 = vmul.f32 %v917_v43, %v1279_v16 }
  0x6f   : > { %693 = vst.msk [vmem:[%s1159_s11 + $0xd8] sm:$0xff] %vm665_vm0, %v660_v35 }
  0x70   : > { %694 = vst.msk [vmem:[%s1159_s11 + $0xe0] sm:$0xff] %vm665_vm0, %v661_v61 }
  0x73   : > { %v919_v36 = vpop.eup %918 }
  0x74   : > { %v921_v22 = vpop.eup %920  ;;  %v662_v41 = vmul.f32 %v919_v36, %v1314_v57 }
  0x75   : > { %v663_v44 = vmul.f32 %v921_v22, %v1317_v59 }
  0x76   : > { %v923_v34 = vpop.eup %922  ;;  %695 = vst.msk [vmem:[%s1159_s11 + $0xe8] sm:$0xff] %vm665_vm0, %v662_v41 }
  0x77   : > { %696 = vst.msk [vmem:[%s1159_s11 + $0xf0] sm:$0xff] %vm665_vm0, %v663_v44  ;;  %v664_v11 = vmul.f32 %v923_v34, %v1325_v1 }
  0x79   : > { %697 = vst.msk [vmem:[%s1159_s11 + $0xf8] sm:$0xff] %vm665_vm0, %v664_v11 }
  0x7a PF: > { %s15_s18 = sadd.s32 1, %s930_s18  }
  0x7b   : > { %p12_p4 = scmp.ge.s32.totalorder %s15_s18, 4  }
  0x7d   :  { %14 = sbr.rel (!%p12_p4) target bundleno = 1 (0x1), region = 76 }

// kernel: _apply_model.70
= control target key start
LH: loop header
LB: loop body
LE: loop exit
PB: predicated region body
PF: predicated region fallthrough
CT: control target
= control target key end

     0   :  { %s1538_s12 = smov 0   ;;  %s1540_s13 = smov 0   ;;  %s1944_s0 = inlined_call_operand.vmem [shape: f32[512,384], index: 0, kind: input, shape index: {}]   ;;  %s1945_s1 = inlined_call_operand.vmem [shape: f32[384,128], index: 1, kind: input, shape index: {}]   ;;  %s1946_s2 = inlined_call_operand.vmem [shape: f32[1,128], index: 2, kind: input, shape index: {}]   ;;  %s1947_s3 = inlined_call_operand.vmem [shape: f32[512,128], index: 3, kind: output, shape index: {}]  }
   0x1   :  { %s1542_s14 = smov 0  }
   0x2 LB: > { %s32_s15 = sadd.s32 1, %s1511_s13  ;;  %p1219_p0 = scmp.ge.s32.totalorder %s1515_s14, 1  ;;  %s1515_s14 = sphi %s1542_s14, %s13_s14   ;;  %s1511_s13 = sphi %s1540_s13, %s1949_s13   ;;  %s1507_s12 = sphi %s1538_s12, %s1948_s12  }
   0x3   : > { %p34_p1 = scmp.ge.s32.totalorder %s32_s15, 2  ;;  %p191_p2 = scmp.lt.s32.totalorder %s1515_s14, 3 }
   0x5   : > { %s1951_s15 = smov (%p34_p1, %s32_s15), 0  ;;  %p192_p3 = pnand %p1219_p0, %p191_p2 }
   0x6   : > { %v431_v0 = vld [vmem:[%s1945_s1] sm:$0xff] (!%p192_p3)  ;;  %v432_v1 = vld [vmem:[%s1945_s1 + $0x8] sm:$0xff] (!%p192_p3)  ;;  %v433_v2 = vld [vmem:[%s1945_s1 + $0x10] sm:$0xff] (!%p192_p3)  ;;  %s1220_s22 = sshll.u32 (!%p192_p3), %s1507_s12, 5  ;;  %v1517_v3 = vmov (!%p192_p3), 0.0|0.0  }
   0x7   : > { %195 = sbr.rel (%p192_p3) target bundleno = 382 (0x17e), region = 32  ;;  %1355 = vmatprep.subr.bf16.mxu0 (!%p192_p3), %v1517_v3  ;;  %1435 = vmatprep.subr.bf16.mxu1 (!%p192_p3), %v1517_v3  ;;  %v1356_v4 = vpack.c.bf16 (!%p192_p3), %v432_v1, %v431_v0  ;;  %v434_v5 = vld [vmem:[%s1945_s1 + $0x18] sm:$0xff] (!%p192_p3)  ;;  %p236_p4 = scmp.lt.s32.totalorder (!%p192_p3), %s1220_s22, 63  ;;  %v435_v7 = vld [vmem:[%s1945_s1 + $0x20] sm:$0xff] (!%p192_p3)  ;;  %v436_v8 = vld [vmem:[%s1945_s1 + $0x28] sm:$0xff] (!%p192_p3) }
   0x8   : > { %v1359_v6 = vpack.c.bf16 (!%p192_p3), %v434_v5, %v433_v2  ;;  %v1362_v9 = vpack.c.bf16 (!%p192_p3), %v436_v8, %v435_v7  ;;  %v437_v10 = vld [vmem:[%s1945_s1 + $0x30] sm:$0xff] (!%p192_p3)  ;;  %v438_v11 = vld [vmem:[%s1945_s1 + $0x38] sm:$0xff] (!%p192_p3)  ;;  %v439_v15 = vld [vmem:[%s1945_s1 + $0x40] sm:$0xff] (!%p192_p3) }
   0x9   : > { %1357 = vmatpush1.bf16.msra.mxu0 (!%p192_p3), %v1356_v4  ;;  %1451 = vmatpush1.bf16.msra.mxu1 (!%p192_p3), %v1356_v4  ;;  %v1365_v13 = vpack.c.bf16 (!%p192_p3), %v438_v11, %v437_v10  ;;  %v440_v16 = vld [vmem:[%s1945_s1 + $0x48] sm:$0xff] (!%p192_p3)  ;;  %v441_v18 = vld [vmem:[%s1945_s1 + $0x50] sm:$0xff] (!%p192_p3)  ;;  %v442_v19 = vld [vmem:[%s1945_s1 + $0x58] sm:$0xff] (!%p192_p3) }
   0xa   : > { %1358 = vmatprep.subr.bf16.mxu0 (!%p192_p3), %v1517_v3  ;;  %1436 = vmatprep.subr.bf16.mxu1 (!%p192_p3), %v1517_v3  ;;  %v1368_v17 = vpack.c.bf16 (!%p192_p3), %v440_v16, %v439_v15  ;;  %v1371_v20 = vpack.c.bf16 (!%p192_p3), %v442_v19, %v441_v18  ;;  %v443_v21 = vld [vmem:[%s1945_s1 + $0x60] sm:$0xff] (!%p192_p3)  ;;  %v444_v22 = vld [vmem:[%s1945_s1 + $0x68] sm:$0xff] (!%p192_p3)  ;;  %v445_v24 = vld [vmem:[%s1945_s1 + $0x70] sm:$0xff] (!%p192_p3) }
   0xb   : > { %v1374_v23 = vpack.c.bf16 (!%p192_p3), %v444_v22, %v443_v21  ;;  %v446_v25 = vld [vmem:[%s1945_s1 + $0x78] sm:$0xff] (!%p192_p3)  ;;  %v447_v27 = vld [vmem:[%s1945_s1 + $0x80] sm:$0xff] (!%p192_p3)  ;;  %v448_v28 = vld [vmem:[%s1945_s1 + $0x88] sm:$0xff] (!%p192_p3) }
   0xc   : > { %v1377_v26 = vpack.c.bf16 (!%p192_p3), %v446_v25, %v445_v24  ;;  %v1380_v29 = vpack.c.bf16 (!%p192_p3), %v448_v28, %v447_v27  ;;  %v449_v30 = vld [vmem:[%s1945_s1 + $0x90] sm:$0xff] (!%p192_p3)  ;;  %v450_v31 = vld [vmem:[%s1945_s1 + $0x98] sm:$0xff] (!%p192_p3)  ;;  %v451_v33 = vld [vmem:[%s1945_s1 + $0xa0] sm:$0xff] (!%p192_p3) }
   0xd   : > { %1360 = vmatpush1.bf16.msra.mxu0 (!%p192_p3), %v1359_v6  ;;  %1452 = vmatpush1.bf16.msra.mxu1 (!%p192_p3), %v1359_v6  ;;  %v1383_v32 = vpack.c.bf16 (!%p192_p3), %v450_v31, %v449_v30  ;;  %v452_v34 = vld [vmem:[%s1945_s1 + $0xa8] sm:$0xff] (!%p192_p3)  ;;  %v453_v36 = vld [vmem:[%s1945_s1 + $0xb0] sm:$0xff] (!%p192_p3)  ;;  %v454_v37 = vld [vmem:[%s1945_s1 + $0xb8] sm:$0xff] (!%p192_p3) }
   0xe   : > { %s1953_s22 = smov (!%p236_p4, %s1220_s22), 63  ;;  %1361 = vmatprep.subr.bf16.mxu0 %v1517_v3  ;;  %1437 = vmatprep.subr.bf16.mxu1 %v1517_v3  ;;  %v1386_v35 = vpack.c.bf16 %v452_v34, %v451_v33  ;;  %v1389_v38 = vpack.c.bf16 %v454_v37, %v453_v36  ;;  %v455_v39 = vld [vmem:[%s1945_s1 + $0xc0] sm:$0xff]  ;;  %v456_v40 = vld [vmem:[%s1945_s1 + $0xc8] sm:$0xff]  ;;  %v457_v42 = vld [vmem:[%s1945_s1 + $0xd0] sm:$0xff] }
   0xf   : > { %s1467_s29 = smul.u32 24, %s1953_s22  ;;  %v1392_v41 = vpack.c.bf16 %v456_v40, %v455_v39  ;;  %v458_v43 = vld [vmem:[%s1945_s1 + $0xd8] sm:$0xff]  ;;  %v459_v45 = vld [vmem:[%s1945_s1 + $0xe0] sm:$0xff]  ;;  %v460_v46 = vld [vmem:[%s1945_s1 + $0xe8] sm:$0xff] }
  0x10   : > { %v1395_v44 = vpack.c.bf16 %v458_v43, %v457_v42  ;;  %v1398_v47 = vpack.c.bf16 %v460_v46, %v459_v45  ;;  %v461_v48 = vld [vmem:[%s1945_s1 + $0xf0] sm:$0xff]  ;;  %v462_v49 = vld [vmem:[%s1945_s1 + $0xf8] sm:$0xff]  ;;  %v463_v50 = vld [vmem:[%s1945_s1 + $0x100] sm:$0xff] }
  0x11   : > { %s1584_s5 = scalar_lea.vmem %s1944_s0, %s1467_s29  ;;  %1363 = vmatpush1.bf16.msra.mxu0 %v1362_v9  ;;  %1453 = vmatpush1.bf16.msra.mxu1 %v1362_v9  ;;  %v464_v51 = vld [vmem:[%s1945_s1 + $0x108] sm:$0xff]  ;;  %v1401_v52 = vpack.c.bf16 %v462_v49, %v461_v48  ;;  %v465_v54 = vld [vmem:[%s1945_s1 + $0x110] sm:$0xff]  ;;  %v466_v55 = vld [vmem:[%s1945_s1 + $0x118] sm:$0xff] }
  0x12   : > { %v336_v12 = vld [vmem:[%s1584_s5 + $0x8] sm:$0xff]  ;;  %1364 = vmatprep.subr.bf16.mxu0 %v1517_v3  ;;  %1438 = vmatprep.subr.bf16.mxu1 %v1517_v3  ;;  %v1403_v53 = vpack.c.bf16 %v464_v51, %v463_v50  ;;  %v335_v56 = vld [vmem:[%s1584_s5] sm:$0xff]  ;;  %v1407_v59 = vpack.c.bf16 %v466_v55, %v465_v54  ;;  %v338_v63 = vld [vmem:[%s1584_s5 + $0x18] sm:$0xff] }
  0x13   : > { %v408_v14 = vld [vmem:[%s1584_s5 + $0x248] sm:$0xff]  ;;  %543 = vmatprep.mubr.f32.mxu0 %v336_v12  ;;  %v407_v57 = vld [vmem:[%s1584_s5 + $0x240] sm:$0xff]  ;;  %v410_v0 = vld [vmem:[%s1584_s5 + $0x258] sm:$0xff] }
  0x14   : > { %663 = vmatprep.mubr.f32.mxu1 %v408_v14  ;;  %v339_v58 = vld [vmem:[%s1584_s5 + $0x20] sm:$0xff]  ;;  %v468_v62 = vld [vmem:[%s1945_s1 + $0x128] sm:$0xff]  ;;  %v342_v1 = vld [vmem:[%s1584_s5 + $0x38] sm:$0xff] }
  0x15   : > { %1366 = vmatpush1.bf16.msra.mxu0 %v1365_v13  ;;  %1454 = vmatpush1.bf16.msra.mxu1 %v1365_v13  ;;  %v411_v60 = vld [vmem:[%s1584_s5 + $0x260] sm:$0xff]  ;;  %v469_v4 = vld [vmem:[%s1945_s1 + $0x130] sm:$0xff]  ;;  %v470_v5 = vld [vmem:[%s1945_s1 + $0x138] sm:$0xff] }
  0x16   : > { %1367 = vmatprep.subr.bf16.mxu0 %v1517_v3  ;;  %1439 = vmatprep.subr.bf16.mxu1 %v1517_v3  ;;  %v467_v61 = vld [vmem:[%s1945_s1 + $0x120] sm:$0xff]  ;;  %v341_v6 = vld [vmem:[%s1584_s5 + $0x30] sm:$0xff]  ;;  %v1415_v9 = vpack.c.bf16 %v470_v5, %v469_v4  ;;  %v472_v12 = vld [vmem:[%s1945_s1 + $0x148] sm:$0xff] }
  0x17   : > { %v1411_v2 = vpack.c.bf16 %v468_v62, %v467_v61  ;;  %v413_v7 = vld [vmem:[%s1584_s5 + $0x270] sm:$0xff]  ;;  %v471_v11 = vld [vmem:[%s1945_s1 + $0x140] sm:$0xff]  ;;  %v344_v13 = vld [vmem:[%s1584_s5 + $0x48] sm:$0xff] }
  0x18   : > { %v345_v8 = vld [vmem:[%s1584_s5 + $0x50] sm:$0xff]  ;;  %v416_v14 = vld [vmem:[%s1584_s5 + $0x288] sm:$0xff]  ;;  %v1419_v16 = vpack.c.bf16 %v472_v12, %v471_v11  ;;  %v474_v19 = vld [vmem:[%s1945_s1 + $0x158] sm:$0xff] }
  0x19   : > { %1369 = vmatpush1.bf16.msra.mxu0 %v1368_v17  ;;  %1455 = vmatpush1.bf16.msra.mxu1 %v1368_v17  ;;  %v417_v10 = vld [vmem:[%s1584_s5 + $0x290] sm:$0xff]  ;;  %v348_v15 = vld [vmem:[%s1584_s5 + $0x68] sm:$0xff]  ;;  %v419_v21 = vld [vmem:[%s1584_s5 + $0x2a0] sm:$0xff] }
  0x1a   : > { %1370 = vmatprep.subr.bf16.mxu0 %v1517_v3  ;;  %1440 = vmatprep.subr.bf16.mxu1 %v1517_v3  ;;  %v420_v17 = vld [vmem:[%s1584_s5 + $0x2a8] sm:$0xff]  ;;  %v473_v18 = vld [vmem:[%s1945_s1 + $0x150] sm:$0xff]  ;;  %v351_v22 = vld [vmem:[%s1584_s5 + $0x80] sm:$0xff] }
  0x1b   : > { %v423_v24 = vld [vmem:[%s1584_s5 + $0x2c0] sm:$0xff]  ;;  %v350_v27 = vld [vmem:[%s1584_s5 + $0x78] sm:$0xff]  ;;  %v353_v34 = vld [vmem:[%s1584_s5 + $0x90] sm:$0xff] }
  0x1c   : > { %v475_v25 = vld [vmem:[%s1945_s1 + $0x160] sm:$0xff]  ;;  %v422_v28 = vld [vmem:[%s1584_s5 + $0x2b8] sm:$0xff]  ;;  %v357_v36 = vld [vmem:[%s1584_s5 + $0xb0] sm:$0xff] }
  0x1d   : > { %1372 = vmatpush1.bf16.msra.mxu0 %v1371_v20  ;;  %1456 = vmatpush1.bf16.msra.mxu1 %v1371_v20  ;;  %v347_v20 = vld [vmem:[%s1584_s5 + $0x60] sm:$0xff]  ;;  %v426_v31 = vld [vmem:[%s1584_s5 + $0x2d8] sm:$0xff]  ;;  %v356_v39 = vld [vmem:[%s1584_s5 + $0xa8] sm:$0xff] }
  0x1e   : > { %1373 = vmatprep.subr.bf16.mxu0 %v1517_v3  ;;  %1441 = vmatprep.subr.bf16.mxu1 %v1517_v3  ;;  %v478_v33 = vld [vmem:[%s1945_s1 + $0x178] sm:$0xff]  ;;  %v428_v40 = vld [vmem:[%s1584_s5 + $0x2e8] sm:$0xff]  ;;  %v337_v42 = vld [vmem:[%s1584_s5 + $0x10] sm:$0xff] }
  0x1f   : > { %v359_v43 = vld [vmem:[%s1584_s5 + $0xc0] sm:$0xff]  ;;  %v346_v48 = vld [vmem:[%s1584_s5 + $0x58] sm:$0xff]  ;;  %v349_v50 = vld [vmem:[%s1584_s5 + $0x70] sm:$0xff] }
  0x20   : > { %v363_v45 = vld [vmem:[%s1584_s5 + $0xe0] sm:$0xff]  ;;  %v366_v49 = vld [vmem:[%s1584_s5 + $0xf8] sm:$0xff]  ;;  %v365_v51 = vld [vmem:[%s1584_s5 + $0xf0] sm:$0xff] }
  0x21   : > { %1375 = vmatpush1.bf16.msra.mxu0 %v1374_v23  ;;  %1457 = vmatpush1.bf16.msra.mxu1 %v1374_v23  ;;  %v1423_v23 = vpack.c.bf16 %v474_v19, %v473_v18  ;;  %v343_v46 = vld [vmem:[%s1584_s5 + $0x40] sm:$0xff]  ;;  %v368_v55 = vld [vmem:[%s1584_s5 + $0x108] sm:$0xff]  ;;  %v381_v5 = vld [vmem:[%s1584_s5 + $0x170] sm:$0xff] }
  0x22   : > { %1376 = vmatprep.subr.bf16.mxu0 %v1517_v3  ;;  %1442 = vmatprep.subr.bf16.mxu1 %v1517_v3  ;;  %v355_v54 = vld [vmem:[%s1584_s5 + $0xa0] sm:$0xff]  ;;  %v376_v4 = vld [vmem:[%s1584_s5 + $0x148] sm:$0xff]  ;;  %v397_v18 = vld [vmem:[%s1584_s5 + $0x1f0] sm:$0xff] }
  0x23   : > { %v375_v61 = vld [vmem:[%s1584_s5 + $0x140] sm:$0xff]  ;;  %v388_v12 = vld [vmem:[%s1584_s5 + $0x1a8] sm:$0xff]  ;;  %v389_v19 = vld [vmem:[%s1584_s5 + $0x1b0] sm:$0xff] }
  0x24   : > { %v367_v62 = vld [vmem:[%s1584_s5 + $0x100] sm:$0xff] }
  0x25   : > { %1378 = vmatpush1.bf16.msra.mxu0 %v1377_v26  ;;  %1458 = vmatpush1.bf16.msra.mxu1 %v1377_v26  ;;  %v476_v26 = vld [vmem:[%s1945_s1 + $0x168] sm:$0xff]  ;;  %v383_v11 = vld [vmem:[%s1584_s5 + $0x180] sm:$0xff] }
  0x26   : > { %1379 = vmatprep.subr.bf16.mxu0 %v1517_v3  ;;  %1443 = vmatprep.subr.bf16.mxu1 %v1517_v3  ;;  %v1427_v30 = vpack.c.bf16 %v476_v26, %v475_v25  ;;  %v396_v25 = vld [vmem:[%s1584_s5 + $0x1e8] sm:$0xff]  ;;  %v409_v26 = vld [vmem:[%s1584_s5 + $0x250] sm:$0xff] }
  0x29   : > { %1381 = vmatpush1.bf16.msra.mxu0 %v1380_v29  ;;  %1459 = vmatpush1.bf16.msra.mxu1 %v1380_v29  ;;  %v354_v29 = vld [vmem:[%s1584_s5 + $0x98] sm:$0xff] }
  0x2a   : > { %1382 = vmatprep.subr.bf16.mxu0 %v1517_v3  ;;  %1444 = vmatprep.subr.bf16.mxu1 %v1517_v3 }
  0x2d   : > { %1384 = vmatpush1.bf16.msra.mxu0 %v1383_v32  ;;  %1460 = vmatpush1.bf16.msra.mxu1 %v1383_v32  ;;  %v477_v32 = vld [vmem:[%s1945_s1 + $0x170] sm:$0xff] }
  0x2e   : > { %1385 = vmatprep.subr.bf16.mxu0 %v1517_v3  ;;  %1445 = vmatprep.subr.bf16.mxu1 %v1517_v3  ;;  %v1431_v37 = vpack.c.bf16 %v478_v33, %v477_v32  ;;  %v418_v32 = vld [vmem:[%s1584_s5 + $0x298] sm:$0xff] }
  0x2f   : > { %v402_v33 = vld [vmem:[%s1584_s5 + $0x218] sm:$0xff] }
  0x31   : > { %1387 = vmatpush1.bf16.msra.mxu0 %v1386_v35  ;;  %1461 = vmatpush1.bf16.msra.mxu1 %v1386_v35  ;;  %v425_v35 = vld [vmem:[%s1584_s5 + $0x2d0] sm:$0xff] }
  0x32   : > { %1388 = vmatprep.subr.bf16.mxu0 %v1517_v3  ;;  %1446 = vmatprep.subr.bf16.mxu1 %v1517_v3 }
  0x35   : > { %1390 = vmatpush1.bf16.msra.mxu0 %v1389_v38  ;;  %1462 = vmatpush1.bf16.msra.mxu1 %v1389_v38  ;;  %v429_v38 = vld [vmem:[%s1584_s5 + $0x2f0] sm:$0xff] }
  0x36   : > { %1391 = vmatprep.subr.bf16.mxu0 %v1517_v3  ;;  %1447 = vmatprep.subr.bf16.mxu1 %v1517_v3 }
  0x39   : > { %1393 = vmatpush1.bf16.msra.mxu0 %v1392_v41  ;;  %1463 = vmatpush1.bf16.msra.mxu1 %v1392_v41  ;;  %v360_v41 = vld [vmem:[%s1584_s5 + $0xc8] sm:$0xff] }
  0x3a   : > { %1394 = vmatprep.subr.bf16.mxu0 %v1517_v3  ;;  %1448 = vmatprep.subr.bf16.mxu1 %v1517_v3 }
  0x3d   : > { %1396 = vmatpush1.bf16.msra.mxu0 %v1395_v44  ;;  %1464 = vmatpush1.bf16.msra.mxu1 %v1395_v44  ;;  %v340_v44 = vld [vmem:[%s1584_s5 + $0x28] sm:$0xff] }
  0x3e   : > { %1397 = vmatprep.subr.bf16.mxu0 %v1517_v3  ;;  %1449 = vmatprep.subr.bf16.mxu1 %v1517_v3 }
  0x41   : > { %1399 = vmatpush1.bf16.msra.mxu0 %v1398_v47  ;;  %1465 = vmatpush1.bf16.msra.mxu1 %v1398_v47  ;;  %v362_v47 = vld [vmem:[%s1584_s5 + $0xd8] sm:$0xff] }
  0x42   : > { %1400 = vmatprep.subr.bf16.mxu0 %v1517_v3  ;;  %1450 = vmatprep.subr.bf16.mxu1 %v1517_v3  ;;  %v414_v3 = vld [vmem:[%s1584_s5 + $0x278] sm:$0xff] }
  0x45   : > { %1402 = vmatpush1.bf16.msra.mxu0 %v1401_v52  ;;  %1466 = vmatpush1.bf16.msra.mxu1 %v1401_v52  ;;  %v352_v52 = vld [vmem:[%s1584_s5 + $0x88] sm:$0xff] }
  0x46   : > { %1404 = vmatprep.subr.bf16.mxu1 %v1403_v53 }
  0x48   : > { %544 = vmatmul.mubr.f32.vlgmr.msra.gmra.mrb[0].mxu0 %v335_v56  ;;  %664 = vmatmul.mubr.f32.vlgmr.msra.gmra.mrb[0].mxu1 %v407_v57  ;;  %v358_v56 = vld [vmem:[%s1584_s5 + $0xb8] sm:$0xff]  ;;  %v372_v57 = vld [vmem:[%s1584_s5 + $0x128] sm:$0xff] }
  0x49   : > { %1406 = vmatpush3.bf16.msra.mxu1 %v1403_v53  ;;  %548 = vmatprep.mubr.f32.mxu0 %v339_v58  ;;  %v369_v53 = vld [vmem:[%s1584_s5 + $0x110] sm:$0xff] }
  0x4a   : > { %668 = vmatprep.mubr.f32.mxu1 %v411_v60  ;;  %1408 = vmatprep.subr.bf16.mxu1 %v1407_v59  ;;  %v361_v58 = vld [vmem:[%s1584_s5 + $0xd0] sm:$0xff]  ;;  %v364_v60 = vld [vmem:[%s1584_s5 + $0xe8] sm:$0xff] }
  0x4c   : > { %549 = vmatmul.mubr.f32.gmra.mrb[2].mxu0 %v338_v63  ;;  %669 = vmatmul.mubr.f32.gmra.mrb[2].mxu1 %v410_v0  ;;  %v374_v63 = vld [vmem:[%s1584_s5 + $0x138] sm:$0xff] }
  0x4d   : > { %1410 = vmatpush3.bf16.msra.mxu1 %v1407_v59  ;;  %553 = vmatprep.mubr.f32.mxu0 %v342_v1  ;;  %v371_v59 = vld [vmem:[%s1584_s5 + $0x120] sm:$0xff]  ;;  %v370_v0 = vld [vmem:[%s1584_s5 + $0x118] sm:$0xff] }
  0x4e   : > { %673 = vmatprep.mubr.f32.mxu1 %v414_v3  ;;  %1412 = vmatprep.subr.bf16.mxu1 %v1411_v2  ;;  %v378_v1 = vld [vmem:[%s1584_s5 + $0x158] sm:$0xff]  ;;  %v377_v3 = vld [vmem:[%s1584_s5 + $0x150] sm:$0xff] }
  0x50   : > { %554 = vmatmul.mubr.f32.gmra.mrb[4].mxu0 %v341_v6  ;;  %674 = vmatmul.mubr.f32.gmra.mrb[4].mxu1 %v413_v7  ;;  %v379_v6 = vld [vmem:[%s1584_s5 + $0x160] sm:$0xff]  ;;  %v380_v7 = vld [vmem:[%s1584_s5 + $0x168] sm:$0xff] }
  0x51   : > { %1414 = vmatpush3.bf16.msra.mxu1 %v1411_v2  ;;  %558 = vmatprep.mubr.f32.mxu0 %v345_v8  ;;  %v373_v2 = vld [vmem:[%s1584_s5 + $0x130] sm:$0xff]  ;;  %v382_v8 = vld [vmem:[%s1584_s5 + $0x178] sm:$0xff] }
  0x52   : > { %678 = vmatprep.mubr.f32.mxu1 %v417_v10  ;;  %1416 = vmatprep.subr.bf16.mxu1 %v1415_v9  ;;  %v385_v10 = vld [vmem:[%s1584_s5 + $0x190] sm:$0xff] }
  0x54   : > { %559 = vmatmul.mubr.f32.gmra.mrb[6].mxu0 %v344_v13  ;;  %679 = vmatmul.mubr.f32.gmra.mrb[6].mxu1 %v416_v14  ;;  %v387_v13 = vld [vmem:[%s1584_s5 + $0x1a0] sm:$0xff] }
  0x55   : > { %1418 = vmatpush3.bf16.msra.mxu1 %v1415_v9  ;;  %563 = vmatprep.mubr.f32.mxu0 %v348_v15  ;;  %v384_v9 = vld [vmem:[%s1584_s5 + $0x188] sm:$0xff]  ;;  %v391_v14 = vld [vmem:[%s1584_s5 + $0x1c0] sm:$0xff]  ;;  %v386_v15 = vld [vmem:[%s1584_s5 + $0x198] sm:$0xff] }
  0x56   : > { %683 = vmatprep.mubr.f32.mxu1 %v420_v17  ;;  %1420 = vmatprep.subr.bf16.mxu1 %v1419_v16  ;;  %v390_v17 = vld [vmem:[%s1584_s5 + $0x1b8] sm:$0xff] }
  0x58   : > { %564 = vmatmul.mubr.f32.gmra.mrb[8].mxu0 %v347_v20  ;;  %684 = vmatmul.mubr.f32.gmra.mrb[8].mxu1 %v419_v21  ;;  %v400_v20 = vld [vmem:[%s1584_s5 + $0x208] sm:$0xff]  ;;  %v393_v21 = vld [vmem:[%s1584_s5 + $0x1d0] sm:$0xff] }
  0x59   : > { %1422 = vmatpush3.bf16.msra.mxu1 %v1419_v16  ;;  %568 = vmatprep.mubr.f32.mxu0 %v351_v22  ;;  %v394_v16 = vld [vmem:[%s1584_s5 + $0x1d8] sm:$0xff]  ;;  %v403_v22 = vld [vmem:[%s1584_s5 + $0x220] sm:$0xff] }
  0x5a   : > { %688 = vmatprep.mubr.f32.mxu1 %v423_v24  ;;  %1424 = vmatprep.subr.bf16.mxu1 %v1423_v23  ;;  %v406_v24 = vld [vmem:[%s1584_s5 + $0x238] sm:$0xff] }
  0x5c   : > { %569 = vmatmul.mubr.f32.gmra.mrb[10].mxu0 %v350_v27  ;;  %689 = vmatmul.mubr.f32.gmra.mrb[10].mxu1 %v422_v28  ;;  %v395_v27 = vld [vmem:[%s1584_s5 + $0x1e0] sm:$0xff]  ;;  %v412_v28 = vld [vmem:[%s1584_s5 + $0x268] sm:$0xff] }
  0x5d   : > { %1426 = vmatpush3.bf16.msra.mxu1 %v1423_v23  ;;  %573 = vmatprep.mubr.f32.mxu0 %v354_v29  ;;  %v392_v23 = vld [vmem:[%s1584_s5 + $0x1c8] sm:$0xff]  ;;  %v399_v29 = vld [vmem:[%s1584_s5 + $0x200] sm:$0xff] }
  0x5e   : > { %693 = vmatprep.mubr.f32.mxu1 %v426_v31  ;;  %1428 = vmatprep.subr.bf16.mxu1 %v1427_v30  ;;  %v398_v31 = vld [vmem:[%s1584_s5 + $0x1f8] sm:$0xff] }
  0x60   : > { %574 = vmatmul.mubr.f32.gmra.mrb[12].mxu0 %v353_v34  ;;  %694 = vmatmul.mubr.f32.gmra.mrb[12].mxu1 %v425_v35  ;;  %v421_v34 = vld [vmem:[%s1584_s5 + $0x2b0] sm:$0xff] }
  0x61   : > { %1430 = vmatpush3.bf16.msra.mxu1 %v1427_v30  ;;  %578 = vmatprep.mubr.f32.mxu0 %v357_v36  ;;  %v415_v30 = vld [vmem:[%s1584_s5 + $0x280] sm:$0xff]  ;;  %v401_v35 = vld [vmem:[%s1584_s5 + $0x210] sm:$0xff]  ;;  %v424_v36 = vld [vmem:[%s1584_s5 + $0x2c8] sm:$0xff] }
  0x62   : > { %698 = vmatprep.mubr.f32.mxu1 %v429_v38  ;;  %1432 = vmatprep.subr.bf16.mxu1 %v1431_v37  ;;  %v427_v38 = vld [vmem:[%s1584_s5 + $0x2e0] sm:$0xff] }
  0x64   : > { %579 = vmatmul.mubr.f32.gmra.mrb[14].mxu0 %v356_v39  ;;  %699 = vmatmul.mubr.f32.gmra.mrb[14].mxu1 %v428_v40  ;;  %v404_v39 = vld [vmem:[%s1584_s5 + $0x228] sm:$0xff]  ;;  %v430_v40 = vld [vmem:[%s1584_s5 + $0x2f8] sm:$0xff] }
  0x65   : > { %1434 = vmatpush3.bf16.msra.mxu1 %v1431_v37  ;;  %583 = vmatprep.mubr.f32.mxu0 %v360_v41  ;;  %v405_v37 = vld [vmem:[%s1584_s5 + $0x230] sm:$0xff]  ;;  %s1223_s5 = sshll.u32 %s1953_s22, 3 }
  0x66   : > { %1307 = vmatprep.mubr.f32.mxu1 %v337_v42  ;;  %s1861_s6 = scalar_lea.vmem %s1947_s3, %s1223_s5 }
  0x68   : > { %584 = vmatmul.mubr.f32.gmra.mrb[16].mxu0 %v359_v43  ;;  %1308 = vmatmul.mubr.f32.vlgmr.msra.gmra.mrb[16].mxu1 %v340_v44 }
  0x69   : > { %588 = vmatprep.mubr.f32.mxu0 %v363_v45  ;;  %1310 = vmatprep.mubr.f32.mxu1 %v343_v46 }
  0x6c   : > { %589 = vmatmul.mubr.f32.gmra.mrb[18].mxu0 %v362_v47  ;;  %1311 = vmatmul.mubr.f32.gmra.mrb[18].mxu1 %v346_v48 }
  0x6d   : > { %593 = vmatprep.mubr.f32.mxu0 %v366_v49  ;;  %1313 = vmatprep.mubr.f32.mxu1 %v349_v50 }
  0x70   : > { %594 = vmatmul.mubr.f32.gmra.mrb[20].mxu0 %v365_v51  ;;  %1314 = vmatmul.mubr.f32.gmra.mrb[20].mxu1 %v352_v52 }
  0x71   : > { %598 = vmatprep.mubr.f32.mxu0 %v369_v53  ;;  %1316 = vmatprep.mubr.f32.mxu1 %v355_v54 }
  0x74   : > { %599 = vmatmul.mubr.f32.gmra.mrb[22].mxu0 %v368_v55  ;;  %1317 = vmatmul.mubr.f32.gmra.mrb[22].mxu1 %v358_v56 }
  0x75   : > { %603 = vmatprep.mubr.f32.mxu0 %v372_v57  ;;  %1319 = vmatprep.mubr.f32.mxu1 %v361_v58 }
  0x78   : > { %604 = vmatmul.mubr.f32.gmra.mrb[24].mxu0 %v371_v59  ;;  %1320 = vmatmul.mubr.f32.gmra.mrb[24].mxu1 %v364_v60 }
  0x79   : > { %608 = vmatprep.mubr.f32.mxu0 %v375_v61  ;;  %1322 = vmatprep.mubr.f32.mxu1 %v367_v62 }
  0x7c   : > { %609 = vmatmul.mubr.f32.gmra.mrb[26].mxu0 %v374_v63  ;;  %1323 = vmatmul.mubr.f32.gmra.mrb[26].mxu1 %v370_v0 }
  0x7d   : > { %613 = vmatprep.mubr.f32.mxu0 %v378_v1  ;;  %1325 = vmatprep.mubr.f32.mxu1 %v373_v2 }
  0x80   : > { %614 = vmatmul.mubr.f32.gmra.mrb[28].mxu0 %v377_v3  ;;  %1326 = vmatmul.mubr.f32.gmra.mrb[28].mxu1 %v376_v4 }
  0x81   : > { %618 = vmatprep.mubr.f32.mxu0 %v381_v5  ;;  %1328 = vmatprep.mubr.f32.mxu1 %v379_v6 }
  0x84   : > { %619 = vmatmul.mubr.f32.gmra.mrb[30].mxu0 %v380_v7  ;;  %1329 = vmatmul.mubr.f32.gmra.mrb[30].mxu1 %v382_v8 }
  0x85   : > { %623 = vmatprep.mubr.f32.mxu0 %v384_v9  ;;  %1331 = vmatprep.mubr.f32.mxu1 %v385_v10  ;;  %v1856_v10 = vld [vmem:[%s1946_s2] ss:$0 sm:$0xff] }
  0x88   : > { %624 = vmatmul.mubr.f32.gmra.mrb[32].mxu0 %v383_v11  ;;  %1332 = vmatmul.mubr.f32.gmra.mrb[32].mxu1 %v388_v12 }
  0x89   : > { %628 = vmatprep.mubr.f32.mxu0 %v387_v13  ;;  %1334 = vmatprep.mubr.f32.mxu1 %v391_v14 }
  0x8c   : > { %629 = vmatmul.mubr.f32.gmra.mrb[34].mxu0 %v386_v15  ;;  %1335 = vmatmul.mubr.f32.gmra.mrb[34].mxu1 %v394_v16 }
  0x8d   : > { %633 = vmatprep.mubr.f32.mxu0 %v390_v17  ;;  %1337 = vmatprep.mubr.f32.mxu1 %v397_v18 }
  0x90   : > { %634 = vmatmul.mubr.f32.gmra.mrb[36].mxu0 %v389_v19  ;;  %1338 = vmatmul.mubr.f32.gmra.mrb[36].mxu1 %v400_v20 }
  0x91   : > { %638 = vmatprep.mubr.f32.mxu0 %v393_v21  ;;  %1340 = vmatprep.mubr.f32.mxu1 %v403_v22 }
  0x94   : > { %639 = vmatmul.mubr.f32.gmra.mrb[38].mxu0 %v392_v23  ;;  %1341 = vmatmul.mubr.f32.gmra.mrb[38].mxu1 %v406_v24 }
  0x95   : > { %643 = vmatprep.mubr.f32.mxu0 %v396_v25  ;;  %1343 = vmatprep.mubr.f32.mxu1 %v409_v26 }
  0x98   : > { %644 = vmatmul.mubr.f32.gmra.mrb[40].mxu0 %v395_v27  ;;  %1344 = vmatmul.mubr.f32.gmra.mrb[40].mxu1 %v412_v28 }
  0x99   : > { %648 = vmatprep.mubr.f32.mxu0 %v399_v29  ;;  %1346 = vmatprep.mubr.f32.mxu1 %v415_v30 }
  0x9c   : > { %649 = vmatmul.mubr.f32.gmra.mrb[42].mxu0 %v398_v31  ;;  %1347 = vmatmul.mubr.f32.gmra.mrb[42].mxu1 %v418_v32 }
  0x9d   : > { %653 = vmatprep.mubr.f32.mxu0 %v402_v33  ;;  %1349 = vmatprep.mubr.f32.mxu1 %v421_v34 }
  0xa0   : > { %654 = vmatmul.mubr.f32.gmra.mrb[44].mxu0 %v401_v35  ;;  %1350 = vmatmul.mubr.f32.gmra.mrb[44].mxu1 %v424_v36 }
  0xa1   : > { %658 = vmatprep.mubr.f32.mxu0 %v405_v37  ;;  %1352 = vmatprep.mubr.f32.mxu1 %v427_v38 }
  0xa4   : > { %659 = vmatmul.mubr.f32.gmra.mrb[46].mxu0 %v404_v39  ;;  %1353 = vmatmul.mubr.f32.gmra.mrb[46].mxu1 %v430_v40 }
 0x11b   : > { %v1836_v41 = vpop.f32.mrb[0].mxu1  ;;  %v545_v42 = vpop.f32.mrb[0].mxu0 }
 0x11c   : > { %v667_v43 = vpop.f32.mrb[1].mxu1  ;;  %v547_v44 = vpop.f32.mrb[1].mxu0 }
 0x11f   : > { %v1838_v45 = vpop.f32.mrb[2].mxu1  ;;  %v550_v46 = vpop.f32.mrb[2].mxu0 }
 0x120   : > { %v672_v47 = vpop.f32.mrb[3].mxu1  ;;  %v552_v48 = vpop.f32.mrb[3].mxu0 }
 0x123   : > { %v1840_v49 = vpop.f32.mrb[4].mxu1  ;;  %v555_v50 = vpop.f32.mrb[4].mxu0 }
 0x124   : > { %v677_v51 = vpop.f32.mrb[5].mxu1  ;;  %v557_v52 = vpop.f32.mrb[5].mxu0 }
 0x127   : > { %v1842_v53 = vpop.f32.mrb[6].mxu1  ;;  %v560_v54 = vpop.f32.mrb[6].mxu0 }
 0x128   : > { %v682_v55 = vpop.f32.mrb[7].mxu1  ;;  %v562_v56 = vpop.f32.mrb[7].mxu0 }
 0x12b   : > { %v1844_v57 = vpop.f32.mrb[8].mxu1  ;;  %v565_v58 = vpop.f32.mrb[8].mxu0 }
 0x12c   : > { %v687_v59 = vpop.f32.mrb[9].mxu1  ;;  %v567_v60 = vpop.f32.mrb[9].mxu0 }
 0x12f   : > { %v1846_v61 = vpop.f32.mrb[10].mxu1  ;;  %v570_v62 = vpop.f32.mrb[10].mxu0 }
 0x130   : > { %v692_v63 = vpop.f32.mrb[11].mxu1  ;;  %v572_v0 = vpop.f32.mrb[11].mxu0 }
 0x133   : > { %v1848_v1 = vpop.f32.mrb[12].mxu1  ;;  %v575_v2 = vpop.f32.mrb[12].mxu0 }
 0x134   : > { %v697_v3 = vpop.f32.mrb[13].mxu1  ;;  %v577_v4 = vpop.f32.mrb[13].mxu0 }
 0x137   : > { %v1850_v5 = vpop.f32.mrb[14].mxu1  ;;  %v580_v6 = vpop.f32.mrb[14].mxu0 }
 0x138   : > { %v702_v7 = vpop.f32.mrb[15].mxu1  ;;  %v582_v8 = vpop.f32.mrb[15].mxu0 }
 0x13b   : > { %v1309_v9 = vpop.f32.mrb[16].mxu1  ;;  %v585_v11 = vpop.f32.mrb[16].mxu0 }
 0x13c   : > { %v776_v12 = vadd.f32 %v1309_v9, %v550_v46  ;;  %v770_v13 = vpop.f32.mrb[17].mxu1  ;;  %v587_v14 = vpop.f32.mrb[17].mxu0 }
 0x13d   : > { %v771_v15 = vadd.f32 %v770_v13, %v545_v42 }
 0x13e   : > { %v1036_v16 = vadd.f32 %v1856_v10, %v776_v12 }
 0x13f   : > { %v1035_v17 = vadd.f32 %v1856_v10, %v771_v15  ;;  %v1312_v18 = vpop.f32.mrb[18].mxu1  ;;  %v590_v19 = vpop.f32.mrb[18].mxu0 }
 0x140   : > { %1068 = vst [vmem:[%s1861_s6 + $0x8] sm:$0xff] %v1036_v16  ;;  %v786_v20 = vadd.f32 %v1312_v18, %v560_v54  ;;  %v780_v21 = vpop.f32.mrb[19].mxu1  ;;  %v592_v22 = vpop.f32.mrb[19].mxu0 }
 0x141   : > { %1067 = vst [vmem:[%s1861_s6] sm:$0xff] %v1035_v17  ;;  %v781_v23 = vadd.f32 %v780_v21, %v555_v50 }
 0x142   : > { %v1038_v24 = vadd.f32 %v1856_v10, %v786_v20 }
 0x143   : > { %v1037_v25 = vadd.f32 %v1856_v10, %v781_v23  ;;  %v1315_v26 = vpop.f32.mrb[20].mxu1  ;;  %v595_v27 = vpop.f32.mrb[20].mxu0 }
 0x144   : > { %1070 = vst [vmem:[%s1861_s6 + $0x18] sm:$0xff] %v1038_v24  ;;  %v796_v28 = vadd.f32 %v1315_v26, %v570_v62  ;;  %v790_v29 = vpop.f32.mrb[21].mxu1  ;;  %v597_v30 = vpop.f32.mrb[21].mxu0 }
 0x145   : > { %1069 = vst [vmem:[%s1861_s6 + $0x10] sm:$0xff] %v1037_v25  ;;  %v791_v31 = vadd.f32 %v790_v29, %v565_v58 }
 0x146   : > { %v1040_v32 = vadd.f32 %v1856_v10, %v796_v28 }
 0x147   : > { %v1039_v33 = vadd.f32 %v1856_v10, %v791_v31  ;;  %v1318_v34 = vpop.f32.mrb[22].mxu1  ;;  %v600_v35 = vpop.f32.mrb[22].mxu0 }
 0x148   : > { %1072 = vst [vmem:[%s1861_s6 + $0x28] sm:$0xff] %v1040_v32  ;;  %v806_v36 = vadd.f32 %v1318_v34, %v580_v6  ;;  %v800_v37 = vpop.f32.mrb[23].mxu1  ;;  %v602_v38 = vpop.f32.mrb[23].mxu0 }
 0x149   : > { %1071 = vst [vmem:[%s1861_s6 + $0x20] sm:$0xff] %v1039_v33  ;;  %v801_v39 = vadd.f32 %v800_v37, %v575_v2 }
 0x14a   : > { %v1042_v40 = vadd.f32 %v1856_v10, %v806_v36 }
 0x14b   : > { %v1041_v42 = vadd.f32 %v1856_v10, %v801_v39  ;;  %v1321_v43 = vpop.f32.mrb[24].mxu1  ;;  %v605_v44 = vpop.f32.mrb[24].mxu0 }
 0x14c   : > { %1074 = vst [vmem:[%s1861_s6 + $0x38] sm:$0xff] %v1042_v40  ;;  %v816_v46 = vadd.f32 %v1321_v43, %v590_v19  ;;  %v810_v47 = vpop.f32.mrb[25].mxu1  ;;  %v607_v48 = vpop.f32.mrb[25].mxu0 }
 0x14d   : > { %1073 = vst [vmem:[%s1861_s6 + $0x30] sm:$0xff] %v1041_v42  ;;  %v811_v50 = vadd.f32 %v810_v47, %v585_v11 }
 0x14e   : > { %v1044_v51 = vadd.f32 %v1856_v10, %v816_v46 }
 0x14f   : > { %v1043_v52 = vadd.f32 %v1856_v10, %v811_v50  ;;  %v1324_v54 = vpop.f32.mrb[26].mxu1  ;;  %v610_v55 = vpop.f32.mrb[26].mxu0 }
 0x150   : > { %1076 = vst [vmem:[%s1861_s6 + $0x48] sm:$0xff] %v1044_v51  ;;  %v826_v56 = vadd.f32 %v1324_v54, %v600_v35  ;;  %v820_v58 = vpop.f32.mrb[27].mxu1  ;;  %v612_v59 = vpop.f32.mrb[27].mxu0 }
 0x151   : > { %1075 = vst [vmem:[%s1861_s6 + $0x40] sm:$0xff] %v1043_v52  ;;  %v821_v60 = vadd.f32 %v820_v58, %v595_v27 }
 0x152   : > { %v1046_v62 = vadd.f32 %v1856_v10, %v826_v56 }
 0x153   : > { %v1045_v63 = vadd.f32 %v1856_v10, %v821_v60  ;;  %v1327_v0 = vpop.f32.mrb[28].mxu1  ;;  %v615_v2 = vpop.f32.mrb[28].mxu0 }
 0x154   : > { %1078 = vst [vmem:[%s1861_s6 + $0x58] sm:$0xff] %v1046_v62  ;;  %v836_v3 = vadd.f32 %v1327_v0, %v610_v55  ;;  %v830_v4 = vpop.f32.mrb[29].mxu1  ;;  %v617_v6 = vpop.f32.mrb[29].mxu0 }
 0x155   : > { %1077 = vst [vmem:[%s1861_s6 + $0x50] sm:$0xff] %v1045_v63  ;;  %v831_v7 = vadd.f32 %v830_v4, %v605_v44 }
 0x156   : > { %v1048_v8 = vadd.f32 %v1856_v10, %v836_v3 }
 0x157   : > { %v1047_v9 = vadd.f32 %v1856_v10, %v831_v7  ;;  %v1330_v11 = vpop.f32.mrb[30].mxu1  ;;  %v620_v12 = vpop.f32.mrb[30].mxu0 }
 0x158   : > { %1080 = vst [vmem:[%s1861_s6 + $0x68] sm:$0xff] %v1048_v8  ;;  %v846_v13 = vadd.f32 %v1330_v11, %v620_v12  ;;  %v840_v14 = vpop.f32.mrb[31].mxu1  ;;  %v622_v15 = vpop.f32.mrb[31].mxu0 }
 0x159   : > { %1079 = vst [vmem:[%s1861_s6 + $0x60] sm:$0xff] %v1047_v9  ;;  %v841_v16 = vadd.f32 %v840_v14, %v615_v2 }
 0x15a   : > { %v1050_v17 = vadd.f32 %v1856_v10, %v846_v13 }
 0x15b   : > { %v1049_v18 = vadd.f32 %v1856_v10, %v841_v16  ;;  %v1333_v19 = vpop.f32.mrb[32].mxu1  ;;  %v625_v20 = vpop.f32.mrb[32].mxu0 }
 0x15c   : > { %1082 = vst [vmem:[%s1861_s6 + $0x78] sm:$0xff] %v1050_v17  ;;  %v850_v21 = vpop.f32.mrb[33].mxu1  ;;  %v627_v22 = vpop.f32.mrb[33].mxu0 }
 0x15d   : > { %1081 = vst [vmem:[%s1861_s6 + $0x70] sm:$0xff] %v1049_v18  ;;  %v851_v23 = vadd.f32 %v850_v21, %v625_v20 }
 0x15f   : > { %v1051_v24 = vadd.f32 %v1856_v10, %v851_v23  ;;  %v630_v25 = vpop.f32.mrb[34].mxu0  ;;  %v1336_v26 = vpop.f32.mrb[34].mxu1 }
 0x160   : > { %v856_v27 = vadd.f32 %v1333_v19, %v630_v25  ;;  %v860_v28 = vpop.f32.mrb[35].mxu1  ;;  %v632_v29 = vpop.f32.mrb[35].mxu0 }
 0x161   : > { %1083 = vst [vmem:[%s1861_s6 + $0x80] sm:$0xff] %v1051_v24 }
 0x162   : > { %v1052_v30 = vadd.f32 %v1856_v10, %v856_v27 }
 0x163   : > { %v635_v31 = vpop.f32.mrb[36].mxu0  ;;  %v1339_v32 = vpop.f32.mrb[36].mxu1 }
 0x164   : > { %1084 = vst [vmem:[%s1861_s6 + $0x88] sm:$0xff] %v1052_v30  ;;  %v861_v33 = vadd.f32 %v860_v28, %v635_v31  ;;  %v870_v34 = vpop.f32.mrb[37].mxu1  ;;  %v637_v35 = vpop.f32.mrb[37].mxu0 }
 0x166   : > { %v1053_v36 = vadd.f32 %v1856_v10, %v861_v33 }
 0x167   : > { %v640_v37 = vpop.f32.mrb[38].mxu0  ;;  %v1342_v38 = vpop.f32.mrb[38].mxu1 }
 0x168   : > { %1085 = vst [vmem:[%s1861_s6 + $0x90] sm:$0xff] %v1053_v36  ;;  %v866_v39 = vadd.f32 %v1336_v26, %v640_v37  ;;  %v880_v40 = vpop.f32.mrb[39].mxu1  ;;  %v642_v42 = vpop.f32.mrb[39].mxu0 }
 0x16a   : > { %v1054_v43 = vadd.f32 %v1856_v10, %v866_v39 }
 0x16b   : > { %v645_v44 = vpop.f32.mrb[40].mxu0  ;;  %v1345_v46 = vpop.f32.mrb[40].mxu1 }
 0x16c   : > { %1086 = vst [vmem:[%s1861_s6 + $0x98] sm:$0xff] %v1054_v43  ;;  %v871_v47 = vadd.f32 %v870_v34, %v645_v44  ;;  %v896_v48 = vadd.f32 %v1345_v46, %v1838_v45  ;;  %v890_v50 = vpop.f32.mrb[41].mxu1  ;;  %v647_v51 = vpop.f32.mrb[41].mxu0 }
 0x16d   : > { %v891_v52 = vadd.f32 %v890_v50, %v1836_v41 }
 0x16e   : > { %v1055_v54 = vadd.f32 %v1856_v10, %v871_v47  ;;  %v1060_v55 = vadd.f32 %v1856_v10, %v896_v48 }
 0x16f   : > { %v1059_v56 = vadd.f32 %v1856_v10, %v891_v52  ;;  %v650_v58 = vpop.f32.mrb[42].mxu0  ;;  %v1348_v59 = vpop.f32.mrb[42].mxu1 }
 0x170   : > { %1087 = vst [vmem:[%s1861_s6 + $0xa0] sm:$0xff] %v1055_v54  ;;  %1092 = vst [vmem:[%s1861_s6 + $0xc8] sm:$0xff] %v1060_v55  ;;  %v876_v60 = vadd.f32 %v1339_v32, %v650_v58  ;;  %v906_v62 = vadd.f32 %v1348_v59, %v1842_v53  ;;  %v900_v45 = vpop.f32.mrb[43].mxu1  ;;  %v652_v63 = vpop.f32.mrb[43].mxu0 }
 0x171   : > { %1091 = vst [vmem:[%s1861_s6 + $0xc0] sm:$0xff] %v1059_v56  ;;  %v901_v41 = vadd.f32 %v900_v45, %v1840_v49 }
 0x172   : > { %v1056_v0 = vadd.f32 %v1856_v10, %v876_v60  ;;  %v1062_v2 = vadd.f32 %v1856_v10, %v906_v62 }
 0x173   : > { %v1061_v3 = vadd.f32 %v1856_v10, %v901_v41  ;;  %v655_v4 = vpop.f32.mrb[44].mxu0  ;;  %v1351_v6 = vpop.f32.mrb[44].mxu1 }
 0x174   : > { %1088 = vst [vmem:[%s1861_s6 + $0xa8] sm:$0xff] %v1056_v0  ;;  %1094 = vst [vmem:[%s1861_s6 + $0xd8] sm:$0xff] %v1062_v2  ;;  %v881_v7 = vadd.f32 %v880_v40, %v655_v4  ;;  %v916_v53 = vadd.f32 %v1351_v6, %v1846_v61  ;;  %v910_v8 = vpop.f32.mrb[45].mxu1  ;;  %v657_v9 = vpop.f32.mrb[45].mxu0 }
 0x175   : > { %1093 = vst [vmem:[%s1861_s6 + $0xd0] sm:$0xff] %v1061_v3  ;;  %v911_v49 = vadd.f32 %v910_v8, %v1844_v57 }
 0x176   : > { %v1057_v11 = vadd.f32 %v1856_v10, %v881_v7  ;;  %v1064_v12 = vadd.f32 %v1856_v10, %v916_v53 }
 0x177   : > { %v1063_v13 = vadd.f32 %v1856_v10, %v911_v49  ;;  %v660_v14 = vpop.f32.mrb[46].mxu0  ;;  %v1354_v15 = vpop.f32.mrb[46].mxu1 }
 0x178   : > { %1089 = vst [vmem:[%s1861_s6 + $0xb0] sm:$0xff] %v1057_v11  ;;  %1096 = vst [vmem:[%s1861_s6 + $0xe8] sm:$0xff] %v1064_v12  ;;  %v886_v61 = vadd.f32 %v1342_v38, %v660_v14  ;;  %v926_v16 = vadd.f32 %v1354_v15, %v1850_v5  ;;  %v920_v17 = vpop.f32.mrb[47].mxu1  ;;  %v662_v18 = vpop.f32.mrb[47].mxu0 }
 0x179   : > { %1095 = vst [vmem:[%s1861_s6 + $0xe0] sm:$0xff] %v1063_v13  ;;  %v921_v57 = vadd.f32 %v920_v17, %v1848_v1 }
 0x17a   : > { %v1058_v19 = vadd.f32 %v1856_v10, %v886_v61  ;;  %v1066_v20 = vadd.f32 %v1856_v10, %v926_v16 }
 0x17b   : > { %v1065_v21 = vadd.f32 %v1856_v10, %v921_v57 }
 0x17c   : > { %1090 = vst [vmem:[%s1861_s6 + $0xb8] sm:$0xff] %v1058_v19  ;;  %1098 = vst [vmem:[%s1861_s6 + $0xf8] sm:$0xff] %v1066_v20 }
 0x17d   : > { %1097 = vst [vmem:[%s1861_s6 + $0xf0] sm:$0xff] %v1065_v21 }
 0x17e PF: > { %s13_s14 = sadd.s32 1, %s1515_s14   ;;  %s1948_s12 = smov %s1511_s13 }
 0x17f   : > { %p10_p5 = scmp.ge.s32.totalorder %s13_s14, 4   ;;  %s1949_s13 = smov %s1951_s15 }
 0x181   :  { %12 = sbr.rel (!%p10_p5) target bundleno = 2 (0x2), region = 76 }

</bundles_post_ra>
